<compile_context>
chip_gen: v5e
topology: v5e:2x2
jax: 0.10.0
libtpu: 0.0.40
codegen_flags: <defaults>
</compile_context>

<pallas_src>
import numpy as np
import jax
import jax.numpy as jnp
from jax.experimental import pallas as pl
from jax.experimental.pallas import tpu as pltpu

EPS = 1e-5
LANE = 128


def _round_up(x, m):
    return (x + m - 1) // m * m


def _make_kernel(Wp, OFF, Prow, Cp):
    """Build the per-image kernel (static geometry closed over)."""

    def kernel(xbig_ref, mask_ref, w1_ref, b1_ref, w2_ref, b2_ref,
               out_ref, mid_ref):
        FLAT = mid_ref.shape[0]
        tail = FLAT - OFF - Prow

        # Zero only the small shift margins of the conv2-input scratch (two
        # aligned stores, ~48 rows total); the interior is fully overwritten
        # below, so correctness does not depend on grid order or on which
        # core's scratch instance we got.
        mid_ref[pl.ds(0, OFF), :] = jnp.zeros((OFF, Cp), mid_ref.dtype)
        mid_ref[pl.ds(OFF + Prow, tail), :] = jnp.zeros((tail, Cp), mid_ref.dtype)

        def conv3x3(src_ref, w_ref, init):
            # Output flat row k needs src[k + (dh-1)*Wp + (dw-1)] per tap; the
            # plane lives at static offset OFF of the flat buffer, so every
            # tap is one contiguous, statically-offset sublane slice.
            acc = init
            for dh in range(3):
                for dw in range(3):
                    s = (dh - 1) * Wp + (dw - 1)
                    tap = src_ref[pl.ds(OFF + s, Prow), :].astype(jnp.bfloat16)
                    acc = acc + jnp.dot(tap, w_ref[dh, dw],
                                        preferred_element_type=jnp.float32)
            return acc

        mask = mask_ref[...]                                  # (Prow, 1) 0/1

        # conv1 (BN1 scale folded into w1, bias folded into the acc init)
        # + ReLU, halo rows masked back to 0 so conv2 sees correct padding.
        init1 = jnp.broadcast_to(b1_ref[...], (Prow, Cp))
        mid = jnp.maximum(conv3x3(xbig_ref, w1_ref, init1), 0.0) * mask
        mid_ref[pl.ds(OFF, Prow), :] = mid                    # aligned store

        # conv2 (BN2 folded): acc init carries bias + exact f32 residual.
        residual = xbig_ref[pl.ds(OFF, Prow), :]
        init2 = residual + jnp.broadcast_to(b2_ref[...], (Prow, Cp))
        out = conv3x3(mid_ref, w2_ref, init2)
        out_ref[...] = jnp.maximum(out, 0.0).astype(out_ref.dtype)

    return kernel


def basic_block_forward(x_nchw, w1, g1, be1, m1, v1, w2, g2, be2, m2, v2):
    """BasicBlock forward (eval-mode BN). x_nchw: (N,C,H,W); w*: (3,3,Cin,Cout)."""
    N, C, H, W = x_nchw.shape
    Cout = w1.shape[-1]
    assert w1.shape[2] == C and Cout == C, \
        "BasicBlock with downsample=None requires inplanes == planes"

    Cp = _round_up(max(C, LANE), LANE)          # lane-dense channel width
    Hp, Wp = H + 2, W + 2
    P = Hp * Wp                                  # padded plane, flattened
    Prow = _round_up(P, 8)                       # compute rows (sublane mult.)
    OFF = _round_up(Wp + 1, 8)                   # plane offset inside buffer
    FLAT = _round_up(OFF + Prow + Wp + 1, 8)     # flat buffer length w/ margins

    # ---- fold eval-mode BN into the conv weights (per-out-channel scale) ----
    s1 = g1 / jnp.sqrt(v1 + EPS)
    b1 = be1 - m1 * s1
    s2 = g2 / jnp.sqrt(v2 + EPS)
    b2 = be2 - m2 * s2

    def pad_w(w, scale):
        wf = (w * scale[None, None, None, :]).astype(jnp.float32)
        wp = jnp.zeros((3, 3, Cp, Cp), jnp.float32)
        wp = wp.at[:, :, :w.shape[2], :w.shape[3]].set(wf)
        return wp.astype(jnp.bfloat16)           # bf16 MXU operand

    w1p, w2p = pad_w(w1, s1), pad_w(w2, s2)
    b1p = jnp.zeros((1, Cp), jnp.float32).at[0, :Cout].set(b1)
    b2p = jnp.zeros((1, Cp), jnp.float32).at[0, :Cout].set(b2)

    # ---- NHWC, channel pad, halo pad, flatten plane, add shift margins ----
    x = jnp.transpose(x_nchw, (0, 2, 3, 1)).astype(jnp.float32)
    x = jnp.pad(x, ((0, 0), (1, 1), (1, 1), (0, Cp - C)))
    x = x.reshape(N, P, Cp)
    xbig = jnp.pad(x, ((0, 0), (OFF, FLAT - OFF - P), (0, 0)))

    # interior mask over flat rows (1 where the row maps to a real pixel)
    kk = np.arange(Prow)
    hh, ww = kk // Wp, kk % Wp
    mask_np = (kk < P) & (hh >= 1) & (hh <= H) & (ww >= 1) & (ww <= W)
    mask = jnp.asarray(mask_np.astype(np.float32)[:, None])   # (Prow, 1)

    kernel = _make_kernel(Wp, OFF, Prow, Cp)

    grid_spec = pltpu.PrefetchScalarGridSpec(
        num_scalar_prefetch=0,
        grid=(N,),                                             # one image / step
        in_specs=[
            pl.BlockSpec((None, FLAT, Cp), lambda n: (n, 0, 0)),     # x (flat, padded)
            pl.BlockSpec((Prow, 1), lambda n: (0, 0)),               # interior mask
            pl.BlockSpec((3, 3, Cp, Cp), lambda n: (0, 0, 0, 0)),    # w1 (resident)
            pl.BlockSpec((1, Cp), lambda n: (0, 0)),                 # b1
            pl.BlockSpec((3, 3, Cp, Cp), lambda n: (0, 0, 0, 0)),    # w2 (resident)
            pl.BlockSpec((1, Cp), lambda n: (0, 0)),                 # b2
        ],
        out_specs=pl.BlockSpec((None, Prow, Cp), lambda n: (n, 0, 0)),
        scratch_shapes=[pltpu.VMEM((FLAT, Cp), jnp.float32)],        # conv2 input
    )

    out_flat = pl.pallas_call(
        kernel,
        out_shape=jax.ShapeDtypeStruct((N, Prow, Cp), x_nchw.dtype),
        grid_spec=grid_spec,
        compiler_params=pltpu.CompilerParams(
            # batch axis is independent -> shard across TCs on 2-core chips
            dimension_semantics=("parallel",),
            # explicit scoped-VMEM budget (tiles here are well under this;
            # raise further only when growing per-step tiles)
            vmem_limit_bytes=32 * 1024 * 1024,
        ),
    )(xbig, mask, w1p, b1p, w2p, b2p)

    # extract the interior once, in the wrapper (layout plumbing, not compute)
    out = out_flat[:, :P, :].reshape(N, Hp, Wp, Cp)[:, 1:1 + H, 1:1 + W, :Cout]
    return jnp.transpose(out, (0, 3, 1, 2))                   # back to NCHW


def reference_forward(x, w1, g1, be1, m1, v1, w2, g2, be2, m2, v2):
    """Plain-JAX reference mirroring the PyTorch module (eval-mode BN)."""
    def conv(inp, w_hwio):
        return jax.lax.conv_general_dilated(
            inp, jnp.transpose(w_hwio, (3, 2, 0, 1)),
            window_strides=(1, 1), padding="SAME",
            dimension_numbers=("NCHW", "OIHW", "NCHW"))

    def bn(inp, g, b, m, v):
        g, b, m, v = (t[None, :, None, None] for t in (g, b, m, v))
        return (inp - m) / jnp.sqrt(v + EPS) * g + b

    out = jax.nn.relu(bn(conv(x, w1), g1, be1, m1, v1))
    out = bn(conv(out, w2), g2, be2, m2, v2)
    return jax.nn.relu(out + x)


if __name__ == "__main__":
    key = jax.random.PRNGKey(0)
    N, C, H, W = 2, 4, 16, 16        # inplanes == planes (downsample is None)
    planes = C

    ks = jax.random.split(key, 11)
    x = jax.random.normal(ks[0], (N, C, H, W), jnp.float32)

    w1 = jax.random.normal(ks[1], (3, 3, C, planes), jnp.float32) * 0.2
    g1 = jax.random.normal(ks[2], (planes,), jnp.float32) * 0.1 + 1.0
    be1 = jax.random.normal(ks[3], (planes,), jnp.float32) * 0.1
    m1 = jax.random.normal(ks[4], (planes,), jnp.float32) * 0.1
    v1 = jnp.abs(jax.random.normal(ks[5], (planes,), jnp.float32)) * 0.5 + 0.5

    w2 = jax.random.normal(ks[6], (3, 3, planes, planes), jnp.float32) * 0.2
    g2 = jax.random.normal(ks[7], (planes,), jnp.float32) * 0.1 + 1.0
    be2 = jax.random.normal(ks[8], (planes,), jnp.float32) * 0.1
    m2 = jax.random.normal(ks[9], (planes,), jnp.float32) * 0.1
    v2 = jnp.abs(jax.random.normal(ks[10], (planes,), jnp.float32)) * 0.5 + 0.5

    params = (w1, g1, be1, m1, v1, w2, g2, be2, m2, v2)

    out = jax.block_until_ready(basic_block_forward(x, *params))
    ref = jax.block_until_ready(reference_forward(x, *params))

    assert out.shape == (N, planes, H, W)
    max_err = float(jnp.max(jnp.abs(out - ref)))
    # Tolerance sized for bf16 MXU operands (f32 accumulation, exact f32 residual).
    assert jnp.allclose(out, ref, atol=1e-1, rtol=1e-2), f"max abs err {max_err}"
    print("KERNEL_OK")
</pallas_src>

<mosaic_0001>
module attributes {stable_mosaic.version = 11 : i64} {
  func.func @kernel(%arg0: i32, %arg1: memref<1x376x128xf32, #tpu.memory_space<vmem>>, %arg2: memref<328x1xf32, #tpu.memory_space<vmem>>, %arg3: memref<3x3x128x128xbf16, #tpu.memory_space<vmem>>, %arg4: memref<1x128xf32, #tpu.memory_space<vmem>>, %arg5: memref<3x3x128x128xbf16, #tpu.memory_space<vmem>>, %arg6: memref<1x128xf32, #tpu.memory_space<vmem>>, %arg7: memref<1x328x128xf32, #tpu.memory_space<vmem>>, %arg8: memref<376x128xf32, #tpu.memory_space<vmem>>) attributes {dimension_semantics = [#tpu.dimension_semantics<parallel>], iteration_bounds = array<i64: 2>, scalar_prefetch = 0 : i64, scratch_operands = 1 : i64, tpu.core_type = #tpu.core_type<tc>, window_params = [{transform_indices = @transform_0, window_bounds = array<i64: 1, 376, 128>}, {pipeline_mode = #tpu.pipeline_mode<synchronous>, transform_indices = @transform_1, window_bounds = array<i64: 328, 1>}, {pipeline_mode = #tpu.pipeline_mode<synchronous>, transform_indices = @transform_2, window_bounds = array<i64: 3, 3, 128, 128>}, {pipeline_mode = #tpu.pipeline_mode<synchronous>, transform_indices = @transform_3, window_bounds = array<i64: 1, 128>}, {pipeline_mode = #tpu.pipeline_mode<synchronous>, transform_indices = @transform_4, window_bounds = array<i64: 3, 3, 128, 128>}, {pipeline_mode = #tpu.pipeline_mode<synchronous>, transform_indices = @transform_5, window_bounds = array<i64: 1, 128>}, {transform_indices = @transform_6, window_bounds = array<i64: 1, 328, 128>}]} {
    %cst = arith.constant 0.000000e+00 : f32
    %0 = vector.broadcast %cst : f32 to vector<24x128xf32>
    %c0 = arith.constant 0 : index
    %c0_0 = arith.constant 0 : index
    %1 = vector.load %arg8[%c0, %c0_0] : memref<376x128xf32, #tpu.memory_space<vmem>>, vector<24x128xf32>
    tpu.vector_store %arg8[%c0, %c0_0], %0 {strides = array<i32>} : memref<376x128xf32, #tpu.memory_space<vmem>>, vector<24x128xf32>,
    %cst_1 = arith.constant 0.000000e+00 : f32
    %2 = vector.broadcast %cst_1 : f32 to vector<24x128xf32>
    %c352 = arith.constant 352 : index
    %c0_2 = arith.constant 0 : index
    %3 = vector.load %arg8[%c352, %c0_2] : memref<376x128xf32, #tpu.memory_space<vmem>>, vector<24x128xf32>
    tpu.vector_store %arg8[%c352, %c0_2], %2 {strides = array<i32>} : memref<376x128xf32, #tpu.memory_space<vmem>>, vector<24x128xf32>,
    %c0_3 = arith.constant 0 : index
    %c0_4 = arith.constant 0 : index
    %4 = vector.load %arg2[%c0_3, %c0_4] : memref<328x1xf32, #tpu.memory_space<vmem>>, vector<328x1xf32>
    %c0_5 = arith.constant 0 : index
    %c0_6 = arith.constant 0 : index
    %5 = vector.load %arg4[%c0_5, %c0_6] : memref<1x128xf32, #tpu.memory_space<vmem>>, vector<1x128xf32>
    %6 = vector.shape_cast %5 : vector<1x128xf32> to vector<1x128xf32>
    %7 = vector.broadcast %6 : vector<1x128xf32> to vector<328x128xf32>
    %c0_7 = arith.constant 0 : index
    %c5 = arith.constant 5 : index
    %c0_8 = arith.constant 0 : index
    %8 = vector.load %arg1[%c0_7, %c5, %c0_8] : memref<1x376x128xf32, #tpu.memory_space<vmem>>, vector<1x328x128xf32>
    %9 = vector.shape_cast %8 : vector<1x328x128xf32> to vector<328x128xf32>
    %10 = arith.truncf %9 : vector<328x128xf32> to vector<328x128xbf16>
    %c0_9 = arith.constant 0 : index
    %c0_10 = arith.constant 0 : index
    %c0_11 = arith.constant 0 : index
    %c0_12 = arith.constant 0 : index
    %11 = vector.load %arg3[%c0_9, %c0_10, %c0_11, %c0_12] : memref<3x3x128x128xbf16, #tpu.memory_space<vmem>>, vector<1x1x128x128xbf16>
    %12 = vector.shape_cast %11 : vector<1x1x128x128xbf16> to vector<128x128xbf16>
    %cst_13 = arith.constant dense<0.000000e+00> : vector<328x128xf32>
    %13 = tpu.matmul %10, %12, %cst_13 {dimension_numbers = #tpu.dot_dimension_numbers<[1], [0], [0], [1], [0, 0, 1, 1], [], []>} : vector<328x128xbf16>, vector<128x128xbf16>, vector<328x128xf32> -> vector<328x128xf32>
    %14 = arith.addf %7, %13 : vector<328x128xf32>
    %c0_14 = arith.constant 0 : index
    %c6 = arith.constant 6 : index
    %c0_15 = arith.constant 0 : index
    %15 = vector.load %arg1[%c0_14, %c6, %c0_15] : memref<1x376x128xf32, #tpu.memory_space<vmem>>, vector<1x328x128xf32>
    %16 = vector.shape_cast %15 : vector<1x328x128xf32> to vector<328x128xf32>
    %17 = arith.truncf %16 : vector<328x128xf32> to vector<328x128xbf16>
    %c0_16 = arith.constant 0 : index
    %c1 = arith.constant 1 : index
    %c0_17 = arith.constant 0 : index
    %c0_18 = arith.constant 0 : index
    %18 = vector.load %arg3[%c0_16, %c1, %c0_17, %c0_18] : memref<3x3x128x128xbf16, #tpu.memory_space<vmem>>, vector<1x1x128x128xbf16>
    %19 = vector.shape_cast %18 : vector<1x1x128x128xbf16> to vector<128x128xbf16>
    %cst_19 = arith.constant dense<0.000000e+00> : vector<328x128xf32>
    %20 = tpu.matmul %17, %19, %cst_19 {dimension_numbers = #tpu.dot_dimension_numbers<[1], [0], [0], [1], [0, 0, 1, 1], [], []>} : vector<328x128xbf16>, vector<128x128xbf16>, vector<328x128xf32> -> vector<328x128xf32>
    %21 = arith.addf %14, %20 : vector<328x128xf32>
    %c0_20 = arith.constant 0 : index
    %c7 = arith.constant 7 : index
    %c0_21 = arith.constant 0 : index
    %22 = vector.load %arg1[%c0_20, %c7, %c0_21] : memref<1x376x128xf32, #tpu.memory_space<vmem>>, vector<1x328x128xf32>
    %23 = vector.shape_cast %22 : vector<1x328x128xf32> to vector<328x128xf32>
    %24 = arith.truncf %23 : vector<328x128xf32> to vector<328x128xbf16>
    %c0_22 = arith.constant 0 : index
    %c2 = arith.constant 2 : index
    %c0_23 = arith.constant 0 : index
    %c0_24 = arith.constant 0 : index
    %25 = vector.load %arg3[%c0_22, %c2, %c0_23, %c0_24] : memref<3x3x128x128xbf16, #tpu.memory_space<vmem>>, vector<1x1x128x128xbf16>
    %26 = vector.shape_cast %25 : vector<1x1x128x128xbf16> to vector<128x128xbf16>
    %cst_25 = arith.constant dense<0.000000e+00> : vector<328x128xf32>
    %27 = tpu.matmul %24, %26, %cst_25 {dimension_numbers = #tpu.dot_dimension_numbers<[1], [0], [0], [1], [0, 0, 1, 1], [], []>} : vector<328x128xbf16>, vector<128x128xbf16>, vector<328x128xf32> -> vector<328x128xf32>
    %28 = arith.addf %21, %27 : vector<328x128xf32>
    %c0_26 = arith.constant 0 : index
    %c23 = arith.constant 23 : index
    %c0_27 = arith.constant 0 : index
    %29 = vector.load %arg1[%c0_26, %c23, %c0_27] : memref<1x376x128xf32, #tpu.memory_space<vmem>>, vector<1x328x128xf32>
    %30 = vector.shape_cast %29 : vector<1x328x128xf32> to vector<328x128xf32>
    %31 = arith.truncf %30 : vector<328x128xf32> to vector<328x128xbf16>
    %c1_28 = arith.constant 1 : index
    %c0_29 = arith.constant 0 : index
    %c0_30 = arith.constant 0 : index
    %c0_31 = arith.constant 0 : index
    %32 = vector.load %arg3[%c1_28, %c0_29, %c0_30, %c0_31] : memref<3x3x128x128xbf16, #tpu.memory_space<vmem>>, vector<1x1x128x128xbf16>
    %33 = vector.shape_cast %32 : vector<1x1x128x128xbf16> to vector<128x128xbf16>
    %cst_32 = arith.constant dense<0.000000e+00> : vector<328x128xf32>
    %34 = tpu.matmul %31, %33, %cst_32 {dimension_numbers = #tpu.dot_dimension_numbers<[1], [0], [0], [1], [0, 0, 1, 1], [], []>} : vector<328x128xbf16>, vector<128x128xbf16>, vector<328x128xf32> -> vector<328x128xf32>
    %35 = arith.addf %28, %34 : vector<328x128xf32>
    %c0_33 = arith.constant 0 : index
    %c24 = arith.constant 24 : index
    %c0_34 = arith.constant 0 : index
    %36 = vector.load %arg1[%c0_33, %c24, %c0_34] : memref<1x376x128xf32, #tpu.memory_space<vmem>>, vector<1x328x128xf32>
    %37 = vector.shape_cast %36 : vector<1x328x128xf32> to vector<328x128xf32>
    %38 = arith.truncf %37 : vector<328x128xf32> to vector<328x128xbf16>
    %c1_35 = arith.constant 1 : index
    %c1_36 = arith.constant 1 : index
    %c0_37 = arith.constant 0 : index
    %c0_38 = arith.constant 0 : index
    %39 = vector.load %arg3[%c1_35, %c1_36, %c0_37, %c0_38] : memref<3x3x128x128xbf16, #tpu.memory_space<vmem>>, vector<1x1x128x128xbf16>
    %40 = vector.shape_cast %39 : vector<1x1x128x128xbf16> to vector<128x128xbf16>
    %cst_39 = arith.constant dense<0.000000e+00> : vector<328x128xf32>
    %41 = tpu.matmul %38, %40, %cst_39 {dimension_numbers = #tpu.dot_dimension_numbers<[1], [0], [0], [1], [0, 0, 1, 1], [], []>} : vector<328x128xbf16>, vector<128x128xbf16>, vector<328x128xf32> -> vector<328x128xf32>
    %42 = arith.addf %35, %41 : vector<328x128xf32>
    %c0_40 = arith.constant 0 : index
    %c25 = arith.constant 25 : index
    %c0_41 = arith.constant 0 : index
    %43 = vector.load %arg1[%c0_40, %c25, %c0_41] : memref<1x376x128xf32, #tpu.memory_space<vmem>>, vector<1x328x128xf32>
    %44 = vector.shape_cast %43 : vector<1x328x128xf32> to vector<328x128xf32>
    %45 = arith.truncf %44 : vector<328x128xf32> to vector<328x128xbf16>
    %c1_42 = arith.constant 1 : index
    %c2_43 = arith.constant 2 : index
    %c0_44 = arith.constant 0 : index
    %c0_45 = arith.constant 0 : index
    %46 = vector.load %arg3[%c1_42, %c2_43, %c0_44, %c0_45] : memref<3x3x128x128xbf16, #tpu.memory_space<vmem>>, vector<1x1x128x128xbf16>
    %47 = vector.shape_cast %46 : vector<1x1x128x128xbf16> to vector<128x128xbf16>
    %cst_46 = arith.constant dense<0.000000e+00> : vector<328x128xf32>
    %48 = tpu.matmul %45, %47, %cst_46 {dimension_numbers = #tpu.dot_dimension_numbers<[1], [0], [0], [1], [0, 0, 1, 1], [], []>} : vector<328x128xbf16>, vector<128x128xbf16>, vector<328x128xf32> -> vector<328x128xf32>
    %49 = arith.addf %42, %48 : vector<328x128xf32>
    %c0_47 = arith.constant 0 : index
    %c41 = arith.constant 41 : index
    %c0_48 = arith.constant 0 : index
    %50 = vector.load %arg1[%c0_47, %c41, %c0_48] : memref<1x376x128xf32, #tpu.memory_space<vmem>>, vector<1x328x128xf32>
    %51 = vector.shape_cast %50 : vector<1x328x128xf32> to vector<328x128xf32>
    %52 = arith.truncf %51 : vector<328x128xf32> to vector<328x128xbf16>
    %c2_49 = arith.constant 2 : index
    %c0_50 = arith.constant 0 : index
    %c0_51 = arith.constant 0 : index
    %c0_52 = arith.constant 0 : index
    %53 = vector.load %arg3[%c2_49, %c0_50, %c0_51, %c0_52] : memref<3x3x128x128xbf16, #tpu.memory_space<vmem>>, vector<1x1x128x128xbf16>
    %54 = vector.shape_cast %53 : vector<1x1x128x128xbf16> to vector<128x128xbf16>
    %cst_53 = arith.constant dense<0.000000e+00> : vector<328x128xf32>
    %55 = tpu.matmul %52, %54, %cst_53 {dimension_numbers = #tpu.dot_dimension_numbers<[1], [0], [0], [1], [0, 0, 1, 1], [], []>} : vector<328x128xbf16>, vector<128x128xbf16>, vector<328x128xf32> -> vector<328x128xf32>
    %56 = arith.addf %49, %55 : vector<328x128xf32>
    %c0_54 = arith.constant 0 : index
    %c42 = arith.constant 42 : index
    %c0_55 = arith.constant 0 : index
    %57 = vector.load %arg1[%c0_54, %c42, %c0_55] : memref<1x376x128xf32, #tpu.memory_space<vmem>>, vector<1x328x128xf32>
    %58 = vector.shape_cast %57 : vector<1x328x128xf32> to vector<328x128xf32>
    %59 = arith.truncf %58 : vector<328x128xf32> to vector<328x128xbf16>
    %c2_56 = arith.constant 2 : index
    %c1_57 = arith.constant 1 : index
    %c0_58 = arith.constant 0 : index
    %c0_59 = arith.constant 0 : index
    %60 = vector.load %arg3[%c2_56, %c1_57, %c0_58, %c0_59] : memref<3x3x128x128xbf16, #tpu.memory_space<vmem>>, vector<1x1x128x128xbf16>
    %61 = vector.shape_cast %60 : vector<1x1x128x128xbf16> to vector<128x128xbf16>
    %cst_60 = arith.constant dense<0.000000e+00> : vector<328x128xf32>
    %62 = tpu.matmul %59, %61, %cst_60 {dimension_numbers = #tpu.dot_dimension_numbers<[1], [0], [0], [1], [0, 0, 1, 1], [], []>} : vector<328x128xbf16>, vector<128x128xbf16>, vector<328x128xf32> -> vector<328x128xf32>
    %63 = arith.addf %56, %62 : vector<328x128xf32>
    %c0_61 = arith.constant 0 : index
    %c43 = arith.constant 43 : index
    %c0_62 = arith.constant 0 : index
    %64 = vector.load %arg1[%c0_61, %c43, %c0_62] : memref<1x376x128xf32, #tpu.memory_space<vmem>>, vector<1x328x128xf32>
    %65 = vector.shape_cast %64 : vector<1x328x128xf32> to vector<328x128xf32>
    %66 = arith.truncf %65 : vector<328x128xf32> to vector<328x128xbf16>
    %c2_63 = arith.constant 2 : index
    %c2_64 = arith.constant 2 : index
    %c0_65 = arith.constant 0 : index
    %c0_66 = arith.constant 0 : index
    %67 = vector.load %arg3[%c2_63, %c2_64, %c0_65, %c0_66] : memref<3x3x128x128xbf16, #tpu.memory_space<vmem>>, vector<1x1x128x128xbf16>
    %68 = vector.shape_cast %67 : vector<1x1x128x128xbf16> to vector<128x128xbf16>
    %cst_67 = arith.constant dense<0.000000e+00> : vector<328x128xf32>
    %69 = tpu.matmul %66, %68, %cst_67 {dimension_numbers = #tpu.dot_dimension_numbers<[1], [0], [0], [1], [0, 0, 1, 1], [], []>} : vector<328x128xbf16>, vector<128x128xbf16>, vector<328x128xf32> -> vector<328x128xf32>
    %70 = arith.addf %63, %69 : vector<328x128xf32>
    %cst_68 = arith.constant 0.000000e+00 : f32
    %71 = vector.broadcast %cst_68 : f32 to vector<328x128xf32>
    %72 = arith.maximumf %70, %71 : vector<328x128xf32>
    %73 = vector.broadcast %4 : vector<328x1xf32> to vector<328x128xf32>
    %74 = arith.mulf %72, %73 : vector<328x128xf32>
    %c24_69 = arith.constant 24 : index
    %c0_70 = arith.constant 0 : index
    %75 = vector.load %arg8[%c24_69, %c0_70] : memref<376x128xf32, #tpu.memory_space<vmem>>, vector<328x128xf32>
    tpu.vector_store %arg8[%c24_69, %c0_70], %74 {strides = array<i32>} : memref<376x128xf32, #tpu.memory_space<vmem>>, vector<328x128xf32>,
    %c0_71 = arith.constant 0 : index
    %c24_72 = arith.constant 24 : index
    %c0_73 = arith.constant 0 : index
    %76 = vector.load %arg1[%c0_71, %c24_72, %c0_73] : memref<1x376x128xf32, #tpu.memory_space<vmem>>, vector<1x328x128xf32>
    %77 = vector.shape_cast %76 : vector<1x328x128xf32> to vector<328x128xf32>
    %c0_74 = arith.constant 0 : index
    %c0_75 = arith.constant 0 : index
    %78 = vector.load %arg6[%c0_74, %c0_75] : memref<1x128xf32, #tpu.memory_space<vmem>>, vector<1x128xf32>
    %79 = vector.shape_cast %78 : vector<1x128xf32> to vector<1x128xf32>
    %80 = vector.broadcast %79 : vector<1x128xf32> to vector<328x128xf32>
    %81 = arith.addf %77, %80 : vector<328x128xf32>
    %c5_76 = arith.constant 5 : index
    %c0_77 = arith.constant 0 : index
    %82 = vector.load %arg8[%c5_76, %c0_77] : memref<376x128xf32, #tpu.memory_space<vmem>>, vector<328x128xf32>
    %83 = arith.truncf %82 : vector<328x128xf32> to vector<328x128xbf16>
    %c0_78 = arith.constant 0 : index
    %c0_79 = arith.constant 0 : index
    %c0_80 = arith.constant 0 : index
    %c0_81 = arith.constant 0 : index
    %84 = vector.load %arg5[%c0_78, %c0_79, %c0_80, %c0_81] : memref<3x3x128x128xbf16, #tpu.memory_space<vmem>>, vector<1x1x128x128xbf16>
    %85 = vector.shape_cast %84 : vector<1x1x128x128xbf16> to vector<128x128xbf16>
    %cst_82 = arith.constant dense<0.000000e+00> : vector<328x128xf32>
    %86 = tpu.matmul %83, %85, %cst_82 {dimension_numbers = #tpu.dot_dimension_numbers<[1], [0], [0], [1], [0, 0, 1, 1], [], []>} : vector<328x128xbf16>, vector<128x128xbf16>, vector<328x128xf32> -> vector<328x128xf32>
    %87 = arith.addf %81, %86 : vector<328x128xf32>
    %c6_83 = arith.constant 6 : index
    %c0_84 = arith.constant 0 : index
    %88 = vector.load %arg8[%c6_83, %c0_84] : memref<376x128xf32, #tpu.memory_space<vmem>>, vector<328x128xf32>
    %89 = arith.truncf %88 : vector<328x128xf32> to vector<328x128xbf16>
    %c0_85 = arith.constant 0 : index
    %c1_86 = arith.constant 1 : index
    %c0_87 = arith.constant 0 : index
    %c0_88 = arith.constant 0 : index
    %90 = vector.load %arg5[%c0_85, %c1_86, %c0_87, %c0_88] : memref<3x3x128x128xbf16, #tpu.memory_space<vmem>>, vector<1x1x128x128xbf16>
    %91 = vector.shape_cast %90 : vector<1x1x128x128xbf16> to vector<128x128xbf16>
    %cst_89 = arith.constant dense<0.000000e+00> : vector<328x128xf32>
    %92 = tpu.matmul %89, %91, %cst_89 {dimension_numbers = #tpu.dot_dimension_numbers<[1], [0], [0], [1], [0, 0, 1, 1], [], []>} : vector<328x128xbf16>, vector<128x128xbf16>, vector<328x128xf32> -> vector<328x128xf32>
    %93 = arith.addf %87, %92 : vector<328x128xf32>
    %c7_90 = arith.constant 7 : index
    %c0_91 = arith.constant 0 : index
    %94 = vector.load %arg8[%c7_90, %c0_91] : memref<376x128xf32, #tpu.memory_space<vmem>>, vector<328x128xf32>
    %95 = arith.truncf %94 : vector<328x128xf32> to vector<328x128xbf16>
    %c0_92 = arith.constant 0 : index
    %c2_93 = arith.constant 2 : index
    %c0_94 = arith.constant 0 : index
    %c0_95 = arith.constant 0 : index
    %96 = vector.load %arg5[%c0_92, %c2_93, %c0_94, %c0_95] : memref<3x3x128x128xbf16, #tpu.memory_space<vmem>>, vector<1x1x128x128xbf16>
    %97 = vector.shape_cast %96 : vector<1x1x128x128xbf16> to vector<128x128xbf16>
    %cst_96 = arith.constant dense<0.000000e+00> : vector<328x128xf32>
    %98 = tpu.matmul %95, %97, %cst_96 {dimension_numbers = #tpu.dot_dimension_numbers<[1], [0], [0], [1], [0, 0, 1, 1], [], []>} : vector<328x128xbf16>, vector<128x128xbf16>, vector<328x128xf32> -> vector<328x128xf32>
    %99 = arith.addf %93, %98 : vector<328x128xf32>
    %c23_97 = arith.constant 23 : index
    %c0_98 = arith.constant 0 : index
    %100 = vector.load %arg8[%c23_97, %c0_98] : memref<376x128xf32, #tpu.memory_space<vmem>>, vector<328x128xf32>
    %101 = arith.truncf %100 : vector<328x128xf32> to vector<328x128xbf16>
    %c1_99 = arith.constant 1 : index
    %c0_100 = arith.constant 0 : index
    %c0_101 = arith.constant 0 : index
    %c0_102 = arith.constant 0 : index
    %102 = vector.load %arg5[%c1_99, %c0_100, %c0_101, %c0_102] : memref<3x3x128x128xbf16, #tpu.memory_space<vmem>>, vector<1x1x128x128xbf16>
    %103 = vector.shape_cast %102 : vector<1x1x128x128xbf16> to vector<128x128xbf16>
    %cst_103 = arith.constant dense<0.000000e+00> : vector<328x128xf32>
    %104 = tpu.matmul %101, %103, %cst_103 {dimension_numbers = #tpu.dot_dimension_numbers<[1], [0], [0], [1], [0, 0, 1, 1], [], []>} : vector<328x128xbf16>, vector<128x128xbf16>, vector<328x128xf32> -> vector<328x128xf32>
    %105 = arith.addf %99, %104 : vector<328x128xf32>
    %c24_104 = arith.constant 24 : index
    %c0_105 = arith.constant 0 : index
    %106 = vector.load %arg8[%c24_104, %c0_105] : memref<376x128xf32, #tpu.memory_space<vmem>>, vector<328x128xf32>
    %107 = arith.truncf %106 : vector<328x128xf32> to vector<328x128xbf16>
    %c1_106 = arith.constant 1 : index
    %c1_107 = arith.constant 1 : index
    %c0_108 = arith.constant 0 : index
    %c0_109 = arith.constant 0 : index
    %108 = vector.load %arg5[%c1_106, %c1_107, %c0_108, %c0_109] : memref<3x3x128x128xbf16, #tpu.memory_space<vmem>>, vector<1x1x128x128xbf16>
    %109 = vector.shape_cast %108 : vector<1x1x128x128xbf16> to vector<128x128xbf16>
    %cst_110 = arith.constant dense<0.000000e+00> : vector<328x128xf32>
    %110 = tpu.matmul %107, %109, %cst_110 {dimension_numbers = #tpu.dot_dimension_numbers<[1], [0], [0], [1], [0, 0, 1, 1], [], []>} : vector<328x128xbf16>, vector<128x128xbf16>, vector<328x128xf32> -> vector<328x128xf32>
    %111 = arith.addf %105, %110 : vector<328x128xf32>
    %c25_111 = arith.constant 25 : index
    %c0_112 = arith.constant 0 : index
    %112 = vector.load %arg8[%c25_111, %c0_112] : memref<376x128xf32, #tpu.memory_space<vmem>>, vector<328x128xf32>
    %113 = arith.truncf %112 : vector<328x128xf32> to vector<328x128xbf16>
    %c1_113 = arith.constant 1 : index
    %c2_114 = arith.constant 2 : index
    %c0_115 = arith.constant 0 : index
    %c0_116 = arith.constant 0 : index
    %114 = vector.load %arg5[%c1_113, %c2_114, %c0_115, %c0_116] : memref<3x3x128x128xbf16, #tpu.memory_space<vmem>>, vector<1x1x128x128xbf16>
    %115 = vector.shape_cast %114 : vector<1x1x128x128xbf16> to vector<128x128xbf16>
    %cst_117 = arith.constant dense<0.000000e+00> : vector<328x128xf32>
    %116 = tpu.matmul %113, %115, %cst_117 {dimension_numbers = #tpu.dot_dimension_numbers<[1], [0], [0], [1], [0, 0, 1, 1], [], []>} : vector<328x128xbf16>, vector<128x128xbf16>, vector<328x128xf32> -> vector<328x128xf32>
    %117 = arith.addf %111, %116 : vector<328x128xf32>
    %c41_118 = arith.constant 41 : index
    %c0_119 = arith.constant 0 : index
    %118 = vector.load %arg8[%c41_118, %c0_119] : memref<376x128xf32, #tpu.memory_space<vmem>>, vector<328x128xf32>
    %119 = arith.truncf %118 : vector<328x128xf32> to vector<328x128xbf16>
    %c2_120 = arith.constant 2 : index
    %c0_121 = arith.constant 0 : index
    %c0_122 = arith.constant 0 : index
    %c0_123 = arith.constant 0 : index
    %120 = vector.load %arg5[%c2_120, %c0_121, %c0_122, %c0_123] : memref<3x3x128x128xbf16, #tpu.memory_space<vmem>>, vector<1x1x128x128xbf16>
    %121 = vector.shape_cast %120 : vector<1x1x128x128xbf16> to vector<128x128xbf16>
    %cst_124 = arith.constant dense<0.000000e+00> : vector<328x128xf32>
    %122 = tpu.matmul %119, %121, %cst_124 {dimension_numbers = #tpu.dot_dimension_numbers<[1], [0], [0], [1], [0, 0, 1, 1], [], []>} : vector<328x128xbf16>, vector<128x128xbf16>, vector<328x128xf32> -> vector<328x128xf32>
    %123 = arith.addf %117, %122 : vector<328x128xf32>
    %c42_125 = arith.constant 42 : index
    %c0_126 = arith.constant 0 : index
    %124 = vector.load %arg8[%c42_125, %c0_126] : memref<376x128xf32, #tpu.memory_space<vmem>>, vector<328x128xf32>
    %125 = arith.truncf %124 : vector<328x128xf32> to vector<328x128xbf16>
    %c2_127 = arith.constant 2 : index
    %c1_128 = arith.constant 1 : index
    %c0_129 = arith.constant 0 : index
    %c0_130 = arith.constant 0 : index
    %126 = vector.load %arg5[%c2_127, %c1_128, %c0_129, %c0_130] : memref<3x3x128x128xbf16, #tpu.memory_space<vmem>>, vector<1x1x128x128xbf16>
    %127 = vector.shape_cast %126 : vector<1x1x128x128xbf16> to vector<128x128xbf16>
    %cst_131 = arith.constant dense<0.000000e+00> : vector<328x128xf32>
    %128 = tpu.matmul %125, %127, %cst_131 {dimension_numbers = #tpu.dot_dimension_numbers<[1], [0], [0], [1], [0, 0, 1, 1], [], []>} : vector<328x128xbf16>, vector<128x128xbf16>, vector<328x128xf32> -> vector<328x128xf32>
    %129 = arith.addf %123, %128 : vector<328x128xf32>
    %c43_132 = arith.constant 43 : index
    %c0_133 = arith.constant 0 : index
    %130 = vector.load %arg8[%c43_132, %c0_133] : memref<376x128xf32, #tpu.memory_space<vmem>>, vector<328x128xf32>
    %131 = arith.truncf %130 : vector<328x128xf32> to vector<328x128xbf16>
    %c2_134 = arith.constant 2 : index
    %c2_135 = arith.constant 2 : index
    %c0_136 = arith.constant 0 : index
    %c0_137 = arith.constant 0 : index
    %132 = vector.load %arg5[%c2_134, %c2_135, %c0_136, %c0_137] : memref<3x3x128x128xbf16, #tpu.memory_space<vmem>>, vector<1x1x128x128xbf16>
    %133 = vector.shape_cast %132 : vector<1x1x128x128xbf16> to vector<128x128xbf16>
    %cst_138 = arith.constant dense<0.000000e+00> : vector<328x128xf32>
    %134 = tpu.matmul %131, %133, %cst_138 {dimension_numbers = #tpu.dot_dimension_numbers<[1], [0], [0], [1], [0, 0, 1, 1], [], []>} : vector<328x128xbf16>, vector<128x128xbf16>, vector<328x128xf32> -> vector<328x128xf32>
    %135 = arith.addf %129, %134 : vector<328x128xf32>
    %cst_139 = arith.constant 0.000000e+00 : f32
    %136 = vector.broadcast %cst_139 : f32 to vector<328x128xf32>
    %137 = arith.maximumf %135, %136 : vector<328x128xf32>
    %c0_140 = arith.constant 0 : index
    %c0_141 = arith.constant 0 : index
    %c0_142 = arith.constant 0 : index
    %138 = vector.load %arg7[%c0_140, %c0_141, %c0_142] : memref<1x328x128xf32, #tpu.memory_space<vmem>>, vector<1x328x128xf32>
    %139 = vector.shape_cast %138 : vector<1x328x128xf32> to vector<328x128xf32>
    %140 = vector.shape_cast %137 : vector<328x128xf32> to vector<1x328x128xf32>
    tpu.vector_store %arg7[%c0_140, %c0_141, %c0_142], %140 {strides = array<i32>} : memref<1x328x128xf32, #tpu.memory_space<vmem>>, vector<1x328x128xf32>,
    return
  }
  func.func @transform_0(%arg0: i32) -> (i32, i32, i32) {
    %c0_i32 = arith.constant 0 : i32
    %c0_i32_0 = arith.constant 0 : i32
    %c0_i32_1 = arith.constant 0 : i32
    return %arg0, %c0_i32, %c0_i32_0 : i32, i32, i32
  }
  func.func @transform_1(%arg0: i32) -> (i32, i32) {
    %c0_i32 = arith.constant 0 : i32
    %c0_i32_0 = arith.constant 0 : i32
    %c0_i32_1 = arith.constant 0 : i32
    return %c0_i32, %c0_i32_0 : i32, i32
  }
  func.func @transform_2(%arg0: i32) -> (i32, i32, i32, i32) {
    %c0_i32 = arith.constant 0 : i32
    %c0_i32_0 = arith.constant 0 : i32
    %c0_i32_1 = arith.constant 0 : i32
    %c0_i32_2 = arith.constant 0 : i32
    %c0_i32_3 = arith.constant 0 : i32
    return %c0_i32, %c0_i32_0, %c0_i32_1, %c0_i32_2 : i32, i32, i32, i32
  }
  func.func @transform_3(%arg0: i32) -> (i32, i32) {
    %c0_i32 = arith.constant 0 : i32
    %c0_i32_0 = arith.constant 0 : i32
    %c0_i32_1 = arith.constant 0 : i32
    return %c0_i32, %c0_i32_0 : i32, i32
  }
  func.func @transform_4(%arg0: i32) -> (i32, i32, i32, i32) {
    %c0_i32 = arith.constant 0 : i32
    %c0_i32_0 = arith.constant 0 : i32
    %c0_i32_1 = arith.constant 0 : i32
    %c0_i32_2 = arith.constant 0 : i32
    %c0_i32_3 = arith.constant 0 : i32
    return %c0_i32, %c0_i32_0, %c0_i32_1, %c0_i32_2 : i32, i32, i32, i32
  }
  func.func @transform_5(%arg0: i32) -> (i32, i32) {
    %c0_i32 = arith.constant 0 : i32
    %c0_i32_0 = arith.constant 0 : i32
    %c0_i32_1 = arith.constant 0 : i32
    return %c0_i32, %c0_i32_0 : i32, i32
  }
  func.func @transform_6(%arg0: i32) -> (i32, i32, i32) {
    %c0_i32 = arith.constant 0 : i32
    %c0_i32_0 = arith.constant 0 : i32
    %c0_i32_1 = arith.constant 0 : i32
    return %arg0, %c0_i32, %c0_i32_0 : i32, i32, i32
  }
}

</mosaic_0001>

<bundles_post_ra>
// kernel: tpu_custom_call.1
= control target key start
LH: loop header
LB: loop body
LE: loop exit
PB: predicated region body
PF: predicated region fallthrough
CT: control target
= control target key end

     0   :  { %s8607_s0 = inlined_call_operand.hbm [shape: f32[2,376,128], index: 0, kind: input, shape index: {}]   ;;  %s8608_s1 = inlined_call_operand.vmem [shape: f32[328,1], index: 1, kind: input, shape index: {}]   ;;  %s8609_s2 = inlined_call_operand.hbm [shape: bf16[3,3,128,128], index: 2, kind: input, shape index: {}]   ;;  %s8610_s3 = inlined_call_operand.vmem [shape: f32[1,128], index: 3, kind: input, shape index: {}]   ;;  %s8611_s4 = inlined_call_operand.hbm [shape: bf16[3,3,128,128], index: 4, kind: input, shape index: {}]   ;;  %s8612_s5 = inlined_call_operand.vmem [shape: f32[1,128], index: 5, kind: input, shape index: {}]   ;;  %s8613_s6 = inlined_call_operand.hbm [shape: f32[2,328,128], index: 6, kind: output, shape index: {}]  }
   0x1   :  { %8614 = sst [smem:[#allocation22_spill]] %s8609_s2 }
   0x2   :  { %8615 = sst [smem:[#allocation23_spill]] %s8611_s4 }
   0x3   :  { %11 = vsyncpa [#allocation4], 0 }
   0x4   :  { %13 = vsyncpa [#allocation4 + $0x1], 0 }
   0x5   :  { %14 = vsyncpa [#allocation7], 0 }
   0x6   :  { %15 = vsyncpa [#allocation5], 0 }
   0x7   :  { %17 = vsyncpa [#allocation5 + $0x1], 0  ;;  %s7057_s21 = smov 0   ;;  %s7059_s22 = smov 0  }
   0x8   :  { %s7061_s23 = smov 0   ;;  %s7063_s24 = smov 0  }
   0x9 LB: > { %s7078_s25 = sadd.s32 4294967295, %s7010_s24   ;;  %s6016_s26 = sadd.s32 4294967294, %s7010_s24   ;;  %s7010_s24 = sphi %s7063_s24, %s8645_s24   ;;  %s7006_s23 = sphi %s7061_s23, %s8644_s23   ;;  %s7002_s22 = sphi %s7059_s22, %s8643_s22   ;;  %s6998_s21 = sphi %s7057_s21, %s8642_s21  }
   0xa   : > { %p43_p0 = scmp.ne.s32.totalorder %s7002_s22, %s6998_s21  ;;  %p44_p1 = scmp.eq.s32.totalorder %s7078_s25, 0 }
   0xb   : > { %p172_p2 = scmp.eq.s32.totalorder %s7078_s25, 1  ;;  %p178_p3 = scmp.eq.s32.totalorder %s6016_s26, 1 }
   0xc   : > { %p7087_p4 = por %p44_p1, %p43_p0  ;;  %p6017_p5 = scmp.ge.s32.totalorder %s7010_s24, 1 }
   0xd   : > { %p7092_p6 = por %p178_p3, %p43_p0  ;;  %p185_p7 = scmp.lt.s32.totalorder %s7010_s24, 3 }
   0xe   : > { %s8618_s2 = sld [smem:[#allocation22_spill]]  ;;  %s7012_s9 = smov [#allocation6]  }
   0xf   : > { %p7100_p8 = pnand %p6017_p5, %p185_p7  ;;  %s201_s10 = sshll.u32 %s7012_s9, 4  ;;  %s202_s10 = int_to_ptr.vmem [resolvable:$true] %s201_s10 }
  0x10   : > { %s8620_s4 = sld [smem:[#allocation23_spill]]  ;;  %s7013_s14 = smov 64  }
  0x11   : > { %p6781_p9 = pneg %p7100_p8  ;;  %s7014_s15 = smov 4  }
  0x12   : > { %s7015_s16 = smov [#allocation8]   ;;  %s7113_s18 = sadd.s32 1, %s7010_s24  }
  0x13   : > { %p6782_p10 = pnand %p6781_p9, %p44_p1  ;;  %s218_s17 = sshll.u32 %s7015_s16, 4  ;;  %s219_s17 = int_to_ptr.vmem [resolvable:$true] %s218_s17 }
  0x14   : > { %s199_s7 = sshll.u32 %s8618_s2, 4  ;;  %s30_s19 = sadd.s32 1, %s7006_s23  ;;  %s200_s7 = int_to_ptr.hbm [resolvable:$true] %s199_s7 }
  0x15   : > { %6784 = dma.hbm_to_vmem [thread:$0]  (!%p6782_p10), %s200_s7, 9216, %s202_s10, [#allocation7], %s7013_s14, %s7013_s14, %s7014_s15  }
  0x16   : > { %s216_s13 = sshll.u32 %s8620_s4, 4  ;;  %s27_s20 = ssub.s32 %s7010_s24, %s7113_s18  ;;  %s217_s13 = int_to_ptr.hbm [resolvable:$true] %s216_s13 }
  0x17   : > { %6787 = dma.hbm_to_vmem [thread:$0]  (!%p6782_p10), %s217_s13, 9216, %s219_s17, [#allocation7], %s7013_s14, %s7013_s14, %s7014_s15  }
  0x18   : > { %p37_p12 = scmp.ne.s32.totalorder %s7006_s23, %s7002_s22  ;;  %p28_p13 = scmp.eq.s32.totalorder %s27_s20, 0 }
  0x19   : > { %p38_p0 = scmp.eq.s32.totalorder %s7010_s24, 0  ;;  %p6798_p5 = scmp.lt.s32.totalorder %s7010_s24, 2 }
  0x1a   : > { %p7123_p3 = por %p172_p2, %p37_p12  ;;  %s235_s30 = sand.u32 1, %s7006_s23  }
  0x1b   : > { %s7129_s29 = scalar_select %p28_p13, %s7006_s23, %s30_s19  }
  0x1c   : > { %p39_p7 = por %p38_p0, %p37_p12  ;;  %s6764_s7 = smul.u32 376, %s235_s30 }
  0x1d   : > { %s6765_s9 = smul.u32 376, %s7010_s24  ;;  %s236_s17 = scalar_lea.sflag [#allocation4], %s235_s30 }
  0x1e   : > { %p7133_p9 = pnand %p6798_p5, %p39_p7  ;;  %s239_s14 = scalar_lea.vmem [#allocation3], %s6764_s7 }
  0x1f   : > { %s244_s13 = scalar_lea.hbm %s8607_s0, %s6765_s9  ;;  %s247_s15 = sshll.u32 %s239_s14, 4  ;;  %s248_s15 = int_to_ptr.vmem [resolvable:$true] %s247_s15 }
  0x20   : > { %s245_s16 = sshll.u32 %s244_s13, 4  ;;  %p6914_p10 = pneg %p7133_p9  ;;  %s246_s16 = int_to_ptr.hbm [resolvable:$true] %s245_s16 }
  0x21   : > { %s6910_s19 = sshra.s32 %s246_s16, 4  ;;  %s6917_s11 = scalar_lea.hbm %s8607_s0, 752  ;;  %s6911_s19 = int_to_ptr.hbm [resolvable:$true] %s6910_s19 }
  0x22   : > { %s6912_s20 = scalar_lea.hbm %s6911_s19, 376  ;;  %p6918_p0 = scmp.lt.s32.totalorder %s6911_s19, %s8607_s0 }
  0x23   : > { %p6913_p2 = scmp.ne.s32.totalorder %s6911_s19, %s6912_s20  ;;  %p6919_p5 = scmp.lt.s32.totalorder %s6917_s11, %s6912_s20 }
  0x25   : > { %p6915_p12 = pnand %p6914_p10, %p6913_p2  ;;  %p6920_p7 = por %p6919_p5, %p6918_p0 }
  0x27   : > { %p6916_p13 = pneg %p6915_p12 }
  0x29   : > { %p6921_p11 = pnand %p6920_p7, %p6916_p13 }
  0x2b   : > { %6924 = shalt.err (!%p6921_p11)
}
  0x2c   : > { %s7016_s30 = smov 128   ;;  %s7017_s7 = smov 8  }
  0x2d   : > { %6791 = dma.hbm_to_vmem [thread:$0]  (!%p7133_p9), %s246_s16, 6016, %s248_s15, %s236_s17, %s7016_s30, %s7016_s30, %s7017_s7  }
  0x2e   : > { %259 = sbr.rel (%p7100_p8) target bundleno = 1862 (0x746), region = 44 }
  0x33   : > { %s7153_s2 = sand.u32 1, %s7002_s22  }
  0x34   : > { %s6766_s4 = smul.u32 376, %s7153_s2  ;;  %s262_s13 = scalar_lea.sflag [#allocation4], %s7153_s2 }
  0x36   : > { %s7157_s14 = scalar_lea.vmem [#allocation3], %s6766_s4 }
  0x37   : > { %6985 = dma.done.wait (%p7087_p4), %s262_s13, 6016  }
  0x38   : > { %6987 = vsyncadd (%p7087_p4), %s262_s13, 4294961280 }
  0x39   : > { %6989 = dma.done.wait (%p44_p1), [#allocation7], 18432  }
  0x3a   : > { %6991 = vsyncadd (%p44_p1), [#allocation7], 4294948864  ;;  %v6611_v0 = vld [vmem:[#allocation6 + $0x38] sm:$0xff]  ;;  %v6610_v2 = vld [vmem:[#allocation6 + $0x30] sm:$0xff]  ;;  %s6768_s13 = smul.u32 328, %s7078_s25  ;;  %s5909_s17 = scalar_lea.sflag [#allocation5], %s7153_s2 }
  0x3b   : > { %v6619_v1 = vld [vmem:[#allocation6 + $0x78] sm:$0xff]  ;;  %482 = vmatpush.bf16.msra.mxu0 %v6611_v0  ;;  %6748 = vmatpush.bf16.msra.mxu2 %v6611_v0  ;;  %v6618_v3 = vld [vmem:[#allocation6 + $0x70] sm:$0xff]  ;;  %v6609_v4 = vld [vmem:[#allocation6 + $0x28] sm:$0xff]  ;;  %s6960_s12 = scalar_lea.hbm %s8613_s6, 656 }
  0x3c   : > { %6756 = vmatpush.bf16.msra.mxu3 %v6619_v1  ;;  %763 = vmatpush.bf16.msra.mxu1 %v6619_v1  ;;  %v6617_v5 = vld [vmem:[#allocation6 + $0x68] sm:$0xff]  ;;  %v6608_v6 = vld [vmem:[#allocation6 + $0x20] sm:$0xff]  ;;  %v6607_v8 = vld [vmem:[#allocation6 + $0x18] sm:$0xff]  ;;  %s5920_s10 = scalar_lea.hbm %s8613_s6, %s6768_s13 }
  0x3d   : > { %v6616_v7 = vld [vmem:[#allocation6 + $0x60] sm:$0xff]  ;;  %v6615_v9 = vld [vmem:[#allocation6 + $0x58] sm:$0xff]  ;;  %v6606_v10 = vld [vmem:[#allocation6 + $0x10] sm:$0xff]  ;;  %s5923_s16 = sshll.u32 %s5920_s10, 4  ;;  %s5924_s16 = int_to_ptr.hbm [resolvable:$true] %s5923_s16 }
  0x3e   : > { %v6614_v11 = vld [vmem:[#allocation6 + $0x50] sm:$0xff]  ;;  %v6605_v12 = vld [vmem:[#allocation6 + $0x8] sm:$0xff]  ;;  %v6604_v14 = vld [vmem:[#allocation6] sm:$0xff]  ;;  %s6954_s25 = sshra.s32 %s5924_s16, 4  ;;  %s6955_s25 = int_to_ptr.hbm [resolvable:$true] %s6954_s25 }
  0x3f   : > { %483 = vmatpush.bf16.msra.mxu0 %v6610_v2  ;;  %6749 = vmatpush.bf16.msra.mxu2 %v6610_v2  ;;  %v6613_v13 = vld [vmem:[#allocation6 + $0x48] sm:$0xff]  ;;  %v6612_v15 = vld [vmem:[#allocation6 + $0x40] sm:$0xff]  ;;  %v6643_v24 = vld [vmem:[#allocation6 + $0x138] sm:$0xff]  ;;  %s6956_s19 = scalar_lea.hbm %s6955_s25, 328  ;;  %p6961_p11 = scmp.lt.s32.totalorder %s6955_s25, %s8613_s6 }
  0x40   : > { %6757 = vmatpush.bf16.msra.mxu3 %v6618_v3  ;;  %764 = vmatpush.bf16.msra.mxu1 %v6618_v3  ;;  %v356_v16 = vld [vmem:[%s7157_s14 + $0x5] sm:$0xff]  ;;  %v357_v17 = vld [vmem:[%s7157_s14 + $0xd] sm:$0xff]  ;;  %v378_v18 = vld [vmem:[%s7157_s14 + $0xb5] sm:$0xff]  ;;  %p6957_p1 = scmp.ne.s32.totalorder %s6955_s25, %s6956_s19  ;;  %p6962_p9 = scmp.lt.s32.totalorder %s6960_s12, %s6956_s19 }
  0x41   : > { %v379_v19 = vld [vmem:[%s7157_s14 + $0xbd] sm:$0xff]  ;;  %v636_v22 = vld [vmem:[%s7157_s14 + $0x6] sm:$0xff]  ;;  %v637_v23 = vld [vmem:[%s7157_s14 + $0xe] sm:$0xff]  ;;  %v397_v26 = vpack.c.bf16 %v357_v17, %v356_v16 }
  0x42   : > { %v658_v20 = vld [vmem:[%s7157_s14 + $0xb6] sm:$0xff]  ;;  %v659_v21 = vld [vmem:[%s7157_s14 + $0xbe] sm:$0xff]  ;;  %v408_v27 = vpack.c.bf16 %v379_v19, %v378_v18  ;;  %v677_v29 = vpack.c.bf16 %v637_v23, %v636_v22  ;;  %v381_v39 = vld [vmem:[%s7157_s14 + $0xcd] sm:$0xff]  ;;  %p6958_p4 = pnand %p6957_p1, %p7123_p3  ;;  %p6963_p2 = por %p6962_p9, %p6961_p11 }
  0x43   : > { %484 = vmatpush.bf16.msra.mxu0 %v6609_v4  ;;  %6750 = vmatpush.bf16.msra.mxu2 %v6609_v4  ;;  %v6627_v25 = vld [vmem:[#allocation6 + $0xb8] sm:$0xff]  ;;  %v688_v28 = vpack.c.bf16 %v659_v21, %v658_v20  ;;  %v6642_v31 = vld [vmem:[#allocation6 + $0x130] sm:$0xff]  ;;  %v6641_v34 = vld [vmem:[#allocation6 + $0x128] sm:$0xff] }
  0x44   : > { %6758 = vmatpush.bf16.msra.mxu3 %v6617_v5  ;;  %765 = vmatpush.bf16.msra.mxu1 %v6617_v5  ;;  %v6635_v30 = vld [vmem:[#allocation6 + $0xf8] sm:$0xff]  ;;  %v6626_v32 = vld [vmem:[#allocation6 + $0xb0] sm:$0xff]  ;;  %v6625_v35 = vld [vmem:[#allocation6 + $0xa8] sm:$0xff]  ;;  %p6959_p8 = pneg %p6958_p4 }
  0x45   : > { %v6634_v33 = vld [vmem:[#allocation6 + $0xf0] sm:$0xff]  ;;  %v358_v36 = vld [vmem:[%s7157_s14 + $0x15] sm:$0xff] }
  0x46   : > { %v359_v37 = vld [vmem:[%s7157_s14 + $0x1d] sm:$0xff]  ;;  %v380_v38 = vld [vmem:[%s7157_s14 + $0xc5] sm:$0xff]  ;;  %v661_v41 = vld [vmem:[%s7157_s14 + $0xce] sm:$0xff]  ;;  %p6964_p10 = pnand %p6963_p2, %p6959_p8 }
  0x47   : > { %485 = vmatpush.bf16.msra.mxu0 %v6608_v6  ;;  %6751 = vmatpush.bf16.msra.mxu2 %v6608_v6  ;;  %v660_v40 = vld [vmem:[%s7157_s14 + $0xc6] sm:$0xff]  ;;  %v638_v42 = vld [vmem:[%s7157_s14 + $0x16] sm:$0xff]  ;;  %v639_v43 = vld [vmem:[%s7157_s14 + $0x1e] sm:$0xff]  ;;  %v398_v44 = vpack.c.bf16 %v359_v37, %v358_v36  ;;  %v409_v45 = vpack.c.bf16 %v381_v39, %v380_v38 }
  0x48   : > { %6759 = vmatpush.bf16.msra.mxu3 %v6616_v7  ;;  %766 = vmatpush.bf16.msra.mxu1 %v6616_v7  ;;  %v689_v46 = vpack.c.bf16 %v661_v41, %v660_v40  ;;  %v678_v47 = vpack.c.bf16 %v639_v43, %v638_v42  ;;  %v6633_v48 = vld [vmem:[#allocation6 + $0xe8] sm:$0xff]  ;;  %v361_v50 = vld [vmem:[%s7157_s14 + $0x2d] sm:$0xff] }
  0x49   : > { %v360_v49 = vld [vmem:[%s7157_s14 + $0x25] sm:$0xff]  ;;  %v382_v51 = vld [vmem:[%s7157_s14 + $0xd5] sm:$0xff]  ;;  %v383_v52 = vld [vmem:[%s7157_s14 + $0xdd] sm:$0xff] }
  0x4a   : > { %v662_v53 = vld [vmem:[%s7157_s14 + $0xd6] sm:$0xff]  ;;  %v663_v54 = vld [vmem:[%s7157_s14 + $0xde] sm:$0xff]  ;;  %v640_v55 = vld [vmem:[%s7157_s14 + $0x26] sm:$0xff]  ;;  %v399_v57 = vpack.c.bf16 %v361_v50, %v360_v49  ;;  %v410_v58 = vpack.c.bf16 %v383_v52, %v382_v51 }
  0x4b   : > { %486 = vmatpush.bf16.msra.mxu0 %v6607_v8  ;;  %6752 = vmatpush.bf16.msra.mxu2 %v6607_v8  ;;  %v641_v56 = vld [vmem:[%s7157_s14 + $0x2e] sm:$0xff]  ;;  %v690_v59 = vpack.c.bf16 %v663_v54, %v662_v53  ;;  %v363_v1 = vld [vmem:[%s7157_s14 + $0x3d] sm:$0xff]  ;;  %v384_v2 = vld [vmem:[%s7157_s14 + $0xe5] sm:$0xff] }
  0x4c   : > { %6760 = vmatpush.bf16.msra.mxu3 %v6615_v9  ;;  %767 = vmatpush.bf16.msra.mxu1 %v6615_v9  ;;  %v679_v60 = vpack.c.bf16 %v641_v56, %v640_v55  ;;  %v6624_v61 = vld [vmem:[#allocation6 + $0xa0] sm:$0xff]  ;;  %v664_v4 = vld [vmem:[%s7157_s14 + $0xe6] sm:$0xff] }
  0x4d   : > { %v6640_v62 = vld [vmem:[#allocation6 + $0x120] sm:$0xff]  ;;  %v644_v21 = vld [vmem:[%s7157_s14 + $0x46] sm:$0xff] }
  0x4e   : > { %v6632_v63 = vld [vmem:[#allocation6 + $0xe0] sm:$0xff]  ;;  %v368_v42 = vld [vmem:[%s7157_s14 + $0x65] sm:$0xff] }
  0x4f   : > { %487 = vmatpush.bf16.msra.mxu0 %v6606_v10  ;;  %6753 = vmatpush.bf16.msra.mxu2 %v6606_v10  ;;  %v362_v0 = vld [vmem:[%s7157_s14 + $0x35] sm:$0xff]  ;;  %v385_v3 = vld [vmem:[%s7157_s14 + $0xed] sm:$0xff]  ;;  %v643_v7 = vld [vmem:[%s7157_s14 + $0x3e] sm:$0xff] }
  0x50   : > { %6761 = vmatpush.bf16.msra.mxu3 %v6614_v11  ;;  %768 = vmatpush.bf16.msra.mxu1 %v6614_v11  ;;  %v665_v5 = vld [vmem:[%s7157_s14 + $0xee] sm:$0xff]  ;;  %v642_v6 = vld [vmem:[%s7157_s14 + $0x36] sm:$0xff]  ;;  %v400_v8 = vpack.c.bf16 %v363_v1, %v362_v0  ;;  %v411_v9 = vpack.c.bf16 %v385_v3, %v384_v2  ;;  %v667_v20 = vld [vmem:[%s7157_s14 + $0xfe] sm:$0xff] }
  0x51   : > { %v691_v10 = vpack.c.bf16 %v665_v5, %v664_v4  ;;  %v680_v11 = vpack.c.bf16 %v643_v7, %v642_v6  ;;  %v365_v16 = vld [vmem:[%s7157_s14 + $0x4d] sm:$0xff]  ;;  %v386_v17 = vld [vmem:[%s7157_s14 + $0xf5] sm:$0xff]  ;;  %v387_v18 = vld [vmem:[%s7157_s14 + $0xfd] sm:$0xff] }
  0x52   : > { %v666_v19 = vld [vmem:[%s7157_s14 + $0xf6] sm:$0xff]  ;;  %v645_v22 = vld [vmem:[%s7157_s14 + $0x4e] sm:$0xff]  ;;  %v647_v37 = vld [vmem:[%s7157_s14 + $0x5e] sm:$0xff] }
  0x53   : > { %488 = vmatpush.bf16.msra.mxu0 %v6605_v12  ;;  %6754 = vmatpush.bf16.msra.mxu2 %v6605_v12  ;;  %v6623_v12 = vld [vmem:[#allocation6 + $0x98] sm:$0xff]  ;;  %v6621_v54 = vld [vmem:[#allocation6 + $0x88] sm:$0xff]  ;;  %v6620_v6 = vld [vmem:[#allocation6 + $0x80] sm:$0xff] }
  0x54   : > { %6762 = vmatpush.bf16.msra.mxu3 %v6613_v13  ;;  %769 = vmatpush.bf16.msra.mxu1 %v6613_v13  ;;  %v6631_v13 = vld [vmem:[#allocation6 + $0xd8] sm:$0xff]  ;;  %v6629_v55 = vld [vmem:[#allocation6 + $0xc8] sm:$0xff]  ;;  %v6628_v7 = vld [vmem:[#allocation6 + $0xc0] sm:$0xff] }
  0x55   : > { %v646_v36 = vld [vmem:[%s7157_s14 + $0x56] sm:$0xff]  ;;  %v369_v43 = vld [vmem:[%s7157_s14 + $0x6d] sm:$0xff]  ;;  %v651_v1 = vld [vmem:[%s7157_s14 + $0x7e] sm:$0xff] }
  0x56   : > { %v682_v41 = vpack.c.bf16 %v647_v37, %v646_v36  ;;  %v649_v49 = vld [vmem:[%s7157_s14 + $0x6e] sm:$0xff]  ;;  %v403_v50 = vpack.c.bf16 %v369_v43, %v368_v42  ;;  %v6637_v56 = vld [vmem:[#allocation6 + $0x108] sm:$0xff] }
  0x57   : > { %489 = vmatpush.bf16.msra.mxu0 %v6604_v14  ;;  %6755 = vmatpush.bf16.msra.mxu2 %v6604_v14  ;;  %v6639_v14 = vld [vmem:[#allocation6 + $0x118] sm:$0xff]  ;;  %v375_v42 = vld [vmem:[%s7157_s14 + $0x9d] sm:$0xff] }
  0x58   : > { %6763 = vmatpush.bf16.msra.mxu3 %v6612_v15  ;;  %770 = vmatpush.bf16.msra.mxu1 %v6612_v15  ;;  %v364_v15 = vld [vmem:[%s7157_s14 + $0x45] sm:$0xff]  ;;  %v650_v0 = vld [vmem:[%s7157_s14 + $0x76] sm:$0xff] }
  0x59   : > { %v401_v23 = vpack.c.bf16 %v365_v16, %v364_v15  ;;  %v684_v5 = vpack.c.bf16 %v651_v1, %v650_v0  ;;  %v674_v15 = vld [vmem:[%s7157_s14 + $0x136] sm:$0xff]  ;;  %v675_v16 = vld [vmem:[%s7157_s14 + $0x13e] sm:$0xff] }
  0x5a   : > { %490 = vmatmul.bf16.vlgmr.msra.gmra.mxu0 %v397_v26  ;;  %545 = vmatmul.bf16.vlgmr.msra.gmra.mxu2 %v408_v27  ;;  %v681_v26 = vpack.c.bf16 %v645_v22, %v644_v21  ;;  %v6622_v27 = vld [vmem:[#allocation6 + $0x90] sm:$0xff]  ;;  %v6659_v37 = vld [vmem:[#allocation6 + $0x1b8] sm:$0xff] }
  0x5b   : > { %1606 = vmatpush.bf16.msrb.mxu0 %v6643_v24  ;;  %1044 = vmatpush.bf16.msrb.mxu2 %v6627_v25  ;;  %v412_v24 = vpack.c.bf16 %v387_v18, %v386_v17  ;;  %v692_v25 = vpack.c.bf16 %v667_v20, %v666_v19  ;;  %v652_v17 = vld [vmem:[%s7157_s14 + $0x86] sm:$0xff]  ;;  %v653_v18 = vld [vmem:[%s7157_s14 + $0x8e] sm:$0xff] }
  0x5c   : > { %826 = vmatmul.bf16.vlgmr.msra.gmra.mxu3 %v688_v28  ;;  %771 = vmatmul.bf16.vlgmr.msra.gmra.mxu1 %v677_v29  ;;  %v6630_v28 = vld [vmem:[#allocation6 + $0xd0] sm:$0xff]  ;;  %v6649_v19 = vld [vmem:[#allocation6 + $0x168] sm:$0xff] }
  0x5d   : > { %1325 = vmatpush.bf16.msrb.mxu3 %v6635_v30  ;;  %v6638_v29 = vld [vmem:[#allocation6 + $0x110] sm:$0xff]  ;;  %v366_v30 = vld [vmem:[%s7157_s14 + $0x55] sm:$0xff] }
  0x5e   : > { %v396_v43 = vld [vmem:[%s7157_s14 + $0x145] sm:$0xff] }
  0x5f   : > { %1607 = vmatpush.bf16.msrb.mxu0 %v6642_v31  ;;  %1045 = vmatpush.bf16.msrb.mxu2 %v6626_v32  ;;  %v367_v31 = vld [vmem:[%s7157_s14 + $0x5d] sm:$0xff]  ;;  %v388_v32 = vld [vmem:[%s7157_s14 + $0x105] sm:$0xff] }
  0x60   : > { %v402_v38 = vpack.c.bf16 %v367_v31, %v366_v30 }
  0x61   : > { %1326 = vmatpush.bf16.msrb.mxu3 %v6634_v33  ;;  %v389_v33 = vld [vmem:[%s7157_s14 + $0x10d] sm:$0xff] }
  0x62   : > { %v413_v39 = vpack.c.bf16 %v389_v33, %v388_v32 }
  0x63   : > { %1608 = vmatpush.bf16.msrb.mxu0 %v6641_v34  ;;  %1046 = vmatpush.bf16.msrb.mxu2 %v6625_v35  ;;  %v668_v34 = vld [vmem:[%s7157_s14 + $0x106] sm:$0xff]  ;;  %v669_v35 = vld [vmem:[%s7157_s14 + $0x10e] sm:$0xff] }
  0x64   : > { %v693_v40 = vpack.c.bf16 %v669_v35, %v668_v34 }
  0x65   : > { %1327 = vmatpush.bf16.msrb.mxu3 %v6633_v48  ;;  %v648_v48 = vld [vmem:[%s7157_s14 + $0x66] sm:$0xff] }
  0x66   : > { %v683_v53 = vpack.c.bf16 %v649_v49, %v648_v48 }
  0x67   : > { %1047 = vmatpush.bf16.msrb.mxu2 %v6624_v61  ;;  %1609 = vmatpush.bf16.msrb.mxu0 %v6640_v62  ;;  %v393_v61 = vld [vmem:[%s7157_s14 + $0x12d] sm:$0xff] }
  0x68   : > { %v672_v62 = vld [vmem:[%s7157_s14 + $0x126] sm:$0xff] }
  0x69   : > { %1328 = vmatpush.bf16.msrb.mxu3 %v6632_v63  ;;  %v673_v63 = vld [vmem:[%s7157_s14 + $0x12e] sm:$0xff] }
  0x6a   : > { %495 = vmatmul.bf16.gmra.mxu0 %v398_v44  ;;  %550 = vmatmul.bf16.gmra.mxu2 %v409_v45  ;;  %v390_v44 = vld [vmem:[%s7157_s14 + $0x115] sm:$0xff]  ;;  %v391_v45 = vld [vmem:[%s7157_s14 + $0x11d] sm:$0xff]  ;;  %v695_v4 = vpack.c.bf16 %v673_v63, %v672_v62 }
  0x6b   : > { %1048 = vmatpush.bf16.msrb.mxu2 %v6623_v12  ;;  %1610 = vmatpush.bf16.msrb.mxu0 %v6639_v14  ;;  %v414_v51 = vpack.c.bf16 %v391_v45, %v390_v44  ;;  %v394_v12 = vld [vmem:[%s7157_s14 + $0x135] sm:$0xff]  ;;  %v395_v14 = vld [vmem:[%s7157_s14 + $0x13d] sm:$0xff]  ;;  %v676_v44 = vld [vmem:[%s7157_s14 + $0x146] sm:$0xff] }
  0x6c   : > { %831 = vmatmul.bf16.gmra.mxu3 %v689_v46  ;;  %776 = vmatmul.bf16.gmra.mxu1 %v678_v47  ;;  %v670_v46 = vld [vmem:[%s7157_s14 + $0x116] sm:$0xff]  ;;  %v671_v47 = vld [vmem:[%s7157_s14 + $0x11e] sm:$0xff]  ;;  %v416_v21 = vpack.c.bf16 %v395_v14, %v394_v12  ;;  %v657_v14 = vld [vmem:[%s7157_s14 + $0xae] sm:$0xff] }
  0x6d   : > { %1329 = vmatpush.bf16.msrb.mxu3 %v6631_v13  ;;  %v694_v52 = vpack.c.bf16 %v671_v47, %v670_v46  ;;  %v6636_v13 = vld [vmem:[#allocation6 + $0x100] sm:$0xff]  ;;  %v6645_v47 = vld [vmem:[#allocation6 + $0x148] sm:$0xff] }
  0x6e   : > { %v654_v45 = vld [vmem:[%s7157_s14 + $0x96] sm:$0xff]  ;;  %v655_v46 = vld [vmem:[%s7157_s14 + $0x9e] sm:$0xff] }
  0x6f   : > { %1049 = vmatpush.bf16.msrb.mxu2 %v6622_v27  ;;  %1611 = vmatpush.bf16.msrb.mxu0 %v6638_v29  ;;  %v6648_v27 = vld [vmem:[#allocation6 + $0x160] sm:$0xff]  ;;  %v6647_v29 = vld [vmem:[#allocation6 + $0x158] sm:$0xff] }
  0x70   : > { %v1199_v12 = vld [vmem:[%s7157_s14 + $0x1f] sm:$0xff] }
  0x71   : > { %1330 = vmatpush.bf16.msrb.mxu3 %v6630_v28 }
  0x73   : > { %1050 = vmatpush.bf16.msrb.mxu2 %v6621_v54  ;;  %1612 = vmatpush.bf16.msrb.mxu0 %v6637_v56  ;;  %v697_v54 = vpack.c.bf16 %v676_v44, %v676_v44 }
  0x75   : > { %1331 = vmatpush.bf16.msrb.mxu3 %v6629_v55  ;;  %v686_v55 = vpack.c.bf16 %v655_v46, %v654_v45 }
  0x77   : > { %1051 = vmatpush.bf16.msrb.mxu2 %v6620_v6  ;;  %1613 = vmatpush.bf16.msrb.mxu0 %v6636_v13  ;;  %v376_v6 = vld [vmem:[%s7157_s14 + $0xa5] sm:$0xff] }
  0x78   : > { %v656_v13 = vld [vmem:[%s7157_s14 + $0xa6] sm:$0xff] }
  0x79   : > { %1332 = vmatpush.bf16.msrb.mxu3 %v6628_v7  ;;  %v377_v7 = vld [vmem:[%s7157_s14 + $0xad] sm:$0xff] }
  0x7a   : > { %500 = vmatmul.bf16.gmra.mxu0 %v399_v57  ;;  %555 = vmatmul.bf16.gmra.mxu2 %v410_v58  ;;  %v6651_v57 = vld [vmem:[#allocation6 + $0x178] sm:$0xff] }
  0x7b   : > { %v370_v58 = vld [vmem:[%s7157_s14 + $0x75] sm:$0xff]  ;;  %1887 = vmatpush.bf16.msrb.mxu1 %v6651_v57  ;;  %2168 = vmatpush.bf16.msra.mxu2 %v6659_v37  ;;  %v1200_v37 = vld [vmem:[%s7157_s14 + $0x27] sm:$0xff] }
  0x7c   : > { %836 = vmatmul.bf16.gmra.mxu3 %v690_v59  ;;  %781 = vmatmul.bf16.gmra.mxu1 %v679_v60  ;;  %v371_v59 = vld [vmem:[%s7157_s14 + $0x7d] sm:$0xff]  ;;  %v392_v60 = vld [vmem:[%s7157_s14 + $0x125] sm:$0xff] }
  0x7d   : > { %v404_v2 = vpack.c.bf16 %v371_v59, %v370_v58  ;;  %v415_v3 = vpack.c.bf16 %v393_v61, %v392_v60  ;;  %v6644_v59 = vld [vmem:[#allocation6 + $0x140] sm:$0xff]  ;;  %v6675_v61 = vld [vmem:[#allocation6 + $0x238] sm:$0xff] }
  0x7e   : > { %2730 = vmatpush.bf16.msra.mxu0 %v6675_v61 }
  0x8a   : > { %505 = vmatmul.bf16.gmra.mxu0 %v400_v8  ;;  %560 = vmatmul.bf16.gmra.mxu2 %v411_v9  ;;  %v6650_v8 = vld [vmem:[#allocation6 + $0x170] sm:$0xff] }
  0x8b   : > { %v372_v9 = vld [vmem:[%s7157_s14 + $0x85] sm:$0xff]  ;;  %1888 = vmatpush.bf16.msrb.mxu1 %v6650_v8 }
  0x8c   : > { %841 = vmatmul.bf16.gmra.mxu3 %v691_v10  ;;  %786 = vmatmul.bf16.gmra.mxu1 %v680_v11  ;;  %v7235_v10 = vld [vmem:[%s8610_s3] ss:$0 sm:$0xff] }
  0x8d   : > { %v373_v11 = vld [vmem:[%s7157_s14 + $0x8d] sm:$0xff] }
  0x8e   : > { %v405_v20 = vpack.c.bf16 %v373_v11, %v372_v9  ;;  %v917_v8 = vld [vmem:[%s7157_s14 + $0x7] sm:$0xff]  ;;  %v918_v9 = vld [vmem:[%s7157_s14 + $0xf] sm:$0xff]  ;;  %v1198_v11 = vld [vmem:[%s7157_s14 + $0x17] sm:$0xff] }
  0x8f   : > { %1889 = vmatpush.bf16.msrb.mxu1 %v6649_v19  ;;  %v958_v19 = vpack.c.bf16 %v918_v9, %v917_v8  ;;  %v1482_v8 = vld [vmem:[%s7157_s14 + $0x30] sm:$0xff]  ;;  %v1203_v9 = vld [vmem:[%s7157_s14 + $0x3f] sm:$0xff] }
  0x93   : > { %1890 = vmatpush.bf16.msrb.mxu1 %v6648_v27 }
  0x97   : > { %1891 = vmatpush.bf16.msrb.mxu1 %v6647_v29 }
  0x9a   : > { %510 = vmatmul.bf16.gmra.mxu0 %v401_v23  ;;  %565 = vmatmul.bf16.gmra.mxu2 %v412_v24  ;;  %v696_v23 = vpack.c.bf16 %v675_v16, %v674_v15  ;;  %v685_v24 = vpack.c.bf16 %v653_v18, %v652_v17  ;;  %v407_v18 = vpack.c.bf16 %v377_v7, %v376_v6  ;;  %v1202_v6 = vld [vmem:[%s7157_s14 + $0x37] sm:$0xff]  ;;  %v1481_v7 = vld [vmem:[%s7157_s14 + $0x28] sm:$0xff] }
  0x9c   : > { %846 = vmatmul.bf16.gmra.mxu3 %v692_v25  ;;  %791 = vmatmul.bf16.gmra.mxu1 %v681_v26 }
  0xaa   : > { %515 = vmatmul.bf16.gmra.mxu0 %v402_v38  ;;  %570 = vmatmul.bf16.gmra.mxu2 %v413_v39  ;;  %v6646_v38 = vld [vmem:[#allocation6 + $0x150] sm:$0xff] }
  0xab   : > { %1892 = vmatpush.bf16.msrb.mxu1 %v6646_v38  ;;  %v1479_v38 = vld [vmem:[%s7157_s14 + $0x18] sm:$0xff] }
  0xac   : > { %851 = vmatmul.bf16.gmra.mxu3 %v693_v40  ;;  %796 = vmatmul.bf16.gmra.mxu1 %v682_v41  ;;  %v374_v40 = vld [vmem:[%s7157_s14 + $0x95] sm:$0xff] }
  0xad   : > { %v6667_v41 = vld [vmem:[#allocation6 + $0x1f8] sm:$0xff] }
  0xae   : > { %2449 = vmatpush.bf16.msra.mxu3 %v6667_v41  ;;  %v1201_v41 = vld [vmem:[%s7157_s14 + $0x2f] sm:$0xff] }
  0xaf   : > { %1893 = vmatpush.bf16.msrb.mxu1 %v6645_v47 }
  0xb3   : > { %1894 = vmatpush.bf16.msrb.mxu1 %v6644_v59 }
  0xba   : > { %520 = vmatmul.bf16.gmra.mxu0 %v403_v50  ;;  %575 = vmatmul.bf16.gmra.mxu2 %v414_v51  ;;  %v406_v51 = vpack.c.bf16 %v375_v42, %v374_v40  ;;  %v1480_v40 = vld [vmem:[%s7157_s14 + $0x20] sm:$0xff] }
  0xbb   : > { %v1760_v42 = vld [vmem:[%s7157_s14 + $0x19] sm:$0xff]  ;;  %v1520_v47 = vpack.c.bf16 %v1480_v40, %v1479_v38  ;;  %v1204_v38 = vld [vmem:[%s7157_s14 + $0x47] sm:$0xff] }
  0xbc   : > { %856 = vmatmul.bf16.gmra.mxu3 %v694_v52  ;;  %801 = vmatmul.bf16.gmra.mxu1 %v683_v53  ;;  %v417_v52 = vpack.c.bf16 %v396_v43, %v396_v43  ;;  %v1761_v43 = vld [vmem:[%s7157_s14 + $0x21] sm:$0xff]  ;;  %v1483_v40 = vld [vmem:[%s7157_s14 + $0x38] sm:$0xff] }
  0xca   : > { %525 = vmatmul.bf16.gmra.mxu0 %v404_v2  ;;  %580 = vmatmul.bf16.gmra.mxu2 %v415_v3 }
  0xcc   : > { %861 = vmatmul.bf16.gmra.mxu3 %v695_v4  ;;  %806 = vmatmul.bf16.gmra.mxu1 %v684_v5 }
  0xd7   : > { %v491_v22 = vpop.f32.mrf.mxu0 }
  0xd8   : > { %v595_v25 = vadd.f32 %v7235_v10, %v491_v22  ;;  %v687_v22 = vpack.c.bf16 %v657_v14, %v656_v13 }
  0xd9   : > { %v772_v26 = vpop.f32.mrf.mxu1 }
  0xda   : > { %v7245_v28 = vadd.f32 %v772_v26, %v595_v25  ;;  %530 = vmatmul.bf16.gmra.mxu0 %v405_v20  ;;  %585 = vmatmul.bf16.gmra.mxu2 %v416_v21  ;;  %v1239_v21 = vpack.c.bf16 %v1199_v12, %v1198_v11  ;;  %v1762_v11 = vld [vmem:[%s7157_s14 + $0x29] sm:$0xff]  ;;  %v1763_v12 = vld [vmem:[%s7157_s14 + $0x31] sm:$0xff] }
  0xdc   : > { %866 = vmatmul.bf16.gmra.mxu3 %v696_v23  ;;  %811 = vmatmul.bf16.gmra.mxu1 %v685_v24 }
  0xdd   : > { %v546_v30 = vpop.f32.mrf.mxu2 }
  0xde   : > { %v617_v31 = vadd.f32 %v7235_v10, %v546_v30 }
  0xdf   : > { %v827_v32 = vpop.f32.mrf.mxu3  ;;  %v493_v33 = vpop.f32.mrf.mxu0 }
  0xe0   : > { %v7248_v34 = vadd.f32 %v827_v32, %v617_v31  ;;  %v596_v35 = vadd.f32 %v7235_v10, %v493_v33 }
  0xe1   : > { %v774_v36 = vpop.f32.mrf.mxu1 }
  0xe2   : > { %v7251_v39 = vadd.f32 %v774_v36, %v596_v35 }
  0xe5   : > { %v548_v48 = vpop.f32.mrf.mxu2 }
  0xe6   : > { %v618_v49 = vadd.f32 %v7235_v10, %v548_v48 }
  0xe7   : > { %v829_v50 = vpop.f32.mrf.mxu3  ;;  %v496_v53 = vpop.f32.mrf.mxu0 }
  0xe8   : > { %v7260_v56 = vadd.f32 %v829_v50, %v618_v49  ;;  %v597_v57 = vadd.f32 %v7235_v10, %v496_v53  ;;  %v1240_v49 = vpack.c.bf16 %v1201_v41, %v1200_v37  ;;  %v1801_v50 = vpack.c.bf16 %v1761_v43, %v1760_v42  ;;  %v1484_v41 = vld [vmem:[%s7157_s14 + $0x40] sm:$0xff]  ;;  %v1205_v42 = vld [vmem:[%s7157_s14 + $0x4f] sm:$0xff] }
  0xe9   : > { %v777_v58 = vpop.f32.mrf.mxu1  ;;  %v1764_v43 = vld [vmem:[%s7157_s14 + $0x39] sm:$0xff] }
  0xea   : > { %v7263_v60 = vadd.f32 %v777_v58, %v597_v57  ;;  %535 = vmatmul.bf16.gmra.mxu0 %v406_v51  ;;  %590 = vmatmul.bf16.gmra.mxu2 %v417_v52  ;;  %v6666_v57 = vld [vmem:[#allocation6 + $0x1f0] sm:$0xff] }
  0xeb   : > { %2450 = vmatpush.bf16.msra.mxu3 %v6666_v57 }
  0xec   : > { %871 = vmatmul.bf16.gmra.mxu3 %v697_v54  ;;  %816 = vmatmul.bf16.gmra.mxu1 %v686_v55  ;;  %v6658_v55 = vld [vmem:[#allocation6 + $0x1b0] sm:$0xff] }
  0xed   : > { %v551_v62 = vpop.f32.mrf.mxu2  ;;  %2169 = vmatpush.bf16.msra.mxu2 %v6658_v55 }
  0xee   : > { %v619_v63 = vadd.f32 %v7235_v10, %v551_v62 }
  0xef   : > { %v832_v0 = vpop.f32.mrf.mxu3  ;;  %v498_v1 = vpop.f32.mrf.mxu0 }
  0xf0   : > { %v7266_v2 = vadd.f32 %v832_v0, %v619_v63  ;;  %v598_v3 = vadd.f32 %v7235_v10, %v498_v1 }
  0xf1   : > { %v779_v4 = vpop.f32.mrf.mxu1 }
  0xf2   : > { %v7269_v5 = vadd.f32 %v779_v4, %v598_v3  ;;  %v6674_v4 = vld [vmem:[#allocation6 + $0x230] sm:$0xff] }
  0xf3   : > { %2731 = vmatpush.bf16.msra.mxu0 %v6674_v4 }
  0xf5   : > { %v553_v15 = vpop.f32.mrf.mxu2 }
  0xf6   : > { %v620_v16 = vadd.f32 %v7235_v10, %v553_v15 }
  0xf7   : > { %v834_v17 = vpop.f32.mrf.mxu3  ;;  %v501_v20 = vpop.f32.mrf.mxu0 }
  0xf8   : > { %v7280_v23 = vadd.f32 %v834_v17, %v620_v16  ;;  %v599_v24 = vadd.f32 %v7235_v10, %v501_v20  ;;  %v1521_v16 = vpack.c.bf16 %v1482_v8, %v1481_v7  ;;  %v6657_v8 = vld [vmem:[#allocation6 + $0x1a8] sm:$0xff] }
  0xf9   : > { %v782_v25 = vpop.f32.mrf.mxu1  ;;  %2170 = vmatpush.bf16.msra.mxu2 %v6657_v8 }
  0xfa   : > { %v7283_v26 = vadd.f32 %v782_v25, %v599_v24  ;;  %540 = vmatmul.bf16.gmra.mxu0 %v407_v18  ;;  %1052 = vmatmul.bf16.vlgmr.msrb.gmra.mxu2 %v958_v19  ;;  %v1241_v18 = vpack.c.bf16 %v1203_v9, %v1202_v6  ;;  %v1802_v19 = vpack.c.bf16 %v1763_v12, %v1762_v11  ;;  %v1206_v9 = vld [vmem:[%s7157_s14 + $0x57] sm:$0xff]  ;;  %v1485_v11 = vld [vmem:[%s7157_s14 + $0x48] sm:$0xff] }
  0xfb   : > { %v1486_v12 = vld [vmem:[%s7157_s14 + $0x50] sm:$0xff] }
  0xfc   : > { %1333 = vmatmul.bf16.vlgmr.msrb.gmra.mxu3 %v1239_v21  ;;  %821 = vmatmul.bf16.gmra.mxu1 %v687_v22 }
  0xfd   : > { %v556_v27 = vpop.f32.mrf.mxu2 }
  0xfe   : > { %v621_v29 = vadd.f32 %v7235_v10, %v556_v27 }
  0xff   : > { %v837_v30 = vpop.f32.mrf.mxu3  ;;  %v503_v31 = vpop.f32.mrf.mxu0 }
 0x100   : > { %v7286_v32 = vadd.f32 %v837_v30, %v621_v29  ;;  %v600_v33 = vadd.f32 %v7235_v10, %v503_v31 }
 0x101   : > { %v784_v35 = vpop.f32.mrf.mxu1 }
 0x102   : > { %v7289_v36 = vadd.f32 %v784_v35, %v600_v33 }
 0x105   : > { %v558_v44 = vpop.f32.mrf.mxu2 }
 0x106   : > { %v622_v45 = vadd.f32 %v7235_v10, %v558_v44  ;;  %v1765_v44 = vld [vmem:[%s7157_s14 + $0x41] sm:$0xff] }
 0x107   : > { %v839_v46 = vpop.f32.mrf.mxu3  ;;  %v506_v48 = vpop.f32.mrf.mxu0 }
 0x108   : > { %v7298_v51 = vadd.f32 %v839_v46, %v622_v45  ;;  %v601_v52 = vadd.f32 %v7235_v10, %v506_v48  ;;  %v1522_v48 = vpack.c.bf16 %v1484_v41, %v1483_v40 }
 0x109   : > { %v787_v53 = vpop.f32.mrf.mxu1 }
 0x10a   : > { %v7301_v54 = vadd.f32 %v787_v53, %v601_v52  ;;  %1057 = vmatmul.bf16.gmra.mxu2 %v1239_v21  ;;  %1614 = vmatmul.bf16.vlgmr.msrb.gmra.mxu0 %v1520_v47  ;;  %v1803_v52 = vpack.c.bf16 %v1765_v44, %v1764_v43 }
 0x10c   : > { %1338 = vmatmul.bf16.gmra.mxu3 %v1240_v49  ;;  %1895 = vmatmul.bf16.vlgmr.msrb.gmra.mxu1 %v1801_v50  ;;  %v1242_v50 = vpack.c.bf16 %v1205_v42, %v1204_v38 }
 0x10d   : > { %v561_v58 = vpop.f32.mrf.mxu2 }
 0x10e   : > { %v623_v59 = vadd.f32 %v7235_v10, %v561_v58 }
 0x10f   : > { %v842_v61 = vpop.f32.mrf.mxu3  ;;  %v508_v62 = vpop.f32.mrf.mxu0 }
 0x110   : > { %v7304_v63 = vadd.f32 %v842_v61, %v623_v59  ;;  %v602_v0 = vadd.f32 %v7235_v10, %v508_v62 }
 0x111   : > { %v789_v1 = vpop.f32.mrf.mxu1 }
 0x112   : > { %v7307_v3 = vadd.f32 %v789_v1, %v602_v0 }
 0x115   : > { %v563_v13 = vpop.f32.mrf.mxu2 }
 0x116   : > { %v624_v14 = vadd.f32 %v7235_v10, %v563_v13  ;;  %v1207_v13 = vld [vmem:[%s7157_s14 + $0x5f] sm:$0xff] }
 0x117   : > { %v844_v15 = vpop.f32.mrf.mxu3  ;;  %v511_v17 = vpop.f32.mrf.mxu0 }
 0x118   : > { %v7316_v20 = vadd.f32 %v844_v15, %v624_v14  ;;  %v603_v21 = vadd.f32 %v7235_v10, %v511_v17  ;;  %v1766_v14 = vld [vmem:[%s7157_s14 + $0x49] sm:$0xff]  ;;  %v1767_v15 = vld [vmem:[%s7157_s14 + $0x51] sm:$0xff] }
 0x119   : > { %v792_v22 = vpop.f32.mrf.mxu1 }
 0x11a   : > { %v7319_v24 = vadd.f32 %v792_v22, %v603_v21  ;;  %1062 = vmatmul.bf16.gmra.mxu2 %v1240_v49  ;;  %1619 = vmatmul.bf16.gmra.mxu0 %v1521_v16  ;;  %v1243_v22 = vpack.c.bf16 %v1207_v13, %v1206_v9 }
 0x11c   : > { %1343 = vmatmul.bf16.gmra.mxu3 %v1241_v18  ;;  %1900 = vmatmul.bf16.gmra.mxu1 %v1802_v19  ;;  %v1523_v19 = vpack.c.bf16 %v1486_v12, %v1485_v11 }
 0x11d   : > { %v566_v25 = vpop.f32.mrf.mxu2 }
 0x11e   : > { %v625_v27 = vadd.f32 %v7235_v10, %v566_v25  ;;  %v1804_v25 = vpack.c.bf16 %v1767_v15, %v1766_v14 }
 0x11f   : > { %v847_v29 = vpop.f32.mrf.mxu3  ;;  %v513_v30 = vpop.f32.mrf.mxu0 }
 0x120   : > { %v7322_v31 = vadd.f32 %v847_v29, %v625_v27  ;;  %v604_v33 = vadd.f32 %v7235_v10, %v513_v30 }
 0x121   : > { %v794_v35 = vpop.f32.mrf.mxu1 }
 0x122   : > { %v7325_v37 = vadd.f32 %v794_v35, %v604_v33  ;;  %v6665_v33 = vld [vmem:[#allocation6 + $0x1e8] sm:$0xff] }
 0x123   : > { %2451 = vmatpush.bf16.msra.mxu3 %v6665_v33  ;;  %v1211_v33 = vld [vmem:[%s7157_s14 + $0x7f] sm:$0xff] }
 0x125   : > { %v568_v45 = vpop.f32.mrf.mxu2 }
 0x126   : > { %v626_v46 = vadd.f32 %v7235_v10, %v568_v45 }
 0x127   : > { %v849_v47 = vpop.f32.mrf.mxu3  ;;  %v516_v49 = vpop.f32.mrf.mxu0 }
 0x128   : > { %v7334_v53 = vadd.f32 %v849_v47, %v626_v46  ;;  %v605_v55 = vadd.f32 %v7235_v10, %v516_v49  ;;  %v6673_v46 = vld [vmem:[#allocation6 + $0x228] sm:$0xff] }
 0x129   : > { %v797_v57 = vpop.f32.mrf.mxu1  ;;  %2732 = vmatpush.bf16.msra.mxu0 %v6673_v46  ;;  %v1487_v49 = vld [vmem:[%s7157_s14 + $0x58] sm:$0xff] }
 0x12a   : > { %v7337_v58 = vadd.f32 %v797_v57, %v605_v55  ;;  %1067 = vmatmul.bf16.gmra.mxu2 %v1241_v18  ;;  %1624 = vmatmul.bf16.gmra.mxu0 %v1522_v48  ;;  %v1208_v48 = vld [vmem:[%s7157_s14 + $0x67] sm:$0xff]  ;;  %v1768_v55 = vld [vmem:[%s7157_s14 + $0x59] sm:$0xff] }
 0x12b   : > { %v1769_v57 = vld [vmem:[%s7157_s14 + $0x61] sm:$0xff] }
 0x12c   : > { %1348 = vmatmul.bf16.gmra.mxu3 %v1242_v50  ;;  %1905 = vmatmul.bf16.gmra.mxu1 %v1803_v52  ;;  %v1209_v52 = vld [vmem:[%s7157_s14 + $0x6f] sm:$0xff]  ;;  %v1805_v8 = vpack.c.bf16 %v1769_v57, %v1768_v55 }
 0x12d   : > { %v571_v59 = vpop.f32.mrf.mxu2 }
 0x12e   : > { %v627_v61 = vadd.f32 %v7235_v10, %v571_v59 }
 0x12f   : > { %v852_v62 = vpop.f32.mrf.mxu3  ;;  %v518_v0 = vpop.f32.mrf.mxu0 }
 0x130   : > { %v7340_v1 = vadd.f32 %v852_v62, %v627_v61  ;;  %v606_v4 = vadd.f32 %v7235_v10, %v518_v0 }
 0x131   : > { %v799_v6 = vpop.f32.mrf.mxu1 }
 0x132   : > { %v7343_v7 = vadd.f32 %v799_v6, %v606_v4  ;;  %v1244_v6 = vpack.c.bf16 %v1209_v52, %v1208_v48 }
 0x135   : > { %v573_v16 = vpop.f32.mrf.mxu2 }
 0x136   : > { %v628_v17 = vadd.f32 %v7235_v10, %v573_v16 }
 0x137   : > { %v854_v18 = vpop.f32.mrf.mxu3  ;;  %v521_v21 = vpop.f32.mrf.mxu0 }
 0x138   : > { %v7352_v27 = vadd.f32 %v854_v18, %v628_v17  ;;  %v607_v29 = vadd.f32 %v7235_v10, %v521_v21 }
 0x139   : > { %v802_v30 = vpop.f32.mrf.mxu1 }
 0x13a   : > { %v7355_v35 = vadd.f32 %v802_v30, %v607_v29  ;;  %1072 = vmatmul.bf16.gmra.mxu2 %v1242_v50  ;;  %1629 = vmatmul.bf16.gmra.mxu0 %v1523_v19  ;;  %v1488_v50 = vld [vmem:[%s7157_s14 + $0x60] sm:$0xff]  ;;  %v1210_v29 = vld [vmem:[%s7157_s14 + $0x77] sm:$0xff]  ;;  %v1489_v30 = vld [vmem:[%s7157_s14 + $0x68] sm:$0xff] }
 0x13b   : > { %v1524_v0 = vpack.c.bf16 %v1488_v50, %v1487_v49  ;;  %v1245_v48 = vpack.c.bf16 %v1211_v33, %v1210_v29  ;;  %v1773_v29 = vld [vmem:[%s7157_s14 + $0x81] sm:$0xff] }
 0x13c   : > { %1353 = vmatmul.bf16.gmra.mxu3 %v1243_v22  ;;  %1910 = vmatmul.bf16.gmra.mxu1 %v1804_v25 }
 0x13d   : > { %v576_v38 = vpop.f32.mrf.mxu2 }
 0x13e   : > { %v629_v40 = vadd.f32 %v7235_v10, %v576_v38  ;;  %v1770_v38 = vld [vmem:[%s7157_s14 + $0x69] sm:$0xff] }
 0x13f   : > { %v857_v41 = vpop.f32.mrf.mxu3  ;;  %v523_v42 = vpop.f32.mrf.mxu0 }
 0x140   : > { %v7358_v43 = vadd.f32 %v857_v41, %v629_v40  ;;  %v608_v44 = vadd.f32 %v7235_v10, %v523_v42  ;;  %v1771_v40 = vld [vmem:[%s7157_s14 + $0x71] sm:$0xff] }
 0x141   : > { %v804_v45 = vpop.f32.mrf.mxu1  ;;  %v1806_v49 = vpack.c.bf16 %v1771_v40, %v1770_v38 }
 0x142   : > { %v7361_v47 = vadd.f32 %v804_v45, %v608_v44 }
 0x145   : > { %v578_v59 = vpop.f32.mrf.mxu2 }
 0x146   : > { %v630_v61 = vadd.f32 %v7235_v10, %v578_v59 }
 0x147   : > { %v859_v62 = vpop.f32.mrf.mxu3  ;;  %v526_v4 = vpop.f32.mrf.mxu0 }
 0x148   : > { %v7370_v9 = vadd.f32 %v859_v62, %v630_v61  ;;  %v609_v11 = vadd.f32 %v7235_v10, %v526_v4 }
 0x149   : > { %v807_v12 = vpop.f32.mrf.mxu1 }
 0x14a   : > { %v7373_v13 = vadd.f32 %v807_v12, %v609_v11  ;;  %1077 = vmatmul.bf16.gmra.mxu2 %v1243_v22  ;;  %1634 = vmatmul.bf16.gmra.mxu0 %v1524_v0  ;;  %v1490_v22 = vld [vmem:[%s7157_s14 + $0x70] sm:$0xff] }
 0x14b   : > { %v1525_v45 = vpack.c.bf16 %v1490_v22, %v1489_v30  ;;  %v6664_v12 = vld [vmem:[#allocation6 + $0x1e0] sm:$0xff] }
 0x14c   : > { %1358 = vmatmul.bf16.gmra.mxu3 %v1244_v6  ;;  %1915 = vmatmul.bf16.gmra.mxu1 %v1805_v8 }
 0x14d   : > { %v581_v14 = vpop.f32.mrf.mxu2  ;;  %2452 = vmatpush.bf16.msra.mxu3 %v6664_v12  ;;  %v1214_v12 = vld [vmem:[%s7157_s14 + $0x97] sm:$0xff] }
 0x14e   : > { %v631_v15 = vadd.f32 %v7235_v10, %v581_v14 }
 0x14f   : > { %v862_v16 = vpop.f32.mrf.mxu3  ;;  %v528_v17 = vpop.f32.mrf.mxu0 }
 0x150   : > { %v7376_v18 = vadd.f32 %v862_v16, %v631_v15  ;;  %v610_v19 = vadd.f32 %v7235_v10, %v528_v17  ;;  %v1212_v15 = vld [vmem:[%s7157_s14 + $0x87] sm:$0xff]  ;;  %v1491_v16 = vld [vmem:[%s7157_s14 + $0x78] sm:$0xff] }
 0x151   : > { %v809_v21 = vpop.f32.mrf.mxu1  ;;  %v1492_v17 = vld [vmem:[%s7157_s14 + $0x80] sm:$0xff] }
 0x152   : > { %v7379_v25 = vadd.f32 %v809_v21, %v610_v19  ;;  %v1213_v19 = vld [vmem:[%s7157_s14 + $0x8f] sm:$0xff]  ;;  %v1772_v21 = vld [vmem:[%s7157_s14 + $0x79] sm:$0xff]  ;;  %v1526_v38 = vpack.c.bf16 %v1492_v17, %v1491_v16 }
 0x153   : > { %v1494_v16 = vld [vmem:[%s7157_s14 + $0x90] sm:$0xff]  ;;  %v1215_v17 = vld [vmem:[%s7157_s14 + $0x9f] sm:$0xff] }
 0x155   : > { %v583_v41 = vpop.f32.mrf.mxu2 }
 0x156   : > { %v632_v42 = vadd.f32 %v7235_v10, %v583_v41  ;;  %v1246_v41 = vpack.c.bf16 %v1213_v19, %v1212_v15  ;;  %v1493_v15 = vld [vmem:[%s7157_s14 + $0x88] sm:$0xff] }
 0x157   : > { %v864_v44 = vpop.f32.mrf.mxu3  ;;  %v531_v46 = vpop.f32.mrf.mxu0  ;;  %v1774_v19 = vld [vmem:[%s7157_s14 + $0x89] sm:$0xff] }
 0x158   : > { %v7388_v50 = vadd.f32 %v864_v44, %v632_v42  ;;  %v611_v52 = vadd.f32 %v7235_v10, %v531_v46  ;;  %v1807_v42 = vpack.c.bf16 %v1773_v29, %v1772_v21  ;;  %v1775_v21 = vld [vmem:[%s7157_s14 + $0x91] sm:$0xff] }
 0x159   : > { %v812_v55 = vpop.f32.mrf.mxu1 }
 0x15a   : > { %v7391_v57 = vadd.f32 %v812_v55, %v611_v52  ;;  %1082 = vmatmul.bf16.gmra.mxu2 %v1244_v6  ;;  %1639 = vmatmul.bf16.gmra.mxu0 %v1525_v45  ;;  %v6656_v6 = vld [vmem:[#allocation6 + $0x1a0] sm:$0xff] }
 0x15b   : > { %2171 = vmatpush.bf16.msra.mxu2 %v6656_v6 }
 0x15c   : > { %1363 = vmatmul.bf16.gmra.mxu3 %v1245_v48  ;;  %1920 = vmatmul.bf16.gmra.mxu1 %v1806_v49  ;;  %v6672_v49 = vld [vmem:[#allocation6 + $0x220] sm:$0xff] }
 0x15d   : > { %v586_v59 = vpop.f32.mrf.mxu2  ;;  %2733 = vmatpush.bf16.msra.mxu0 %v6672_v49 }
 0x15e   : > { %v633_v61 = vadd.f32 %v7235_v10, %v586_v59 }
 0x15f   : > { %v867_v62 = vpop.f32.mrf.mxu3  ;;  %v533_v0 = vpop.f32.mrf.mxu0 }
 0x160   : > { %v7394_v4 = vadd.f32 %v867_v62, %v633_v61  ;;  %v612_v8 = vadd.f32 %v7235_v10, %v533_v0 }
 0x161   : > { %v814_v11 = vpop.f32.mrf.mxu1 }
 0x162   : > { %v7397_v14 = vadd.f32 %v814_v11, %v612_v8 }
 0x165   : > { %v588_v30 = vpop.f32.mrf.mxu2 }
 0x166   : > { %v634_v22 = vadd.f32 %v7235_v10, %v588_v30 }
 0x167   : > { %v869_v33 = vpop.f32.mrf.mxu3  ;;  %v536_v40 = vpop.f32.mrf.mxu0 }
 0x168   : > { %v7406_v44 = vadd.f32 %v869_v33, %v634_v22  ;;  %v613_v45 = vadd.f32 %v7235_v10, %v536_v40  ;;  %v1527_v22 = vpack.c.bf16 %v1494_v16, %v1493_v15  ;;  %v1808_v40 = vpack.c.bf16 %v1775_v21, %v1774_v19  ;;  %v1495_v15 = vld [vmem:[%s7157_s14 + $0x98] sm:$0xff]  ;;  %v1496_v16 = vld [vmem:[%s7157_s14 + $0xa0] sm:$0xff] }
 0x169   : > { %v817_v46 = vpop.f32.mrf.mxu1  ;;  %v1777_v19 = vld [vmem:[%s7157_s14 + $0xa1] sm:$0xff] }
 0x16a   : > { %v7409_v52 = vadd.f32 %v817_v46, %v613_v45  ;;  %1087 = vmatmul.bf16.gmra.mxu2 %v1245_v48  ;;  %1644 = vmatmul.bf16.gmra.mxu0 %v1526_v38  ;;  %v6683_v48 = vld [vmem:[#allocation8 + $0x38] sm:$0xff]  ;;  %v1247_v38 = vpack.c.bf16 %v1215_v17, %v1214_v12  ;;  %v1776_v17 = vld [vmem:[%s7157_s14 + $0x99] sm:$0xff] }
 0x16b   : > { %3424 = vmatpush.bf16.msra.mxu1 %v6683_v48  ;;  %v1216_v12 = vld [vmem:[%s7157_s14 + $0xa7] sm:$0xff] }
 0x16c   : > { %1368 = vmatmul.bf16.gmra.mxu3 %v1246_v41  ;;  %1925 = vmatmul.bf16.gmra.mxu1 %v1807_v42 }
 0x16d   : > { %v591_v55 = vpop.f32.mrf.mxu2 }
 0x16e   : > { %v635_v59 = vadd.f32 %v7235_v10, %v591_v55 }
 0x16f   : > { %v872_v61 = vpop.f32.mrf.mxu3  ;;  %v538_v62 = vpop.f32.mrf.mxu0 }
 0x170   : > { %v7412_v0 = vadd.f32 %v872_v61, %v635_v59  ;;  %v614_v8 = vadd.f32 %v7235_v10, %v538_v62 }
 0x171   : > { %v819_v11 = vpop.f32.mrf.mxu1 }
 0x172   : > { %v7415_v6 = vadd.f32 %v819_v11, %v614_v8 }
 0x175   : > { %v593_v29 = vpop.f32.mrf.mxu2 }
 0x177   : > { %v874_v30 = vpop.f32.mrf.mxu3  ;;  %v541_v33 = vpop.f32.mrf.mxu0 }
 0x178   : > { %v615_v42 = vadd.f32 %v7235_v10, %v541_v33 }
 0x179   : > { %v822_v45 = vpop.f32.mrf.mxu1 }
 0x17a   : > { %v7424_v46 = vadd.f32 %v822_v45, %v615_v42  ;;  %1092 = vmatmul.bf16.gmra.mxu2 %v1246_v41  ;;  %1649 = vmatmul.bf16.gmra.mxu0 %v1527_v22  ;;  %v1217_v41 = vld [vmem:[%s7157_s14 + $0xaf] sm:$0xff]  ;;  %v1528_v22 = vpack.c.bf16 %v1496_v16, %v1495_v15 }
 0x17b   : > { %v1248_v33 = vpack.c.bf16 %v1217_v41, %v1216_v12  ;;  %v6671_v16 = vld [vmem:[#allocation6 + $0x218] sm:$0xff] }
 0x17c   : > { %1373 = vmatmul.bf16.gmra.mxu3 %v1247_v38  ;;  %1930 = vmatmul.bf16.gmra.mxu1 %v1808_v40  ;;  %v1809_v40 = vpack.c.bf16 %v1777_v19, %v1776_v17  ;;  %v1218_v41 = vld [vmem:[%s7157_s14 + $0xb7] sm:$0xff]  ;;  %v1497_v17 = vld [vmem:[%s7157_s14 + $0xa8] sm:$0xff] }
 0x17d   : > { %v1053_v49 = vpop.f32.mrf.mxu2  ;;  %v1498_v19 = vld [vmem:[%s7157_s14 + $0xb0] sm:$0xff]  ;;  %2734 = vmatpush.bf16.msra.mxu0 %v6671_v16 }
 0x17e   : > { %v1157_v55 = vadd.f32 %v1053_v49, %v7245_v28  ;;  %v6655_v49 = vld [vmem:[#allocation6 + $0x198] sm:$0xff] }
 0x17f   : > { %v1334_v59 = vpop.f32.mrf.mxu3  ;;  %v543_v61 = vpop.f32.mrf.mxu0  ;;  %2172 = vmatpush.bf16.msra.mxu2 %v6655_v49 }
 0x180   : > { %v1438_v62 = vadd.f32 %v1334_v59, %v1157_v55  ;;  %v616_v8 = vadd.f32 %v7235_v10, %v543_v61 }
 0x181   : > { %v824_v11 = vpop.f32.mrf.mxu1 }
 0x182   : > { %v7428_v48 = vadd.f32 %v824_v11, %v616_v8 }
 0x185   : > { %v1055_v21 = vpop.f32.mrf.mxu2 }
 0x186   : > { %v1158_v29 = vadd.f32 %v1055_v21, %v7251_v39  ;;  %v6663_v39 = vld [vmem:[#allocation6 + $0x1d8] sm:$0xff]  ;;  %v1219_v21 = vld [vmem:[%s7157_s14 + $0xbf] sm:$0xff] }
 0x187   : > { %v1336_v30 = vpop.f32.mrf.mxu3  ;;  %v1615_v28 = vpop.f32.mrf.mxu0  ;;  %2453 = vmatpush.bf16.msra.mxu3 %v6663_v39 }
 0x188   : > { %v1439_v42 = vadd.f32 %v1336_v30, %v1158_v29  ;;  %v1719_v45 = vadd.f32 %v1615_v28, %v1438_v62  ;;  %v1778_v29 = vld [vmem:[%s7157_s14 + $0xa9] sm:$0xff]  ;;  %v1779_v30 = vld [vmem:[%s7157_s14 + $0xb1] sm:$0xff] }
 0x189   : > { %v1896_v10 = vpop.f32.mrf.mxu1  ;;  %v1810_v49 = vpack.c.bf16 %v1779_v30, %v1778_v29  ;;  %v1221_v29 = vld [vmem:[%s7157_s14 + $0xcf] sm:$0xff]  ;;  %v1780_v30 = vld [vmem:[%s7157_s14 + $0xb9] sm:$0xff] }
 0x18a   : > { %v7437_v55 = vadd.f32 %v1896_v10, %v1719_v45  ;;  %1097 = vmatmul.bf16.gmra.mxu2 %v1247_v38  ;;  %1654 = vmatmul.bf16.gmra.mxu0 %v1528_v22  ;;  %v1249_v10 = vpack.c.bf16 %v1219_v21, %v1218_v41  ;;  %v1500_v21 = vld [vmem:[%s7157_s14 + $0xc0] sm:$0xff] }
 0x18c   : > { %1378 = vmatmul.bf16.gmra.mxu3 %v1248_v33  ;;  %1935 = vmatmul.bf16.gmra.mxu1 %v1809_v40 }
 0x18d   : > { %v1058_v59 = vpop.f32.mrf.mxu2 }
 0x18e   : > { %v1159_v61 = vadd.f32 %v1058_v59, %v7263_v60  ;;  %v1529_v60 = vpack.c.bf16 %v1498_v19, %v1497_v17  ;;  %v1499_v19 = vld [vmem:[%s7157_s14 + $0xb8] sm:$0xff] }
 0x18f   : > { %v1339_v62 = vpop.f32.mrf.mxu3  ;;  %v1617_v8 = vpop.f32.mrf.mxu0 }
 0x190   : > { %v1440_v11 = vadd.f32 %v1339_v62, %v1159_v61  ;;  %v1720_v12 = vadd.f32 %v1617_v8, %v1439_v42 }
 0x191   : > { %v1898_v38 = vpop.f32.mrf.mxu1 }
 0x192   : > { %v7440_v15 = vadd.f32 %v1898_v38, %v1720_v12 }
 0x195   : > { %v1060_v22 = vpop.f32.mrf.mxu2 }
 0x196   : > { %v1160_v28 = vadd.f32 %v1060_v22, %v7269_v5  ;;  %v6682_v5 = vld [vmem:[#allocation8 + $0x30] sm:$0xff] }
 0x197   : > { %v1341_v40 = vpop.f32.mrf.mxu3  ;;  %v1620_v45 = vpop.f32.mrf.mxu0  ;;  %3425 = vmatpush.bf16.msra.mxu1 %v6682_v5  ;;  %v1781_v22 = vld [vmem:[%s7157_s14 + $0xc1] sm:$0xff] }
 0x198   : > { %v1441_v42 = vadd.f32 %v1341_v40, %v1160_v28  ;;  %v1721_v39 = vadd.f32 %v1620_v45, %v1440_v11  ;;  %v1530_v45 = vpack.c.bf16 %v1500_v21, %v1499_v19  ;;  %v6654_v19 = vld [vmem:[#allocation6 + $0x190] sm:$0xff] }
 0x199   : > { %v1901_v59 = vpop.f32.mrf.mxu1  ;;  %v6662_v21 = vld [vmem:[#allocation6 + $0x1d0] sm:$0xff]  ;;  %2173 = vmatpush.bf16.msra.mxu2 %v6654_v19 }
 0x19a   : > { %v7449_v61 = vadd.f32 %v1901_v59, %v1721_v39  ;;  %1102 = vmatmul.bf16.gmra.mxu2 %v1248_v33  ;;  %1659 = vmatmul.bf16.gmra.mxu0 %v1529_v60  ;;  %v1220_v33 = vld [vmem:[%s7157_s14 + $0xc7] sm:$0xff]  ;;  %v1811_v39 = vpack.c.bf16 %v1781_v22, %v1780_v30  ;;  %v1502_v30 = vld [vmem:[%s7157_s14 + $0xd0] sm:$0xff]  ;;  %v1223_v22 = vld [vmem:[%s7157_s14 + $0xdf] sm:$0xff] }
 0x19b   : > { %2454 = vmatpush.bf16.msra.mxu3 %v6662_v21 }
 0x19c   : > { %1383 = vmatmul.bf16.gmra.mxu3 %v1249_v10  ;;  %1940 = vmatmul.bf16.gmra.mxu1 %v1810_v49 }
 0x19d   : > { %v1063_v62 = vpop.f32.mrf.mxu2 }
 0x19e   : > { %v1161_v8 = vadd.f32 %v1063_v62, %v7283_v26  ;;  %v1250_v26 = vpack.c.bf16 %v1221_v29, %v1220_v33  ;;  %v1501_v29 = vld [vmem:[%s7157_s14 + $0xc8] sm:$0xff] }
 0x19f   : > { %v1344_v12 = vpop.f32.mrf.mxu3  ;;  %v1622_v11 = vpop.f32.mrf.mxu0 }
 0x1a0   : > { %v1442_v38 = vadd.f32 %v1344_v12, %v1161_v8  ;;  %v1722_v16 = vadd.f32 %v1622_v11, %v1441_v42 }
 0x1a1   : > { %v1903_v41 = vpop.f32.mrf.mxu1 }
 0x1a2   : > { %v7452_v17 = vadd.f32 %v1903_v41, %v1722_v16 }
 0x1a5   : > { %v1065_v28 = vpop.f32.mrf.mxu2 }
 0x1a6   : > { %v1162_v40 = vadd.f32 %v1065_v28, %v7289_v36  ;;  %v1782_v28 = vld [vmem:[%s7157_s14 + $0xc9] sm:$0xff] }
 0x1a7   : > { %v1346_v60 = vpop.f32.mrf.mxu3  ;;  %v1625_v49 = vpop.f32.mrf.mxu0 }
 0x1a8   : > { %v1443_v59 = vadd.f32 %v1346_v60, %v1162_v40  ;;  %v1723_v5 = vadd.f32 %v1625_v49, %v1442_v38  ;;  %v1783_v40 = vld [vmem:[%s7157_s14 + $0xd1] sm:$0xff]  ;;  %v1531_v49 = vpack.c.bf16 %v1502_v30, %v1501_v29  ;;  %v1224_v30 = vld [vmem:[%s7157_s14 + $0xe7] sm:$0xff] }
 0x1a9   : > { %v1906_v42 = vpop.f32.mrf.mxu1 }
 0x1aa   : > { %v7461_v62 = vadd.f32 %v1906_v42, %v1723_v5  ;;  %1107 = vmatmul.bf16.gmra.mxu2 %v1249_v10  ;;  %1664 = vmatmul.bf16.gmra.mxu0 %v1530_v45  ;;  %v1222_v10 = vld [vmem:[%s7157_s14 + $0xd7] sm:$0xff]  ;;  %v1812_v5 = vpack.c.bf16 %v1783_v40, %v1782_v28  ;;  %v1504_v28 = vld [vmem:[%s7157_s14 + $0xe0] sm:$0xff]  ;;  %v1225_v40 = vld [vmem:[%s7157_s14 + $0xef] sm:$0xff] }
 0x1ac   : > { %1388 = vmatmul.bf16.gmra.mxu3 %v1250_v26  ;;  %1945 = vmatmul.bf16.gmra.mxu1 %v1811_v39 }
 0x1ad   : > { %v1068_v36 = vpop.f32.mrf.mxu2 }
 0x1ae   : > { %v1163_v8 = vadd.f32 %v1068_v36, %v7301_v54 }
 0x1af   : > { %v1349_v12 = vpop.f32.mrf.mxu3  ;;  %v1627_v11 = vpop.f32.mrf.mxu0 }
 0x1b0   : > { %v1444_v16 = vadd.f32 %v1349_v12, %v1163_v8  ;;  %v1724_v38 = vadd.f32 %v1627_v11, %v1443_v59  ;;  %v1251_v59 = vpack.c.bf16 %v1223_v22, %v1222_v10  ;;  %v1503_v22 = vld [vmem:[%s7157_s14 + $0xd8] sm:$0xff] }
 0x1b1   : > { %v1908_v41 = vpop.f32.mrf.mxu1 }
 0x1b2   : > { %v7464_v33 = vadd.f32 %v1908_v41, %v1724_v38 }
 0x1b5   : > { %v1070_v60 = vpop.f32.mrf.mxu2 }
 0x1b6   : > { %v1164_v54 = vadd.f32 %v1070_v60, %v7307_v3  ;;  %v6670_v3 = vld [vmem:[#allocation6 + $0x210] sm:$0xff] }
 0x1b7   : > { %v1351_v45 = vpop.f32.mrf.mxu3  ;;  %v1630_v39 = vpop.f32.mrf.mxu0  ;;  %2735 = vmatpush.bf16.msra.mxu0 %v6670_v3  ;;  %v1784_v60 = vld [vmem:[%s7157_s14 + $0xd9] sm:$0xff] }
 0x1b8   : > { %v1445_v42 = vadd.f32 %v1351_v45, %v1164_v54  ;;  %v1725_v36 = vadd.f32 %v1630_v39, %v1444_v16  ;;  %v1785_v54 = vld [vmem:[%s7157_s14 + $0xe1] sm:$0xff] }
 0x1b9   : > { %v1911_v8 = vpop.f32.mrf.mxu1 }
 0x1ba   : > { %v7473_v12 = vadd.f32 %v1911_v8, %v1725_v36  ;;  %1112 = vmatmul.bf16.gmra.mxu2 %v1250_v26  ;;  %1669 = vmatmul.bf16.gmra.mxu0 %v1531_v49  ;;  %v6681_v26 = vld [vmem:[#allocation8 + $0x28] sm:$0xff]  ;;  %v1252_v36 = vpack.c.bf16 %v1225_v40, %v1224_v30  ;;  %v1813_v8 = vpack.c.bf16 %v1785_v54, %v1784_v60  ;;  %v1506_v40 = vld [vmem:[%s7157_s14 + $0xf0] sm:$0xff] }
 0x1bb   : > { %3426 = vmatpush.bf16.msra.mxu1 %v6681_v26  ;;  %v1227_v60 = vld [vmem:[%s7157_s14 + $0xff] sm:$0xff]  ;;  %v1787_v54 = vld [vmem:[%s7157_s14 + $0xf1] sm:$0xff] }
 0x1bc   : > { %1393 = vmatmul.bf16.gmra.mxu3 %v1251_v59  ;;  %1950 = vmatmul.bf16.gmra.mxu1 %v1812_v5 }
 0x1bd   : > { %v1073_v11 = vpop.f32.mrf.mxu2 }
 0x1be   : > { %v1165_v38 = vadd.f32 %v1073_v11, %v7319_v24  ;;  %v1532_v24 = vpack.c.bf16 %v1504_v28, %v1503_v22  ;;  %v1226_v22 = vld [vmem:[%s7157_s14 + $0xf7] sm:$0xff]  ;;  %v1505_v28 = vld [vmem:[%s7157_s14 + $0xe8] sm:$0xff] }
 0x1bf   : > { %v1354_v41 = vpop.f32.mrf.mxu3  ;;  %v1632_v16 = vpop.f32.mrf.mxu0 }
 0x1c0   : > { %v1446_v19 = vadd.f32 %v1354_v41, %v1165_v38  ;;  %v1726_v21 = vadd.f32 %v1632_v16, %v1445_v42 }
 0x1c1   : > { %v1913_v10 = vpop.f32.mrf.mxu1 }
 0x1c2   : > { %v7476_v29 = vadd.f32 %v1913_v10, %v1726_v21 }
 0x1c5   : > { %v1075_v45 = vpop.f32.mrf.mxu2 }
 0x1c6   : > { %v1166_v49 = vadd.f32 %v1075_v45, %v7325_v37 }
 0x1c7   : > { %v1356_v39 = vpop.f32.mrf.mxu3  ;;  %v1635_v5 = vpop.f32.mrf.mxu0 }
 0x1c8   : > { %v1447_v42 = vadd.f32 %v1356_v39, %v1166_v49  ;;  %v1727_v3 = vadd.f32 %v1635_v5, %v1446_v19 }
 0x1c9   : > { %v1916_v11 = vpop.f32.mrf.mxu1 }
 0x1ca   : > { %v7485_v38 = vadd.f32 %v1916_v11, %v1727_v3  ;;  %1117 = vmatmul.bf16.gmra.mxu2 %v1251_v59  ;;  %1674 = vmatmul.bf16.gmra.mxu0 %v1532_v24  ;;  %v1786_v59 = vld [vmem:[%s7157_s14 + $0xe9] sm:$0xff]  ;;  %v1533_v24 = vpack.c.bf16 %v1506_v40, %v1505_v28  ;;  %v7018_v28 = vmov 0  }
 0x1cb   : > { %6844 = vset.pattern.permute.xlu0 %v7018_v28  ;;  %v311_v40 = vld [vmem:[%s8608_s1] sm:$0xff]  ;;  %6845 = vset.pattern.permute.xlu1 %v7018_v28 }
 0x1cc   : > { %1398 = vmatmul.bf16.gmra.mxu3 %v1252_v36  ;;  %1955 = vmatmul.bf16.gmra.mxu1 %v1813_v8  ;;  %v1814_v8 = vpack.c.bf16 %v1787_v54, %v1786_v59  ;;  %v1507_v59 = vld [vmem:[%s7157_s14 + $0xf8] sm:$0xff]  ;;  %v1508_v54 = vld [vmem:[%s7157_s14 + $0x100] sm:$0xff] }
 0x1cd   : > { %v1078_v37 = vpop.f32.mrf.mxu2  ;;  %2927 = vperm.xlu0 %6844, %v311_v40   ;;  %6846 = vset.pattern.permute.xlu2 %v7018_v28 }
 0x1ce   : > { %v1167_v41 = vadd.f32 %v1078_v37, %v7337_v58  ;;  %v1253_v58 = vpack.c.bf16 %v1227_v60, %v1226_v22 }
 0x1cf   : > { %v1359_v16 = vpop.f32.mrf.mxu3  ;;  %v1637_v21 = vpop.f32.mrf.mxu0 }
 0x1d0   : > { %v1448_v10 = vadd.f32 %v1359_v16, %v1167_v41  ;;  %v1728_v26 = vadd.f32 %v1637_v21, %v1447_v42  ;;  %v6653_v41 = vld [vmem:[#allocation6 + $0x188] sm:$0xff] }
 0x1d1   : > { %v1918_v19 = vpop.f32.mrf.mxu1  ;;  %2174 = vmatpush.bf16.msra.mxu2 %v6653_v41 }
 0x1d2   : > { %v7488_v30 = vadd.f32 %v1918_v19, %v1728_v26 }
 0x1d5   : > { %v1080_v45 = vpop.f32.mrf.mxu2 }
 0x1d6   : > { %v1168_v49 = vadd.f32 %v1080_v45, %v7343_v7  ;;  %v1229_v45 = vld [vmem:[%s7157_s14 + $0x10f] sm:$0xff] }
 0x1d7   : > { %v1361_v39 = vpop.f32.mrf.mxu3  ;;  %v1640_v5 = vpop.f32.mrf.mxu0 }
 0x1d8   : > { %v1449_v3 = vadd.f32 %v1361_v39, %v1168_v49  ;;  %v1729_v11 = vadd.f32 %v1640_v5, %v1448_v10  ;;  %v1788_v49 = vld [vmem:[%s7157_s14 + $0xf9] sm:$0xff]  ;;  %v1789_v39 = vld [vmem:[%s7157_s14 + $0x101] sm:$0xff] }
 0x1d9   : > { %v1921_v42 = vpop.f32.mrf.mxu1  ;;  %v1815_v41 = vpack.c.bf16 %v1789_v39, %v1788_v49  ;;  %v1509_v39 = vld [vmem:[%s7157_s14 + $0x108] sm:$0xff] }
 0x1da   : > { %v7497_v37 = vadd.f32 %v1921_v42, %v1729_v11  ;;  %1122 = vmatmul.bf16.gmra.mxu2 %v1252_v36  ;;  %1679 = vmatmul.bf16.gmra.mxu0 %v1533_v24  ;;  %v6661_v36 = vld [vmem:[#allocation6 + $0x1c8] sm:$0xff] }
 0x1db   : > { %2455 = vmatpush.bf16.msra.mxu3 %v6661_v36 }
 0x1dc   : > { %1403 = vmatmul.bf16.gmra.mxu3 %v1253_v58  ;;  %1960 = vmatmul.bf16.gmra.mxu1 %v1814_v8 }
 0x1dd   : > { %v1083_v16 = vpop.f32.mrf.mxu2 }
 0x1de   : > { %v1169_v7 = vadd.f32 %v1083_v16, %v7355_v35  ;;  %v1228_v35 = vld [vmem:[%s7157_s14 + $0x107] sm:$0xff] }
 0x1df   : > { %v1364_v21 = vpop.f32.mrf.mxu3  ;;  %v1642_v26 = vpop.f32.mrf.mxu0  ;;  %v1254_v42 = vpack.c.bf16 %v1229_v45, %v1228_v35  ;;  %v317_v45 = vld [vmem:[%s8608_s1 + $0x30] sm:$0xff] }
 0x1e0   : > { %v1450_v19 = vadd.f32 %v1364_v21, %v1169_v7  ;;  %v1730_v10 = vadd.f32 %v1642_v26, %v1449_v3  ;;  %v1534_v3 = vpack.c.bf16 %v1508_v54, %v1507_v59  ;;  %v6669_v26 = vld [vmem:[#allocation6 + $0x208] sm:$0xff] }
 0x1e1   : > { %v1923_v22 = vpop.f32.mrf.mxu1  ;;  %2736 = vmatpush.bf16.msra.mxu0 %v6669_v26  ;;  %v313_v54 = vld [vmem:[%s8608_s1 + $0x10] sm:$0xff] }
 0x1e2   : > { %v7503_v60 = vadd.f32 %v1923_v22, %v1730_v10  ;;  %v312_v10 = vld [vmem:[%s8608_s1 + $0x8] sm:$0xff]  ;;  %2937 = vperm.xlu1 %6845, %v313_v54  }
 0x1e3   : > { %2932 = vperm.xlu0 %6844, %v312_v10  }
 0x1e5   : > { %v1085_v24 = vpop.f32.mrf.mxu2 }
 0x1e6   : > { %v1170_v5 = vadd.f32 %v1085_v24, %v7361_v47  ;;  %v1510_v24 = vld [vmem:[%s7157_s14 + $0x110] sm:$0xff] }
 0x1e7   : > { %v1366_v8 = vpop.f32.mrf.mxu3  ;;  %v1645_v11 = vpop.f32.mrf.mxu0 }
 0x1e8   : > { %v1451_v16 = vadd.f32 %v1366_v8, %v1170_v5  ;;  %v1731_v7 = vadd.f32 %v1645_v11, %v1450_v19  ;;  %v1231_v5 = vld [vmem:[%s7157_s14 + $0x11f] sm:$0xff]  ;;  %v1790_v8 = vld [vmem:[%s7157_s14 + $0x109] sm:$0xff] }
 0x1e9   : > { %v1926_v21 = vpop.f32.mrf.mxu1 }
 0x1ea   : > { %v7515_v22 = vadd.f32 %v1926_v21, %v1731_v7  ;;  %1127 = vmatmul.bf16.gmra.mxu2 %v1253_v58  ;;  %1684 = vmatmul.bf16.gmra.mxu0 %v1534_v3  ;;  %v6680_v58 = vld [vmem:[#allocation8 + $0x20] sm:$0xff]  ;;  %v1535_v7 = vpack.c.bf16 %v1510_v24, %v1509_v39  ;;  %v323_v24 = vld [vmem:[%s8608_s1 + $0x60] sm:$0xff] }
 0x1eb   : > { %3427 = vmatpush.bf16.msra.mxu1 %v6680_v58  ;;  %v1791_v3 = vld [vmem:[%s7157_s14 + $0x111] sm:$0xff]  ;;  %2957 = vperm.xlu0 %6844, %v317_v45  }
 0x1ec   : > { %1408 = vmatmul.bf16.gmra.mxu3 %v1254_v42  ;;  %1965 = vmatmul.bf16.gmra.mxu1 %v1815_v41  ;;  %v1816_v10 = vpack.c.bf16 %v1791_v3, %v1790_v8  ;;  %v1232_v8 = vld [vmem:[%s7157_s14 + $0x127] sm:$0xff]  ;;  %v1511_v3 = vld [vmem:[%s7157_s14 + $0x118] sm:$0xff] }
 0x1ed   : > { %v1088_v47 = vpop.f32.mrf.mxu2 }
 0x1ee   : > { %v1171_v19 = vadd.f32 %v1088_v47, %v7373_v13  ;;  %v1230_v13 = vld [vmem:[%s7157_s14 + $0x117] sm:$0xff] }
 0x1ef   : > { %v1369_v36 = vpop.f32.mrf.mxu3  ;;  %v1647_v28 = vpop.f32.mrf.mxu0  ;;  %v1255_v26 = vpack.c.bf16 %v1231_v5, %v1230_v13 }
 0x1f0   : > { %v1452_v40 = vadd.f32 %v1369_v36, %v1171_v19  ;;  %v1732_v35 = vadd.f32 %v1647_v28, %v1451_v16  ;;  %v314_v28 = vld [vmem:[%s8608_s1 + $0x18] sm:$0xff] }
 0x1f1   : > { %v1928_v59 = vpop.f32.mrf.mxu1  ;;  %2942 = vperm.xlu1 %6845, %v314_v28  }
 0x1f2   : > { %v7524_v49 = vadd.f32 %v1928_v59, %v1732_v35  ;;  %v320_v35 = vld [vmem:[%s8608_s1 + $0x48] sm:$0xff] }
 0x1f3   : > { %2972 = vperm.xlu0 %6844, %v320_v35  }
 0x1f5   : > { %v1090_v11 = vpop.f32.mrf.mxu2 }
 0x1f6   : > { %v1172_v41 = vadd.f32 %v1090_v11, %v7379_v25  ;;  %v1512_v11 = vld [vmem:[%s7157_s14 + $0x120] sm:$0xff] }
 0x1f7   : > { %v1371_v16 = vpop.f32.mrf.mxu3  ;;  %v1650_v21 = vpop.f32.mrf.mxu0 }
 0x1f8   : > { %v1453_v47 = vadd.f32 %v1371_v16, %v1172_v41  ;;  %v1733_v19 = vadd.f32 %v1650_v21, %v1452_v40  ;;  %v1233_v41 = vld [vmem:[%s7157_s14 + $0x12f] sm:$0xff]  ;;  %v1793_v16 = vld [vmem:[%s7157_s14 + $0x121] sm:$0xff] }
 0x1f9   : > { %v1931_v36 = vpop.f32.mrf.mxu1 }
 0x1fa   : > { %v7539_v59 = vadd.f32 %v1931_v36, %v1733_v19  ;;  %1132 = vmatmul.bf16.gmra.mxu2 %v1254_v42  ;;  %1689 = vmatmul.bf16.gmra.mxu0 %v1535_v7  ;;  %v318_v42 = vld [vmem:[%s8608_s1 + $0x38] sm:$0xff]  ;;  %v1256_v36 = vpack.c.bf16 %v1233_v41, %v1232_v8  ;;  %v6668_v41 = vld [vmem:[#allocation6 + $0x200] sm:$0xff] }
 0x1fb   : > { %2962 = vperm.xlu1 %6845, %v318_v42   ;;  %2987 = vperm.xlu0 %6844, %v323_v24  }
 0x1fc   : > { %1413 = vmatmul.bf16.gmra.mxu3 %v1255_v26  ;;  %1970 = vmatmul.bf16.gmra.mxu1 %v1816_v10 }
 0x1fd   : > { %v1093_v25 = vpop.f32.mrf.mxu2  ;;  %2737 = vmatpush.bf16.msra.mxu0 %v6668_v41 }
 0x1fe   : > { %v1173_v40 = vadd.f32 %v1093_v25, %v7391_v57  ;;  %v1792_v57 = vld [vmem:[%s7157_s14 + $0x119] sm:$0xff] }
 0x1ff   : > { %v1374_v58 = vpop.f32.mrf.mxu3  ;;  %v1652_v54 = vpop.f32.mrf.mxu0  ;;  %v1817_v28 = vpack.c.bf16 %v1793_v16, %v1792_v57  ;;  %v324_v16 = vld [vmem:[%s8608_s1 + $0x68] sm:$0xff] }
 0x200   : > { %v1454_v45 = vadd.f32 %v1374_v58, %v1173_v40  ;;  %v1734_v13 = vadd.f32 %v1652_v54, %v1453_v47  ;;  %v1536_v47 = vpack.c.bf16 %v1512_v11, %v1511_v3  ;;  %v6652_v58 = vld [vmem:[#allocation6 + $0x180] sm:$0xff] }
 0x201   : > { %v1933_v39 = vpop.f32.mrf.mxu1  ;;  %v6660_v54 = vld [vmem:[#allocation6 + $0x1c0] sm:$0xff]  ;;  %2175 = vmatpush.bf16.msra.mxu2 %v6652_v58 }
 0x202   : > { %v7548_v5 = vadd.f32 %v1933_v39, %v1734_v13  ;;  %v321_v39 = vld [vmem:[%s8608_s1 + $0x50] sm:$0xff]  ;;  %2456 = vmatpush.bf16.msra.mxu3 %v6660_v54 }
 0x203   : > { %2977 = vperm.xlu1 %6845, %v321_v39  }
 0x205   : > { %v1095_v7 = vpop.f32.mrf.mxu2 }
 0x206   : > { %v1174_v21 = vadd.f32 %v1095_v7, %v7397_v14  ;;  %v326_v14 = vld [vmem:[%s8608_s1 + $0x78] sm:$0xff]  ;;  %v329_v7 = vld [vmem:[%s8608_s1 + $0x90] sm:$0xff] }
 0x207   : > { %v1376_v10 = vpop.f32.mrf.mxu3  ;;  %v1655_v19 = vpop.f32.mrf.mxu0  ;;  %3002 = vperm.xlu0 %6844, %v326_v14  }
 0x208   : > { %v1455_v35 = vadd.f32 %v1376_v10, %v1174_v21  ;;  %v1735_v25 = vadd.f32 %v1655_v19, %v1454_v45  ;;  %v1234_v21 = vld [vmem:[%s7157_s14 + $0x137] sm:$0xff]  ;;  %v1794_v19 = vld [vmem:[%s7157_s14 + $0x129] sm:$0xff] }
 0x209   : > { %v1936_v40 = vpop.f32.mrf.mxu1  ;;  %v1514_v10 = vld [vmem:[%s7157_s14 + $0x130] sm:$0xff] }
 0x20a   : > { %v7557_v13 = vadd.f32 %v1936_v40, %v1735_v25  ;;  %1137 = vmatmul.bf16.gmra.mxu2 %v1255_v26  ;;  %1694 = vmatmul.bf16.gmra.mxu0 %v1536_v47  ;;  %v1235_v47 = vld [vmem:[%s7157_s14 + $0x13f] sm:$0xff] }
 0x20b   : > { %2992 = vperm.xlu1 %6845, %v324_v16   ;;  %v1257_v39 = vpack.c.bf16 %v1235_v47, %v1234_v21  ;;  %v330_v47 = vld [vmem:[%s8608_s1 + $0x98] sm:$0xff] }
 0x20c   : > { %1418 = vmatmul.bf16.gmra.mxu3 %v1256_v36  ;;  %1975 = vmatmul.bf16.gmra.mxu1 %v1817_v28  ;;  %v1795_v28 = vld [vmem:[%s7157_s14 + $0x131] sm:$0xff] }
 0x20d   : > { %v1098_v45 = vpop.f32.mrf.mxu2  ;;  %v1818_v14 = vpack.c.bf16 %v1795_v28, %v1794_v19  ;;  %v1236_v19 = vld [vmem:[%s7157_s14 + $0x147] sm:$0xff]  ;;  %v1515_v28 = vld [vmem:[%s7157_s14 + $0x138] sm:$0xff] }
 0x20e   : > { %v1175_v26 = vadd.f32 %v1098_v45, %v7409_v52  ;;  %v1513_v52 = vld [vmem:[%s7157_s14 + $0x128] sm:$0xff] }
 0x20f   : > { %v1379_v42 = vpop.f32.mrf.mxu3  ;;  %v1657_v24 = vpop.f32.mrf.mxu0  ;;  %3017 = vperm.xlu0 %6844, %v329_v7   ;;  %v1537_v58 = vpack.c.bf16 %v1514_v10, %v1513_v52  ;;  %v315_v10 = vld [vmem:[%s8608_s1 + $0x20] sm:$0xff] }
 0x210   : > { %v1456_v8 = vadd.f32 %v1379_v42, %v1175_v26  ;;  %v1736_v3 = vadd.f32 %v1657_v24, %v1455_v35  ;;  %v6679_v24 = vld [vmem:[#allocation8 + $0x18] sm:$0xff]  ;;  %2947 = vperm.xlu2 %6846, %v315_v10   ;;  %v338_v10 = vld [vmem:[%s8608_s1 + $0xd8] sm:$0xff] }
 0x211   : > { %v1938_v11 = vpop.f32.mrf.mxu1  ;;  %3428 = vmatpush.bf16.msra.mxu1 %v6679_v24 }
 0x212   : > { %v7566_v57 = vadd.f32 %v1938_v11, %v1736_v3  ;;  %v327_v11 = vld [vmem:[%s8608_s1 + $0x80] sm:$0xff] }
 0x213   : > { %3007 = vperm.xlu1 %6845, %v327_v11  }
 0x215   : > { %v1100_v35 = vpop.f32.mrf.mxu2 }
 0x216   : > { %v1176_v25 = vadd.f32 %v1100_v35, %v7415_v6  ;;  %v332_v6 = vld [vmem:[%s8608_s1 + $0xa8] sm:$0xff]  ;;  %v1516_v35 = vld [vmem:[%s7157_s14 + $0x140] sm:$0xff] }
 0x217   : > { %v1381_v40 = vpop.f32.mrf.mxu3  ;;  %v1660_v54 = vpop.f32.mrf.mxu0  ;;  %3032 = vperm.xlu0 %6844, %v332_v6  }
 0x218   : > { %v1457_v45 = vadd.f32 %v1381_v40, %v1176_v25  ;;  %v1737_v26 = vadd.f32 %v1660_v54, %v1456_v8  ;;  %v1237_v25 = vld [vmem:[%s7157_s14 + $0x14f] sm:$0xff]  ;;  %v1796_v40 = vld [vmem:[%s7157_s14 + $0x139] sm:$0xff] }
 0x219   : > { %v1941_v42 = vpop.f32.mrf.mxu1  ;;  %v1258_v24 = vpack.c.bf16 %v1237_v25, %v1236_v19 }
 0x21a   : > { %v7581_v3 = vadd.f32 %v1941_v42, %v1737_v26  ;;  %1142 = vmatmul.bf16.gmra.mxu2 %v1256_v36  ;;  %1699 = vmatmul.bf16.gmra.mxu0 %v1537_v58  ;;  %v1797_v58 = vld [vmem:[%s7157_s14 + $0x141] sm:$0xff]  ;;  %v1538_v26 = vpack.c.bf16 %v1516_v35, %v1515_v28 }
 0x21b   : > { %3022 = vperm.xlu1 %6845, %v330_v47   ;;  %v1819_v11 = vpack.c.bf16 %v1797_v58, %v1796_v40  ;;  %v319_v40 = vld [vmem:[%s8608_s1 + $0x40] sm:$0xff]  ;;  %v336_v58 = vld [vmem:[%s8608_s1 + $0xc8] sm:$0xff] }
 0x21c   : > { %1423 = vmatmul.bf16.gmra.mxu3 %v1257_v39  ;;  %1980 = vmatmul.bf16.gmra.mxu1 %v1818_v14 }
 0x21d   : > { %v1103_v8 = vpop.f32.mrf.mxu2 }
 0x21e   : > { %v1177_v36 = vadd.f32 %v1103_v8, %v7424_v46  ;;  %v335_v46 = vld [vmem:[%s8608_s1 + $0xc0] sm:$0xff] }
 0x21f   : > { %v1384_v41 = vpop.f32.mrf.mxu3  ;;  %v1662_v16 = vpop.f32.mrf.mxu0  ;;  %3047 = vperm.xlu0 %6844, %v335_v46  }
 0x220   : > { %v1458_v7 = vadd.f32 %v1384_v41, %v1177_v36  ;;  %v7590_v21 = vadd.f32 %v1662_v16, %v1457_v45  ;;  %v316_v41 = vld [vmem:[%s8608_s1 + $0x28] sm:$0xff] }
 0x221   : > { %v7592_v52 = vpop.f32.mrf.mxu1  ;;  %2952 = vperm.xlu2 %6846, %v316_v41  }
 0x225   : > { %v1105_v54 = vpop.f32.mrf.mxu2 }
 0x226   : > { %v1178_v14 = vadd.f32 %v1105_v54, %v7428_v48  ;;  %v333_v48 = vld [vmem:[%s8608_s1 + $0xb0] sm:$0xff] }
 0x227   : > { %v1386_v45 = vpop.f32.mrf.mxu3  ;;  %v1665_v42 = vpop.f32.mrf.mxu0  ;;  %3037 = vperm.xlu1 %6845, %v333_v48   ;;  %3062 = vperm.xlu0 %6844, %v338_v10   ;;  %v341_v54 = vld [vmem:[%s8608_s1 + $0xf0] sm:$0xff] }
 0x228   : > { %v1459_v6 = vadd.f32 %v1386_v45, %v1178_v14  ;;  %v1739_v8 = vadd.f32 %v1665_v42, %v1458_v7  ;;  %v1518_v14 = vld [vmem:[%s7157_s14 + $0x150] sm:$0xff] }
 0x229   : > { %v1946_v36 = vpop.f32.mrf.mxu1  ;;  %v1238_v45 = vld [vmem:[%s7157_s14 + $0x157] sm:$0xff]  ;;  %2967 = vperm.xlu2 %6846, %v319_v40  }
 0x22a   : > { %v7613_v16 = vadd.f32 %v1946_v36, %v1739_v8  ;;  %1147 = vmatmul.bf16.gmra.mxu2 %v1257_v39  ;;  %1704 = vmatmul.bf16.gmra.mxu0 %v1538_v26  ;;  %v1798_v26 = vld [vmem:[%s7157_s14 + $0x149] sm:$0xff]  ;;  %v1799_v42 = vld [vmem:[%s7157_s14 + $0x151] sm:$0xff]  ;;  %v978_v8 = vpack.c.bf16 %v1236_v19, %v1236_v19  ;;  %v1259_v48 = vpack.c.bf16 %v1238_v45, %v1238_v45 }
 0x22b   : > { %v1820_v10 = vpack.c.bf16 %v1799_v42, %v1798_v26  ;;  %v344_v19 = vld [vmem:[%s8608_s1 + $0x108] sm:$0xff]  ;;  %v325_v26 = vld [vmem:[%s8608_s1 + $0x70] sm:$0xff]  ;;  %v342_v42 = vld [vmem:[%s8608_s1 + $0xf8] sm:$0xff] }
 0x22c   : > { %1428 = vmatmul.bf16.gmra.mxu3 %v1258_v24  ;;  %1985 = vmatmul.bf16.gmra.mxu1 %v1819_v11 }
 0x22d   : > { %v1108_v7 = vpop.f32.mrf.mxu2 }
 0x22e   : > { %v1179_v39 = vadd.f32 %v1108_v7, %v7248_v34  ;;  %v1517_v34 = vld [vmem:[%s7157_s14 + $0x148] sm:$0xff] }
 0x22f   : > { %v1389_v47 = vpop.f32.mrf.mxu3  ;;  %v1667_v46 = vpop.f32.mrf.mxu0  ;;  %3052 = vperm.xlu1 %6845, %v336_v58   ;;  %3077 = vperm.xlu0 %6844, %v341_v54   ;;  %v1539_v36 = vpack.c.bf16 %v1518_v14, %v1517_v34 }
 0x230   : > { %v1460_v28 = vadd.f32 %v1389_v47, %v1179_v39  ;;  %v7622_v35 = vadd.f32 %v1667_v46, %v1459_v6  ;;  %v322_v46 = vld [vmem:[%s8608_s1 + $0x58] sm:$0xff] }
 0x231   : > { %v7624_v25 = vpop.f32.mrf.mxu1  ;;  %2982 = vperm.xlu2 %6846, %v322_v46  }
 0x232   : > { %8623 = vst [vmem:[#allocation13_spill] sm:$0xff] %v7624_v25 }
 0x235   : > { %v1110_v24 = vpop.f32.mrf.mxu2 }
 0x236   : > { %v1180_v11 = vadd.f32 %v1110_v24, %v7260_v56  ;;  %v339_v56 = vld [vmem:[%s8608_s1 + $0xe0] sm:$0xff] }
 0x237   : > { %v1391_v6 = vpop.f32.mrf.mxu3  ;;  %v1670_v41 = vpop.f32.mrf.mxu0  ;;  %3067 = vperm.xlu1 %6845, %v339_v56   ;;  %3092 = vperm.xlu0 %6844, %v344_v19   ;;  %v347_v24 = vld [vmem:[%s8608_s1 + $0x120] sm:$0xff] }
 0x238   : > { %v1461_v7 = vadd.f32 %v1391_v6, %v1180_v11  ;;  %v1741_v39 = vadd.f32 %v1670_v41, %v1460_v28  ;;  %v1519_v11 = vld [vmem:[%s7157_s14 + $0x158] sm:$0xff]  ;;  %v2041_v6 = vld [vmem:[%s7157_s14 + $0x29] sm:$0xff] }
 0x239   : > { %v1951_v47 = vpop.f32.mrf.mxu1  ;;  %v2323_v41 = vld [vmem:[%s7157_s14 + $0x32] sm:$0xff]  ;;  %2997 = vperm.xlu2 %6846, %v325_v26  }
 0x23a   : > { %v7644_v25 = vadd.f32 %v1951_v47, %v1741_v39  ;;  %1152 = vmatmul.bf16.gmra.mxu2 %v978_v8  ;;  %1709 = vmatmul.bf16.gmra.mxu0 %v1539_v36  ;;  %v2042_v8 = vld [vmem:[%s7157_s14 + $0x31] sm:$0xff]  ;;  %v1540_v47 = vpack.c.bf16 %v1519_v11, %v1519_v11 }
 0x23b   : > { %v2322_v36 = vld [vmem:[%s7157_s14 + $0x2a] sm:$0xff]  ;;  %v2082_v46 = vpack.c.bf16 %v2042_v8, %v2041_v6 }
 0x23c   : > { %1433 = vmatmul.bf16.gmra.mxu3 %v1259_v48  ;;  %1990 = vmatmul.bf16.gmra.mxu1 %v1820_v10  ;;  %v1800_v48 = vld [vmem:[%s7157_s14 + $0x159] sm:$0xff]  ;;  %v2363_v19 = vpack.c.bf16 %v2323_v41, %v2322_v36  ;;  %v331_v41 = vld [vmem:[%s8608_s1 + $0xa0] sm:$0xff] }
 0x23d   : > { %v1113_v28 = vpop.f32.mrf.mxu2 }
 0x23e   : > { %v1181_v40 = vadd.f32 %v1113_v28, %v7266_v2  ;;  %v6678_v2 = vld [vmem:[#allocation8 + $0x10] sm:$0xff]  ;;  %v1821_v28 = vpack.c.bf16 %v1800_v48, %v1800_v48 }
 0x23f   : > { %v1394_v58 = vpop.f32.mrf.mxu3  ;;  %v1672_v54 = vpop.f32.mrf.mxu0  ;;  %3429 = vmatpush.bf16.msra.mxu1 %v6678_v2  ;;  %3082 = vperm.xlu1 %6845, %v342_v42   ;;  %v350_v42 = vld [vmem:[%s8608_s1 + $0x138] sm:$0xff] }
 0x240   : > { %v1462_v34 = vadd.f32 %v1394_v58, %v1181_v40  ;;  %v7653_v14 = vadd.f32 %v1672_v54, %v1461_v7  ;;  %3107 = vperm.xlu0 %6844, %v347_v24   ;;  %v2043_v48 = vld [vmem:[%s7157_s14 + $0x39] sm:$0xff] }
 0x241   : > { %v7655_v45 = vpop.f32.mrf.mxu1 }
 0x242   : > { %8624 = vst [vmem:[#allocation14_spill] sm:$0xff] %v7655_v45  ;;  %v328_v45 = vld [vmem:[%s8608_s1 + $0x88] sm:$0xff] }
 0x243   : > { %3012 = vperm.xlu2 %6846, %v328_v45   ;;  %v348_v45 = vld [vmem:[%s8608_s1 + $0x128] sm:$0xff] }
 0x245   : > { %v1115_v10 = vpop.f32.mrf.mxu2 }
 0x246   : > { %v1182_v7 = vadd.f32 %v1115_v10, %v7280_v23  ;;  %v345_v23 = vld [vmem:[%s8608_s1 + $0x110] sm:$0xff] }
 0x247   : > { %v1396_v39 = vpop.f32.mrf.mxu3  ;;  %v1675_v56 = vpop.f32.mrf.mxu0  ;;  %3097 = vperm.xlu1 %6845, %v345_v23   ;;  %v2044_v10 = vld [vmem:[%s7157_s14 + $0x41] sm:$0xff] }
 0x248   : > { %v1463_v40 = vadd.f32 %v1396_v39, %v1182_v7  ;;  %v1743_v58 = vadd.f32 %v1675_v56, %v1462_v34  ;;  %3122 = vperm.xlu0 %6844, %v350_v42   ;;  %v2603_v7 = vld [vmem:[%s7157_s14 + $0x2b] sm:$0xff]  ;;  %v2604_v39 = vld [vmem:[%s7157_s14 + $0x33] sm:$0xff] }
 0x249   : > { %v1956_v54 = vpop.f32.mrf.mxu1 }
 0x24a   : > { %v7676_v26 = vadd.f32 %v1956_v54, %v1743_v58  ;;  %1714 = vmatmul.bf16.gmra.mxu0 %v1540_v47  ;;  %2176 = vmatmul.bf16.vlgmr.msra.gmra.mxu2 %v2082_v46  ;;  %v2325_v47 = vld [vmem:[%s7157_s14 + $0x42] sm:$0xff] }
 0x24b   : > { %3027 = vperm.xlu2 %6846, %v331_v41  }
 0x24c   : > { %2457 = vmatmul.bf16.vlgmr.msra.gmra.mxu3 %v2363_v19  ;;  %1995 = vmatmul.bf16.gmra.mxu1 %v1821_v28  ;;  %v2083_v28 = vpack.c.bf16 %v2044_v10, %v2043_v48 }
 0x24d   : > { %v1118_v34 = vpop.f32.mrf.mxu2 }
 0x24e   : > { %v1183_v24 = vadd.f32 %v1118_v34, %v7286_v32  ;;  %v2324_v32 = vld [vmem:[%s7157_s14 + $0x3a] sm:$0xff] }
 0x24f   : > { %v1399_v2 = vpop.f32.mrf.mxu3  ;;  %v1677_v11 = vpop.f32.mrf.mxu0  ;;  %3112 = vperm.xlu1 %6845, %v348_v45   ;;  %v2364_v54 = vpack.c.bf16 %v2325_v47, %v2324_v32  ;;  %v2045_v32 = vld [vmem:[%s7157_s14 + $0x49] sm:$0xff]  ;;  %v2046_v47 = vld [vmem:[%s7157_s14 + $0x51] sm:$0xff] }
 0x250   : > { %v1464_v6 = vadd.f32 %v1399_v2, %v1183_v24  ;;  %v7685_v8 = vadd.f32 %v1677_v11, %v1463_v40  ;;  %v2644_v40 = vpack.c.bf16 %v2604_v39, %v2603_v7  ;;  %v334_v24 = vld [vmem:[%s8608_s1 + $0xb8] sm:$0xff]  ;;  %v337_v39 = vld [vmem:[%s8608_s1 + $0xd0] sm:$0xff] }
 0x251   : > { %v7687_v36 = vpop.f32.mrf.mxu1 }
 0x253   : > { %3042 = vperm.xlu2 %6846, %v334_v24  }
 0x255   : > { %v1120_v46 = vpop.f32.mrf.mxu2 }
 0x256   : > { %v1184_v56 = vadd.f32 %v1120_v46, %v7298_v51  ;;  %v351_v51 = vld [vmem:[%s8608_s1 + $0x140] sm:$0xff]  ;;  %v2605_v46 = vld [vmem:[%s7157_s14 + $0x3b] sm:$0xff] }
 0x257   : > { %v1401_v19 = vpop.f32.mrf.mxu3  ;;  %v1680_v58 = vpop.f32.mrf.mxu0  ;;  %3127 = vperm.xlu1 %6845, %v351_v51  }
 0x258   : > { %v1465_v23 = vadd.f32 %v1401_v19, %v1184_v56  ;;  %v1745_v42 = vadd.f32 %v1680_v58, %v1464_v6  ;;  %v2606_v56 = vld [vmem:[%s7157_s14 + $0x43] sm:$0xff] }
 0x259   : > { %v1961_v34 = vpop.f32.mrf.mxu1  ;;  %v2326_v19 = vld [vmem:[%s7157_s14 + $0x4a] sm:$0xff] }
 0x25a   : > { %v7705_v2 = vadd.f32 %v1961_v34, %v1745_v42  ;;  %2181 = vmatmul.bf16.gmra.mxu2 %v2083_v28  ;;  %2738 = vmatmul.bf16.vlgmr.msra.gmra.mxu0 %v2644_v40  ;;  %v2327_v28 = vld [vmem:[%s7157_s14 + $0x52] sm:$0xff] }
 0x25b   : > { %3057 = vperm.xlu2 %6846, %v337_v39   ;;  %v2365_v34 = vpack.c.bf16 %v2327_v28, %v2326_v19  ;;  %v343_v19 = vld [vmem:[%s8608_s1 + $0x100] sm:$0xff]  ;;  %v2047_v28 = vld [vmem:[%s7157_s14 + $0x59] sm:$0xff] }
 0x25c   : > { %2462 = vmatmul.bf16.gmra.mxu3 %v2364_v54  ;;  %v2084_v54 = vpack.c.bf16 %v2046_v47, %v2045_v32 }
 0x25d   : > { %v1123_v11 = vpop.f32.mrf.mxu2 }
 0x25e   : > { %v1185_v6 = vadd.f32 %v1123_v11, %v7304_v63 }
 0x25f   : > { %v1404_v41 = vpop.f32.mrf.mxu3  ;;  %v1682_v48 = vpop.f32.mrf.mxu0 }
 0x260   : > { %v1466_v45 = vadd.f32 %v1404_v41, %v1185_v6  ;;  %v7711_v10 = vadd.f32 %v1682_v48, %v1465_v23  ;;  %v2645_v23 = vpack.c.bf16 %v2606_v56, %v2605_v46  ;;  %v340_v6 = vld [vmem:[%s8608_s1 + $0xe8] sm:$0xff] }
 0x261   : > { %v7713_v7 = vpop.f32.mrf.mxu1 }
 0x263   : > { %3072 = vperm.xlu2 %6846, %v340_v6  }
 0x265   : > { %v1125_v40 = vpop.f32.mrf.mxu2 }
 0x266   : > { %v1186_v63 = vadd.f32 %v1125_v40, %v7316_v20  ;;  %v6677_v20 = vld [vmem:[#allocation8 + $0x8] sm:$0xff] }
 0x267   : > { %v1406_v58 = vpop.f32.mrf.mxu3  ;;  %v1685_v42 = vpop.f32.mrf.mxu0  ;;  %3430 = vmatpush.bf16.msra.mxu1 %v6677_v20  ;;  %v2048_v40 = vld [vmem:[%s7157_s14 + $0x61] sm:$0xff] }
 0x268   : > { %v1467_v24 = vadd.f32 %v1406_v58, %v1186_v63  ;;  %v1747_v51 = vadd.f32 %v1685_v42, %v1466_v45  ;;  %v2607_v63 = vld [vmem:[%s7157_s14 + $0x4b] sm:$0xff]  ;;  %v2608_v58 = vld [vmem:[%s7157_s14 + $0x53] sm:$0xff] }
 0x269   : > { %v1966_v11 = vpop.f32.mrf.mxu1 }
 0x26a   : > { %v7728_v41 = vadd.f32 %v1966_v11, %v1747_v51  ;;  %2186 = vmatmul.bf16.gmra.mxu2 %v2084_v54  ;;  %2743 = vmatmul.bf16.gmra.mxu0 %v2645_v23  ;;  %v2328_v54 = vld [vmem:[%s7157_s14 + $0x5a] sm:$0xff]  ;;  %v2329_v23 = vld [vmem:[%s7157_s14 + $0x62] sm:$0xff]  ;;  %v2085_v51 = vpack.c.bf16 %v2048_v40, %v2047_v28 }
 0x26b   : > { %3087 = vperm.xlu2 %6846, %v343_v19   ;;  %v2366_v6 = vpack.c.bf16 %v2329_v23, %v2328_v54  ;;  %v349_v54 = vld [vmem:[%s8608_s1 + $0x130] sm:$0xff]  ;;  %v2049_v23 = vld [vmem:[%s7157_s14 + $0x69] sm:$0xff] }
 0x26c   : > { %2467 = vmatmul.bf16.gmra.mxu3 %v2365_v34 }
 0x26d   : > { %v1128_v48 = vpop.f32.mrf.mxu2 }
 0x26e   : > { %v1187_v45 = vadd.f32 %v1128_v48, %v7322_v31 }
 0x26f   : > { %v1409_v39 = vpop.f32.mrf.mxu3  ;;  %v1687_v32 = vpop.f32.mrf.mxu0 }
 0x270   : > { %v1468_v47 = vadd.f32 %v1409_v39, %v1187_v45  ;;  %v7731_v46 = vadd.f32 %v1687_v32, %v1467_v24  ;;  %v2646_v24 = vpack.c.bf16 %v2608_v58, %v2607_v63  ;;  %v346_v39 = vld [vmem:[%s8608_s1 + $0x118] sm:$0xff] }
 0x271   : > { %v7733_v56 = vpop.f32.mrf.mxu1 }
 0x273   : > { %3102 = vperm.xlu2 %6846, %v346_v39  }
 0x275   : > { %v1130_v42 = vpop.f32.mrf.mxu2 }
 0x276   : > { %v1188_v31 = vadd.f32 %v1130_v42, %v7334_v53  ;;  %v2050_v42 = vld [vmem:[%s7157_s14 + $0x71] sm:$0xff] }
 0x277   : > { %v1411_v34 = vpop.f32.mrf.mxu3  ;;  %v1690_v11 = vpop.f32.mrf.mxu0 }
 0x278   : > { %v1469_v20 = vadd.f32 %v1411_v34, %v1188_v31  ;;  %v1749_v48 = vadd.f32 %v1690_v11, %v1468_v47  ;;  %v2609_v31 = vld [vmem:[%s7157_s14 + $0x5b] sm:$0xff]  ;;  %v2610_v34 = vld [vmem:[%s7157_s14 + $0x63] sm:$0xff] }
 0x279   : > { %v1971_v45 = vpop.f32.mrf.mxu1 }
 0x27a   : > { %v7748_v32 = vadd.f32 %v1971_v45, %v1749_v48  ;;  %2191 = vmatmul.bf16.gmra.mxu2 %v2085_v51  ;;  %2748 = vmatmul.bf16.gmra.mxu0 %v2646_v24  ;;  %v2330_v51 = vld [vmem:[%s7157_s14 + $0x6a] sm:$0xff]  ;;  %v2331_v24 = vld [vmem:[%s7157_s14 + $0x72] sm:$0xff]  ;;  %v2086_v48 = vpack.c.bf16 %v2050_v42, %v2049_v23 }
 0x27b   : > { %3117 = vperm.xlu2 %6846, %v349_v54   ;;  %v2367_v39 = vpack.c.bf16 %v2331_v24, %v2330_v51  ;;  %v2052_v24 = vld [vmem:[%s7157_s14 + $0x81] sm:$0xff] }
 0x27c   : > { %2472 = vmatmul.bf16.gmra.mxu3 %v2366_v6 }
 0x27d   : > { %v1133_v53 = vpop.f32.mrf.mxu2 }
 0x27e   : > { %v1189_v47 = vadd.f32 %v1133_v53, %v7340_v1 }
 0x27f   : > { %v1414_v19 = vpop.f32.mrf.mxu3  ;;  %v1692_v28 = vpop.f32.mrf.mxu0 }
 0x280   : > { %v1470_v40 = vadd.f32 %v1414_v19, %v1189_v47  ;;  %v7751_v63 = vadd.f32 %v1692_v28, %v1469_v20  ;;  %v2647_v20 = vpack.c.bf16 %v2610_v34, %v2609_v31 }
 0x281   : > { %v7753_v58 = vpop.f32.mrf.mxu1 }
 0x285   : > { %v1135_v11 = vpop.f32.mrf.mxu2 }
 0x286   : > { %v1190_v1 = vadd.f32 %v1135_v11, %v7352_v27  ;;  %v2611_v11 = vld [vmem:[%s7157_s14 + $0x6b] sm:$0xff] }
 0x287   : > { %v1416_v6 = vpop.f32.mrf.mxu3  ;;  %v1695_v45 = vpop.f32.mrf.mxu0 }
 0x288   : > { %v1471_v53 = vadd.f32 %v1416_v6, %v1190_v1  ;;  %v1751_v47 = vadd.f32 %v1695_v45, %v1470_v40  ;;  %v2051_v40 = vld [vmem:[%s7157_s14 + $0x79] sm:$0xff]  ;;  %v2333_v45 = vld [vmem:[%s7157_s14 + $0x82] sm:$0xff] }
 0x289   : > { %v1976_v19 = vpop.f32.mrf.mxu1  ;;  %v2612_v1 = vld [vmem:[%s7157_s14 + $0x73] sm:$0xff] }
 0x28a   : > { %v7765_v28 = vadd.f32 %v1976_v19, %v1751_v47  ;;  %2196 = vmatmul.bf16.gmra.mxu2 %v2086_v48  ;;  %2753 = vmatmul.bf16.gmra.mxu0 %v2647_v20  ;;  %v2332_v6 = vld [vmem:[%s7157_s14 + $0x7a] sm:$0xff]  ;;  %v2648_v19 = vpack.c.bf16 %v2612_v1, %v2611_v11 }
 0x28c   : > { %8625 = vst [vmem:[#allocation15_spill] sm:$0xff] %v7765_v28  ;;  %2477 = vmatmul.bf16.gmra.mxu3 %v2367_v39  ;;  %v2087_v39 = vpack.c.bf16 %v2052_v24, %v2051_v40 }
 0x28d   : > { %v1138_v27 = vpop.f32.mrf.mxu2 }
 0x28e   : > { %v1191_v54 = vadd.f32 %v1138_v27, %v7358_v43  ;;  %v2368_v27 = vpack.c.bf16 %v2333_v45, %v2332_v6  ;;  %v2053_v45 = vld [vmem:[%s7157_s14 + $0x89] sm:$0xff] }
 0x28f   : > { %v1419_v23 = vpop.f32.mrf.mxu3  ;;  %v1697_v42 = vpop.f32.mrf.mxu0 }
 0x290   : > { %v1472_v31 = vadd.f32 %v1419_v23, %v1191_v54  ;;  %v7768_v34 = vadd.f32 %v1697_v42, %v1471_v53  ;;  %v6676_v23 = vld [vmem:[#allocation8] sm:$0xff] }
 0x291   : > { %v7770_v51 = vpop.f32.mrf.mxu1  ;;  %3431 = vmatpush.bf16.msra.mxu1 %v6676_v23 }
 0x295   : > { %v1140_v47 = vpop.f32.mrf.mxu2 }
 0x296   : > { %v1192_v48 = vadd.f32 %v1140_v47, %v7370_v9  ;;  %v2054_v47 = vld [vmem:[%s7157_s14 + $0x91] sm:$0xff] }
 0x297   : > { %v1421_v20 = vpop.f32.mrf.mxu3  ;;  %v1700_v43 = vpop.f32.mrf.mxu0 }
 0x298   : > { %v1473_v28 = vadd.f32 %v1421_v20, %v1192_v48  ;;  %v1753_v53 = vadd.f32 %v1700_v43, %v1472_v31  ;;  %v2613_v48 = vld [vmem:[%s7157_s14 + $0x7b] sm:$0xff]  ;;  %v2614_v20 = vld [vmem:[%s7157_s14 + $0x83] sm:$0xff] }
 0x299   : > { %v1981_v54 = vpop.f32.mrf.mxu1  ;;  %v2334_v43 = vld [vmem:[%s7157_s14 + $0x8a] sm:$0xff]  ;;  %v2649_v23 = vpack.c.bf16 %v2614_v20, %v2613_v48  ;;  %v7019_v48 = vmov 0.0  }
 0x29a   : > { %v7779_v42 = vadd.f32 %v1981_v54, %v1753_v53  ;;  %2201 = vmatmul.bf16.gmra.mxu2 %v2087_v39  ;;  %2758 = vmatmul.bf16.gmra.mxu0 %v2648_v19  ;;  %v2335_v39 = vld [vmem:[%s7157_s14 + $0x92] sm:$0xff]  ;;  %v2088_v54 = vpack.c.bf16 %v2054_v47, %v2053_v45  ;;  %305 = vst [vmem:[#allocation2] sm:$0xff] %v7019_v48 }
 0x29b   : > { %306 = vst [vmem:[#allocation2 + $0x8] sm:$0xff] %v7019_v48 }
 0x29c   : > { %8626 = vst [vmem:[#allocation16_spill] sm:$0xff] %v7779_v42  ;;  %2482 = vmatmul.bf16.gmra.mxu3 %v2368_v27 }
 0x29d   : > { %v1143_v9 = vpop.f32.mrf.mxu2  ;;  %307 = vst [vmem:[#allocation2 + $0x10] sm:$0xff] %v7019_v48 }
 0x29e   : > { %v1193_v40 = vadd.f32 %v1143_v9, %v7376_v18  ;;  %v2369_v9 = vpack.c.bf16 %v2335_v39, %v2334_v43  ;;  %v2055_v39 = vld [vmem:[%s7157_s14 + $0x99] sm:$0xff]  ;;  %308 = vst [vmem:[#allocation2 + $0x160] sm:$0xff] %v7019_v48 }
 0x29f   : > { %v1424_v24 = vpop.f32.mrf.mxu3  ;;  %v1702_v11 = vpop.f32.mrf.mxu0  ;;  %309 = vst [vmem:[#allocation2 + $0x168] sm:$0xff] %v7019_v48 }
 0x2a0   : > { %v1474_v1 = vadd.f32 %v1424_v24, %v1193_v40  ;;  %v7782_v31 = vadd.f32 %v1702_v11, %v1473_v28  ;;  %310 = vst [vmem:[#allocation2 + $0x170] sm:$0xff] %v7019_v48 }
 0x2a1   : > { %v7784_v6 = vpop.f32.mrf.mxu1 }
 0x2a2   : > { %8627 = vst [vmem:[#allocation17_spill] sm:$0xff] %v7782_v31 }
 0x2a3   : > { %8628 = vst [vmem:[#allocation18_spill] sm:$0xff] %v7784_v6 }
 0x2a5   : > { %v1145_v53 = vpop.f32.mrf.mxu2 }
 0x2a6   : > { %v1194_v19 = vadd.f32 %v1145_v53, %v7388_v50  ;;  %v2056_v53 = vld [vmem:[%s7157_s14 + $0xa1] sm:$0xff] }
 0x2a7   : > { %v1426_v27 = vpop.f32.mrf.mxu3  ;;  %v1705_v18 = vpop.f32.mrf.mxu0 }
 0x2a8   : > { %v1475_v42 = vadd.f32 %v1426_v27, %v1194_v19  ;;  %v1755_v40 = vadd.f32 %v1705_v18, %v1474_v1  ;;  %v2615_v19 = vld [vmem:[%s7157_s14 + $0x8b] sm:$0xff]  ;;  %v2616_v27 = vld [vmem:[%s7157_s14 + $0x93] sm:$0xff] }
 0x2a9   : > { %v1986_v28 = vpop.f32.mrf.mxu1 }
 0x2aa   : > { %v7793_v24 = vadd.f32 %v1986_v28, %v1755_v40  ;;  %2206 = vmatmul.bf16.gmra.mxu2 %v2088_v54  ;;  %2763 = vmatmul.bf16.gmra.mxu0 %v2649_v23  ;;  %v2337_v54 = vld [vmem:[%s7157_s14 + $0xa2] sm:$0xff]  ;;  %v2089_v40 = vpack.c.bf16 %v2056_v53, %v2055_v39 }
 0x2ab   : > { %v6699_v39 = vld [vmem:[#allocation8 + $0xb8] sm:$0xff] }
 0x2ac   : > { %8629 = vst [vmem:[#allocation19_spill] sm:$0xff] %v7793_v24  ;;  %2487 = vmatmul.bf16.gmra.mxu3 %v2369_v9  ;;  %v3299_v24 = vld [vmem:[#allocation2 + $0xd] sm:$0xff] }
 0x2ad   : > { %v1148_v11 = vpop.f32.mrf.mxu2  ;;  %3986 = vmatpush.bf16.msrb.mxu3 %v6699_v39 }
 0x2ae   : > { %v1195_v50 = vadd.f32 %v1148_v11, %v7394_v4  ;;  %v2336_v4 = vld [vmem:[%s7157_s14 + $0x9a] sm:$0xff] }
 0x2af   : > { %v1429_v45 = vpop.f32.mrf.mxu3  ;;  %v1707_v47 = vpop.f32.mrf.mxu0  ;;  %v2370_v11 = vpack.c.bf16 %v2337_v54, %v2336_v4  ;;  %v2058_v4 = vld [vmem:[%s7157_s14 + $0xb1] sm:$0xff]  ;;  %v2617_v54 = vld [vmem:[%s7157_s14 + $0x9b] sm:$0xff] }
 0x2b0   : > { %v1476_v1 = vadd.f32 %v1429_v45, %v1195_v50  ;;  %v7796_v20 = vadd.f32 %v1707_v47, %v1475_v42  ;;  %v2650_v42 = vpack.c.bf16 %v2616_v27, %v2615_v19  ;;  %v3298_v50 = vld [vmem:[#allocation2 + $0x5] sm:$0xff] }
 0x2b1   : > { %v7798_v43 = vpop.f32.mrf.mxu1  ;;  %v3339_v6 = vpack.c.bf16 %v3299_v24, %v3298_v50  ;;  %v2057_v27 = vld [vmem:[%s7157_s14 + $0xa9] sm:$0xff] }
 0x2b2   : > { %8630 = vst [vmem:[#allocation20_spill] sm:$0xff] %v7796_v20  ;;  %v6691_v20 = vld [vmem:[#allocation8 + $0x78] sm:$0xff] }
 0x2b3   : > { %8631 = vst [vmem:[#allocation21_spill] sm:$0xff] %v7798_v43  ;;  %3705 = vmatpush.bf16.msrb.mxu2 %v6691_v20  ;;  %3432 = vmatmul.bf16.vlgmr.msra.gmra.mxu1 %v3339_v6  ;;  %v2339_v20 = vld [vmem:[%s7157_s14 + $0xb2] sm:$0xff] }
 0x2b5   : > { %v1150_v23 = vpop.f32.mrf.mxu2 }
 0x2b6   : > { %v1196_v18 = vadd.f32 %v1150_v23, %v7406_v44  ;;  %v2618_v23 = vld [vmem:[%s7157_s14 + $0xa3] sm:$0xff] }
 0x2b7   : > { %v1431_v9 = vpop.f32.mrf.mxu3  ;;  %v1710_v28 = vpop.f32.mrf.mxu0 }
 0x2b8   : > { %v1477_v45 = vadd.f32 %v1431_v9, %v1196_v18  ;;  %v1757_v47 = vadd.f32 %v1710_v28, %v1476_v1  ;;  %v2338_v18 = vld [vmem:[%s7157_s14 + $0xaa] sm:$0xff] }
 0x2b9   : > { %v1991_v43 = vpop.f32.mrf.mxu1  ;;  %v6715_v28 = vld [vmem:[#allocation8 + $0x138] sm:$0xff]  ;;  %v2371_v50 = vpack.c.bf16 %v2339_v20, %v2338_v18  ;;  %v2340_v18 = vld [vmem:[%s7157_s14 + $0xba] sm:$0xff] }
 0x2ba   : > { %v7807_v31 = vadd.f32 %v1991_v43, %v1757_v47  ;;  %2211 = vmatmul.bf16.gmra.mxu2 %v2089_v40  ;;  %2768 = vmatmul.bf16.gmra.mxu0 %v2650_v42  ;;  %v2090_v40 = vpack.c.bf16 %v2058_v4, %v2057_v27  ;;  %v2651_v42 = vpack.c.bf16 %v2618_v23, %v2617_v54  ;;  %v2059_v4 = vld [vmem:[%s7157_s14 + $0xb9] sm:$0xff]  ;;  %v2060_v54 = vld [vmem:[%s7157_s14 + $0xc1] sm:$0xff] }
 0x2bb   : > { %4548 = vmatpush.bf16.msrb.mxu1 %v6715_v28  ;;  %v2620_v23 = vld [vmem:[%s7157_s14 + $0xb3] sm:$0xff]  ;;  %v2341_v20 = vld [vmem:[%s7157_s14 + $0xc2] sm:$0xff]  ;;  %v2091_v28 = vpack.c.bf16 %v2060_v54, %v2059_v4 }
 0x2bc   : > { %2492 = vmatmul.bf16.gmra.mxu3 %v2370_v11 }
 0x2bd   : > { %v1153_v44 = vpop.f32.mrf.mxu2 }
 0x2be   : > { %v1197_v48 = vadd.f32 %v1153_v44, %v7412_v0  ;;  %v6707_v0 = vld [vmem:[#allocation8 + $0xf8] sm:$0xff] }
 0x2bf   : > { %v1434_v1 = vpop.f32.mrf.mxu3  ;;  %v1712_v53 = vpop.f32.mrf.mxu0  ;;  %4267 = vmatpush.bf16.msrb.mxu0 %v6707_v0 }
 0x2c0   : > { %v1478_v24 = vadd.f32 %v1434_v1, %v1197_v48  ;;  %v7810_v19 = vadd.f32 %v1712_v53, %v1477_v45 }
 0x2c1   : > { %v7812_v43 = vpop.f32.mrf.mxu1 }
 0x2c5   : > { %v1155_v9 = vpop.f32.mrf.mxu2 }
 0x2c7   : > { %v1436_v6 = vpop.f32.mrf.mxu3  ;;  %v1715_v11 = vpop.f32.mrf.mxu0 }
 0x2c8   : > { %v1759_v45 = vadd.f32 %v1715_v11, %v1478_v24  ;;  %v2619_v24 = vld [vmem:[%s7157_s14 + $0xab] sm:$0xff] }
 0x2c9   : > { %v1996_v47 = vpop.f32.mrf.mxu1  ;;  %v2652_v11 = vpack.c.bf16 %v2620_v23, %v2619_v24 }
 0x2ca   : > { %v7820_v44 = vadd.f32 %v1996_v47, %v1759_v45  ;;  %2216 = vmatmul.bf16.gmra.mxu2 %v2090_v40  ;;  %2773 = vmatmul.bf16.gmra.mxu0 %v2651_v42  ;;  %v2372_v42 = vpack.c.bf16 %v2341_v20, %v2340_v18  ;;  %v2928_v45 = vpop.permute.xlu0 %2927  ;;  %v2062_v18 = vld [vmem:[%s7157_s14 + $0xd1] sm:$0xff]  ;;  %v2621_v20 = vld [vmem:[%s7157_s14 + $0xbb] sm:$0xff] }
 0x2cc   : > { %2497 = vmatmul.bf16.gmra.mxu3 %v2371_v50 }
 0x2cd   : > { %v2177_v48 = vpop.f32.mrf.mxu2 }
 0x2ce   : > { %v2281_v27 = vadd.f32 %v2177_v48, %v7437_v55 }
 0x2cf   : > { %v2458_v1 = vpop.f32.mrf.mxu3  ;;  %v1717_v39 = vpop.f32.mrf.mxu0 }
 0x2d0   : > { %v2562_v6 = vadd.f32 %v2458_v1, %v2281_v27 }
 0x2d1   : > { %v1998_v53 = vpop.f32.mrf.mxu1 }
 0x2d2   : > { %v2933_v23 = vpop.permute.xlu0 %2932 }
 0x2d5   : > { %v2179_v9 = vpop.f32.mrf.mxu2 }
 0x2d6   : > { %v2282_v47 = vadd.f32 %v2179_v9, %v7440_v15  ;;  %v2061_v15 = vld [vmem:[%s7157_s14 + $0xc9] sm:$0xff] }
 0x2d7   : > { %v2460_v0 = vpop.f32.mrf.mxu3  ;;  %v2739_v40 = vpop.f32.mrf.mxu0  ;;  %v2622_v9 = vld [vmem:[%s7157_s14 + $0xc3] sm:$0xff] }
 0x2d8   : > { %v2843_v50 = vadd.f32 %v2739_v40, %v2562_v6  ;;  %v2563_v39 = vadd.f32 %v2460_v0, %v2282_v47  ;;  %v2092_v0 = vpack.c.bf16 %v2062_v18, %v2061_v15  ;;  %v6690_v47 = vld [vmem:[#allocation8 + $0x70] sm:$0xff] }
 0x2d9   : > { %3706 = vmatpush.bf16.msrb.mxu2 %v6690_v47  ;;  %v2624_v47 = vld [vmem:[%s7157_s14 + $0xd3] sm:$0xff] }
 0x2da   : > { %v2884_v55 = vmax.f32 %v2843_v50, 0.0  ;;  %2221 = vmatmul.bf16.gmra.mxu2 %v2091_v28  ;;  %2778 = vmatmul.bf16.gmra.mxu0 %v2652_v11  ;;  %v2342_v28 = vld [vmem:[%s7157_s14 + $0xca] sm:$0xff]  ;;  %v2343_v11 = vld [vmem:[%s7157_s14 + $0xd2] sm:$0xff] }
 0x2dc   : > { %2502 = vmatmul.bf16.gmra.mxu3 %v2372_v42  ;;  %v3130_v48 = vmul.f32 %v2928_v45, %v2884_v55  ;;  %v2653_v45 = vpack.c.bf16 %v2622_v9, %v2621_v20  ;;  %v6698_v55 = vld [vmem:[#allocation8 + $0xb0] sm:$0xff] }
 0x2dd   : > { %v2182_v1 = vpop.f32.mrf.mxu2  ;;  %3987 = vmatpush.bf16.msrb.mxu3 %v6698_v55  ;;  %v6706_v9 = vld [vmem:[#allocation8 + $0xf0] sm:$0xff] }
 0x2de   : > { %3171 = vst [vmem:[#allocation2 + $0x18] sm:$0xff] %v3130_v48  ;;  %v2283_v54 = vadd.f32 %v2182_v1, %v7449_v61  ;;  %v2938_v1 = vpop.permute.xlu1 %2937  ;;  %4268 = vmatpush.bf16.msrb.mxu0 %v6706_v9 }
 0x2df   : > { %v2463_v53 = vpop.f32.mrf.mxu3  ;;  %v2741_v27 = vpop.f32.mrf.mxu0 }
 0x2e0   : > { %v2844_v4 = vadd.f32 %v2741_v27, %v2563_v39  ;;  %v2564_v42 = vadd.f32 %v2463_v53, %v2283_v54  ;;  %v2373_v39 = vpack.c.bf16 %v2343_v11, %v2342_v28 }
 0x2e2   : > { %v2885_v24 = vmax.f32 %v2844_v4, 0.0 }
 0x2e4   : > { %v3131_v6 = vmul.f32 %v2933_v23, %v2885_v24 }
 0x2e5   : > { %v2184_v40 = vpop.f32.mrf.mxu2  ;;  %v3300_v54 = vld [vmem:[#allocation2 + $0x15] sm:$0xff] }
 0x2e6   : > { %3172 = vst [vmem:[#allocation2 + $0x20] sm:$0xff] %v3131_v6  ;;  %v2284_v27 = vadd.f32 %v2184_v40, %v7452_v17  ;;  %v6714_v17 = vld [vmem:[#allocation8 + $0x130] sm:$0xff] }
 0x2e7   : > { %v2465_v50 = vpop.f32.mrf.mxu3  ;;  %v2744_v48 = vpop.f32.mrf.mxu0  ;;  %4549 = vmatpush.bf16.msrb.mxu1 %v6714_v17 }
 0x2e8   : > { %v2845_v61 = vadd.f32 %v2744_v48, %v2564_v42  ;;  %v2565_v23 = vadd.f32 %v2465_v50, %v2284_v27  ;;  %v2063_v42 = vld [vmem:[%s7157_s14 + $0xd9] sm:$0xff]  ;;  %v2064_v50 = vld [vmem:[%s7157_s14 + $0xe1] sm:$0xff] }
 0x2e9   : > { %v2344_v48 = vld [vmem:[%s7157_s14 + $0xda] sm:$0xff] }
 0x2ea   : > { %v2886_v4 = vmax.f32 %v2845_v61, 0.0  ;;  %2226 = vmatmul.bf16.gmra.mxu2 %v2092_v0  ;;  %2783 = vmatmul.bf16.gmra.mxu0 %v2653_v45  ;;  %v2943_v0 = vpop.permute.xlu1 %2942  ;;  %v2623_v45 = vld [vmem:[%s7157_s14 + $0xcb] sm:$0xff] }
 0x2ec   : > { %2507 = vmatmul.bf16.gmra.mxu3 %v2373_v39  ;;  %v3132_v24 = vmul.f32 %v2938_v1, %v2886_v4  ;;  %v2345_v39 = vld [vmem:[%s7157_s14 + $0xe2] sm:$0xff]  ;;  %v2093_v4 = vpack.c.bf16 %v2064_v50, %v2063_v42 }
 0x2ed   : > { %v2187_v53 = vpop.f32.mrf.mxu2  ;;  %v3301_v15 = vld [vmem:[#allocation2 + $0x1d] sm:$0xff] }
 0x2ee   : > { %3173 = vst [vmem:[#allocation2 + $0x28] sm:$0xff] %v3132_v24  ;;  %v3340_v20 = vpack.c.bf16 %v3301_v15, %v3300_v54  ;;  %v2285_v11 = vadd.f32 %v2187_v53, %v7461_v62  ;;  %v2654_v24 = vpack.c.bf16 %v2624_v47, %v2623_v45  ;;  %v2374_v15 = vpack.c.bf16 %v2345_v39, %v2344_v48  ;;  %v2065_v45 = vld [vmem:[%s7157_s14 + $0xe9] sm:$0xff]  ;;  %v2625_v48 = vld [vmem:[%s7157_s14 + $0xdb] sm:$0xff] }
 0x2ef   : > { %v2468_v18 = vpop.f32.mrf.mxu3  ;;  %v2746_v6 = vpop.f32.mrf.mxu0  ;;  %v2626_v39 = vld [vmem:[%s7157_s14 + $0xe3] sm:$0xff] }
 0x2f0   : > { %v2846_v28 = vadd.f32 %v2746_v6, %v2565_v23  ;;  %3437 = vmatmul.bf16.gmra.mxu1 %v3340_v20  ;;  %v2566_v1 = vadd.f32 %v2468_v18, %v2285_v11  ;;  %v2948_v20 = vpop.permute.xlu2 %2947 }
 0x2f2   : > { %v2887_v40 = vmax.f32 %v2846_v28, 0.0 }
 0x2f4   : > { %v3133_v55 = vmul.f32 %v2943_v0, %v2887_v40 }
 0x2f5   : > { %v2189_v61 = vpop.f32.mrf.mxu2  ;;  %v3302_v18 = vld [vmem:[#allocation2 + $0x25] sm:$0xff] }
 0x2f6   : > { %3174 = vst [vmem:[#allocation2 + $0x30] sm:$0xff] %v3133_v55  ;;  %v2286_v62 = vadd.f32 %v2189_v61, %v7464_v33  ;;  %v2066_v55 = vld [vmem:[%s7157_s14 + $0xf1] sm:$0xff] }
 0x2f7   : > { %v2470_v27 = vpop.f32.mrf.mxu3  ;;  %v2749_v54 = vpop.f32.mrf.mxu0 }
 0x2f8   : > { %v2847_v23 = vadd.f32 %v2749_v54, %v2566_v1  ;;  %v2567_v28 = vadd.f32 %v2470_v27, %v2286_v62  ;;  %v2953_v47 = vpop.permute.xlu2 %2952  ;;  %v2346_v1 = vld [vmem:[%s7157_s14 + $0xea] sm:$0xff] }
 0x2fa   : > { %v2888_v53 = vmax.f32 %v2847_v23, 0.0  ;;  %2231 = vmatmul.bf16.gmra.mxu2 %v2093_v4  ;;  %2788 = vmatmul.bf16.gmra.mxu0 %v2654_v24  ;;  %v2347_v4 = vld [vmem:[%s7157_s14 + $0xf2] sm:$0xff]  ;;  %v2655_v23 = vpack.c.bf16 %v2626_v39, %v2625_v48  ;;  %v2963_v39 = vpop.permute.xlu1 %2962 }
 0x2fb   : > { %v2375_v62 = vpack.c.bf16 %v2347_v4, %v2346_v1  ;;  %v2067_v48 = vld [vmem:[%s7157_s14 + $0xf9] sm:$0xff]  ;;  %v2627_v1 = vld [vmem:[%s7157_s14 + $0xeb] sm:$0xff] }
 0x2fc   : > { %2512 = vmatmul.bf16.gmra.mxu3 %v2374_v15  ;;  %v3134_v9 = vmul.f32 %v2948_v20, %v2888_v53  ;;  %v2094_v15 = vpack.c.bf16 %v2066_v55, %v2065_v45  ;;  %v2628_v4 = vld [vmem:[%s7157_s14 + $0xf3] sm:$0xff] }
 0x2fd   : > { %v2192_v17 = vpop.f32.mrf.mxu2  ;;  %v3303_v6 = vld [vmem:[#allocation2 + $0x2d] sm:$0xff] }
 0x2fe   : > { %3175 = vst [vmem:[#allocation2 + $0x38] sm:$0xff] %v3134_v9  ;;  %v3341_v40 = vpack.c.bf16 %v3303_v6, %v3302_v18  ;;  %v2287_v0 = vadd.f32 %v2192_v17, %v7473_v12  ;;  %v2958_v17 = vpop.permute.xlu0 %2957 }
 0x2ff   : > { %v2473_v11 = vpop.f32.mrf.mxu3  ;;  %v2751_v42 = vpop.f32.mrf.mxu0 }
 0x300   : > { %v2848_v33 = vadd.f32 %v2751_v42, %v2567_v28  ;;  %3442 = vmatmul.bf16.gmra.mxu1 %v3341_v40  ;;  %v2568_v27 = vadd.f32 %v2473_v11, %v2287_v0  ;;  %v6689_v0 = vld [vmem:[#allocation8 + $0x68] sm:$0xff] }
 0x301   : > { %3707 = vmatpush.bf16.msrb.mxu2 %v6689_v0 }
 0x302   : > { %v2889_v50 = vmax.f32 %v2848_v33, 0.0 }
 0x304   : > { %v3135_v61 = vmul.f32 %v2953_v47, %v2889_v50 }
 0x305   : > { %v2194_v24 = vpop.f32.mrf.mxu2  ;;  %v3304_v28 = vld [vmem:[#allocation2 + $0x35] sm:$0xff] }
 0x306   : > { %3176 = vst [vmem:[#allocation2 + $0x40] sm:$0xff] %v3135_v61  ;;  %v2288_v12 = vadd.f32 %v2194_v24, %v7476_v29  ;;  %v6697_v29 = vld [vmem:[#allocation8 + $0xa8] sm:$0xff] }
 0x307   : > { %v2475_v54 = vpop.f32.mrf.mxu3  ;;  %v2754_v20 = vpop.f32.mrf.mxu0  ;;  %3988 = vmatpush.bf16.msrb.mxu3 %v6697_v29  ;;  %v2068_v61 = vld [vmem:[%s7157_s14 + $0x101] sm:$0xff] }
 0x308   : > { %v2849_v53 = vadd.f32 %v2754_v20, %v2568_v27  ;;  %v2569_v11 = vadd.f32 %v2475_v54, %v2288_v12  ;;  %v2348_v27 = vld [vmem:[%s7157_s14 + $0xfa] sm:$0xff]  ;;  %v2349_v54 = vld [vmem:[%s7157_s14 + $0x102] sm:$0xff] }
 0x309   : > { %v6705_v12 = vld [vmem:[#allocation8 + $0xe8] sm:$0xff] }
 0x30a   : > { %v2890_v9 = vmax.f32 %v2849_v53, 0.0  ;;  %2236 = vmatmul.bf16.gmra.mxu2 %v2094_v15  ;;  %2793 = vmatmul.bf16.gmra.mxu0 %v2655_v23  ;;  %v2656_v53 = vpack.c.bf16 %v2628_v4, %v2627_v1  ;;  %v2070_v1 = vld [vmem:[%s7157_s14 + $0x111] sm:$0xff]  ;;  %v2629_v4 = vld [vmem:[%s7157_s14 + $0xfb] sm:$0xff] }
 0x30b   : > { %4269 = vmatpush.bf16.msrb.mxu0 %v6705_v12 }
 0x30c   : > { %2517 = vmatmul.bf16.gmra.mxu3 %v2375_v62  ;;  %v3136_v18 = vmul.f32 %v2958_v17, %v2890_v9  ;;  %v2095_v62 = vpack.c.bf16 %v2068_v61, %v2067_v48  ;;  %v6713_v9 = vld [vmem:[#allocation8 + $0x128] sm:$0xff]  ;;  %v2973_v61 = vpop.permute.xlu0 %2972 }
 0x30d   : > { %v2197_v6 = vpop.f32.mrf.mxu2  ;;  %v3305_v40 = vld [vmem:[#allocation2 + $0x3d] sm:$0xff]  ;;  %4550 = vmatpush.bf16.msrb.mxu1 %v6713_v9 }
 0x30e   : > { %3177 = vst [vmem:[#allocation2 + $0x48] sm:$0xff] %v3136_v18  ;;  %v3342_v33 = vpack.c.bf16 %v3305_v40, %v3304_v28  ;;  %v2289_v47 = vadd.f32 %v2197_v6, %v7485_v38  ;;  %v2376_v18 = vpack.c.bf16 %v2349_v54, %v2348_v27  ;;  %v2968_v40 = vpop.permute.xlu2 %2967  ;;  %v2350_v54 = vld [vmem:[%s7157_s14 + $0x10a] sm:$0xff] }
 0x30f   : > { %v2478_v42 = vpop.f32.mrf.mxu3  ;;  %v2756_v50 = vpop.f32.mrf.mxu0 }
 0x310   : > { %v2850_v45 = vadd.f32 %v2756_v50, %v2569_v11  ;;  %3447 = vmatmul.bf16.gmra.mxu1 %v3342_v33  ;;  %v2570_v23 = vadd.f32 %v2478_v42, %v2289_v47 }
 0x312   : > { %v2891_v55 = vmax.f32 %v2850_v45, 0.0 }
 0x314   : > { %v3137_v24 = vmul.f32 %v2963_v39, %v2891_v55  ;;  %v2069_v39 = vld [vmem:[%s7157_s14 + $0x109] sm:$0xff] }
 0x315   : > { %v2199_v15 = vpop.f32.mrf.mxu2  ;;  %v3306_v33 = vld [vmem:[#allocation2 + $0x45] sm:$0xff] }
 0x316   : > { %3178 = vst [vmem:[#allocation2 + $0x50] sm:$0xff] %v3137_v24  ;;  %v2290_v6 = vadd.f32 %v2199_v15, %v7488_v30  ;;  %v2630_v24 = vld [vmem:[%s7157_s14 + $0x103] sm:$0xff]  ;;  %v2351_v15 = vld [vmem:[%s7157_s14 + $0x112] sm:$0xff] }
 0x317   : > { %v2480_v20 = vpop.f32.mrf.mxu3  ;;  %v2759_v17 = vpop.f32.mrf.mxu0  ;;  %v2657_v12 = vpack.c.bf16 %v2630_v24, %v2629_v4  ;;  %v2352_v4 = vld [vmem:[%s7157_s14 + $0x11a] sm:$0xff]  ;;  %v2353_v24 = vld [vmem:[%s7157_s14 + $0x122] sm:$0xff] }
 0x318   : > { %v2851_v38 = vadd.f32 %v2759_v17, %v2570_v23  ;;  %v2571_v29 = vadd.f32 %v2480_v20, %v2290_v6  ;;  %v2377_v17 = vpack.c.bf16 %v2351_v15, %v2350_v54  ;;  %v2978_v6 = vpop.permute.xlu1 %2977 }
 0x31a   : > { %v2892_v28 = vmax.f32 %v2851_v38, 0.0  ;;  %2241 = vmatmul.bf16.gmra.mxu2 %v2095_v62  ;;  %2798 = vmatmul.bf16.gmra.mxu0 %v2656_v53  ;;  %v2096_v53 = vpack.c.bf16 %v2070_v1, %v2069_v39  ;;  %v2631_v39 = vld [vmem:[%s7157_s14 + $0x10b] sm:$0xff] }
 0x31c   : > { %2522 = vmatmul.bf16.gmra.mxu3 %v2376_v18  ;;  %v3138_v11 = vmul.f32 %v2968_v40, %v2892_v28 }
 0x31d   : > { %v2202_v42 = vpop.f32.mrf.mxu2  ;;  %v3307_v0 = vld [vmem:[#allocation2 + $0x4d] sm:$0xff] }
 0x31e   : > { %3179 = vst [vmem:[#allocation2 + $0x58] sm:$0xff] %v3138_v11  ;;  %v3343_v45 = vpack.c.bf16 %v3307_v0, %v3306_v33  ;;  %v2291_v55 = vadd.f32 %v2202_v42, %v7497_v37 }
 0x31f   : > { %v2483_v50 = vpop.f32.mrf.mxu3  ;;  %v2761_v30 = vpop.f32.mrf.mxu0 }
 0x320   : > { %v2852_v47 = vadd.f32 %v2761_v30, %v2571_v29  ;;  %3452 = vmatmul.bf16.gmra.mxu1 %v3343_v45  ;;  %v2572_v20 = vadd.f32 %v2483_v50, %v2291_v55  ;;  %v2983_v55 = vpop.permute.xlu2 %2982 }
 0x322   : > { %v2893_v48 = vmax.f32 %v2852_v47, 0.0  ;;  %v2071_v47 = vld [vmem:[%s7157_s14 + $0x119] sm:$0xff] }
 0x324   : > { %v3139_v27 = vmul.f32 %v2973_v61, %v2893_v48  ;;  %v2072_v48 = vld [vmem:[%s7157_s14 + $0x121] sm:$0xff]  ;;  %v2632_v61 = vld [vmem:[%s7157_s14 + $0x113] sm:$0xff] }
 0x325   : > { %v2204_v23 = vpop.f32.mrf.mxu2  ;;  %v3308_v11 = vld [vmem:[#allocation2 + $0x55] sm:$0xff] }
 0x326   : > { %3180 = vst [vmem:[#allocation2 + $0x60] sm:$0xff] %v3139_v27  ;;  %v2292_v37 = vadd.f32 %v2204_v23, %v7503_v60  ;;  %v2097_v23 = vpack.c.bf16 %v2072_v48, %v2071_v47  ;;  %v2993_v47 = vpop.permute.xlu1 %2992  ;;  %v2633_v48 = vld [vmem:[%s7157_s14 + $0x11b] sm:$0xff] }
 0x327   : > { %v2485_v62 = vpop.f32.mrf.mxu3  ;;  %v2764_v9 = vpop.f32.mrf.mxu0 }
 0x328   : > { %v2853_v18 = vadd.f32 %v2764_v9, %v2572_v20  ;;  %v2573_v33 = vadd.f32 %v2485_v62, %v2292_v37  ;;  %v2658_v20 = vpack.c.bf16 %v2632_v61, %v2631_v39  ;;  %v6688_v62 = vld [vmem:[#allocation8 + $0x60] sm:$0xff]  ;;  %v2988_v37 = vpop.permute.xlu0 %2987  ;;  %v2634_v39 = vld [vmem:[%s7157_s14 + $0x123] sm:$0xff] }
 0x329   : > { %3708 = vmatpush.bf16.msrb.mxu2 %v6688_v62 }
 0x32a   : > { %v2894_v38 = vmax.f32 %v2853_v18, 0.0  ;;  %2246 = vmatmul.bf16.gmra.mxu2 %v2096_v53  ;;  %2803 = vmatmul.bf16.gmra.mxu0 %v2657_v12  ;;  %v2378_v12 = vpack.c.bf16 %v2353_v24, %v2352_v4  ;;  %v2355_v4 = vld [vmem:[%s7157_s14 + $0x132] sm:$0xff] }
 0x32c   : > { %2527 = vmatmul.bf16.gmra.mxu3 %v2377_v17  ;;  %v3140_v28 = vmul.f32 %v2978_v6, %v2894_v38 }
 0x32d   : > { %v2207_v40 = vpop.f32.mrf.mxu2  ;;  %v3309_v42 = vld [vmem:[#allocation2 + $0x5d] sm:$0xff] }
 0x32e   : > { %3181 = vst [vmem:[#allocation2 + $0x68] sm:$0xff] %v3140_v28  ;;  %v3344_v29 = vpack.c.bf16 %v3309_v42, %v3308_v11  ;;  %v2293_v45 = vadd.f32 %v2207_v40, %v7515_v22  ;;  %v6696_v22 = vld [vmem:[#allocation8 + $0xa0] sm:$0xff] }
 0x32f   : > { %v2488_v0 = vpop.f32.mrf.mxu3  ;;  %v2766_v60 = vpop.f32.mrf.mxu0  ;;  %3989 = vmatpush.bf16.msrb.mxu3 %v6696_v22 }
 0x330   : > { %v2854_v50 = vadd.f32 %v2766_v60, %v2573_v33  ;;  %3457 = vmatmul.bf16.gmra.mxu1 %v3344_v29  ;;  %v2574_v54 = vadd.f32 %v2488_v0, %v2293_v45  ;;  %v6704_v29 = vld [vmem:[#allocation8 + $0xe0] sm:$0xff] }
 0x331   : > { %v6712_v60 = vld [vmem:[#allocation8 + $0x120] sm:$0xff]  ;;  %4270 = vmatpush.bf16.msrb.mxu0 %v6704_v29 }
 0x332   : > { %v2895_v30 = vmax.f32 %v2854_v50, 0.0  ;;  %4551 = vmatpush.bf16.msrb.mxu1 %v6712_v60  ;;  %v2635_v29 = vld [vmem:[%s7157_s14 + $0x12b] sm:$0xff]  ;;  %v2636_v60 = vld [vmem:[%s7157_s14 + $0x133] sm:$0xff] }
 0x334   : > { %v3141_v1 = vmul.f32 %v2983_v55, %v2895_v30  ;;  %v2073_v30 = vld [vmem:[%s7157_s14 + $0x129] sm:$0xff]  ;;  %v2074_v55 = vld [vmem:[%s7157_s14 + $0x131] sm:$0xff] }
 0x335   : > { %v2209_v27 = vpop.f32.mrf.mxu2  ;;  %v3310_v28 = vld [vmem:[#allocation2 + $0x65] sm:$0xff] }
 0x336   : > { %3182 = vst [vmem:[#allocation2 + $0x70] sm:$0xff] %v3141_v1  ;;  %v2294_v17 = vadd.f32 %v2209_v27, %v7524_v49  ;;  %v2354_v1 = vld [vmem:[%s7157_s14 + $0x12a] sm:$0xff] }
 0x337   : > { %v2490_v15 = vpop.f32.mrf.mxu3  ;;  %v2769_v53 = vpop.f32.mrf.mxu0  ;;  %v2379_v62 = vpack.c.bf16 %v2355_v4, %v2354_v1 }
 0x338   : > { %v2855_v9 = vadd.f32 %v2769_v53, %v2574_v54  ;;  %v2575_v11 = vadd.f32 %v2490_v15, %v2294_v17  ;;  %v2098_v15 = vpack.c.bf16 %v2074_v55, %v2073_v30  ;;  %v2357_v30 = vld [vmem:[%s7157_s14 + $0x142] sm:$0xff] }
 0x33a   : > { %v2896_v18 = vmax.f32 %v2855_v9, 0.0  ;;  %2251 = vmatmul.bf16.gmra.mxu2 %v2097_v23  ;;  %2808 = vmatmul.bf16.gmra.mxu0 %v2658_v20  ;;  %v2659_v23 = vpack.c.bf16 %v2634_v39, %v2633_v48  ;;  %v2998_v9 = vpop.permute.xlu2 %2997 }
 0x33c   : > { %2532 = vmatmul.bf16.gmra.mxu3 %v2378_v12  ;;  %v3142_v38 = vmul.f32 %v2988_v37, %v2896_v18 }
 0x33d   : > { %v2212_v6 = vpop.f32.mrf.mxu2  ;;  %v3311_v40 = vld [vmem:[#allocation2 + $0x6d] sm:$0xff] }
 0x33e   : > { %3183 = vst [vmem:[#allocation2 + $0x78] sm:$0xff] %v3142_v38  ;;  %v3345_v33 = vpack.c.bf16 %v3311_v40, %v3310_v28  ;;  %v2295_v50 = vadd.f32 %v2212_v6, %v7539_v59 }
 0x33f   : > { %v2493_v42 = vpop.f32.mrf.mxu3  ;;  %v2771_v49 = vpop.f32.mrf.mxu0 }
 0x340   : > { %v2856_v0 = vadd.f32 %v2771_v49, %v2575_v11  ;;  %3462 = vmatmul.bf16.gmra.mxu1 %v3345_v33  ;;  %v2576_v27 = vadd.f32 %v2493_v42, %v2295_v50  ;;  %v2075_v33 = vld [vmem:[%s7157_s14 + $0x139] sm:$0xff]  ;;  %v3003_v49 = vpop.permute.xlu0 %3002 }
 0x342   : > { %v2897_v45 = vmax.f32 %v2856_v0, 0.0  ;;  %v2076_v0 = vld [vmem:[%s7157_s14 + $0x141] sm:$0xff] }
 0x343   : > { %v2099_v39 = vpack.c.bf16 %v2076_v0, %v2075_v33  ;;  %v2359_v33 = vld [vmem:[%s7157_s14 + $0x152] sm:$0xff] }
 0x344   : > { %v3143_v61 = vmul.f32 %v2993_v47, %v2897_v45  ;;  %v2356_v45 = vld [vmem:[%s7157_s14 + $0x13a] sm:$0xff] }
 0x345   : > { %v2214_v24 = vpop.f32.mrf.mxu2  ;;  %v3312_v18 = vld [vmem:[#allocation2 + $0x75] sm:$0xff]  ;;  %v2380_v4 = vpack.c.bf16 %v2357_v30, %v2356_v45  ;;  %v6695_v30 = vld [vmem:[#allocation8 + $0x98] sm:$0xff] }
 0x346   : > { %3184 = vst [vmem:[#allocation2 + $0x80] sm:$0xff] %v3143_v61  ;;  %v2296_v53 = vadd.f32 %v2214_v24, %v7548_v5  ;;  %v2660_v61 = vpack.c.bf16 %v2636_v60, %v2635_v29  ;;  %3990 = vmatpush.bf16.msrb.mxu3 %v6695_v30 }
 0x347   : > { %v2495_v54 = vpop.f32.mrf.mxu3  ;;  %v2774_v20 = vpop.f32.mrf.mxu0 }
 0x348   : > { %v2857_v59 = vadd.f32 %v2774_v20, %v2576_v27  ;;  %v2577_v38 = vadd.f32 %v2495_v54, %v2296_v53  ;;  %v3008_v54 = vpop.permute.xlu1 %3007 }
 0x34a   : > { %v2898_v12 = vmax.f32 %v2857_v59, 0.0  ;;  %2256 = vmatmul.bf16.gmra.mxu2 %v2098_v15  ;;  %2813 = vmatmul.bf16.gmra.mxu0 %v2659_v23  ;;  %v7894_v15 = vpop.f32.mrf.mxu1 }
 0x34c   : > { %2537 = vmatmul.bf16.gmra.mxu3 %v2379_v62  ;;  %v3144_v22 = vmul.f32 %v2998_v9, %v2898_v12 }
 0x34d   : > { %v2217_v17 = vpop.f32.mrf.mxu2  ;;  %v3313_v37 = vld [vmem:[#allocation2 + $0x7d] sm:$0xff] }
 0x34e   : > { %3185 = vst [vmem:[#allocation2 + $0x88] sm:$0xff] %v3144_v22  ;;  %v3346_v28 = vpack.c.bf16 %v3313_v37, %v3312_v18  ;;  %v2297_v11 = vadd.f32 %v2217_v17, %v7557_v13  ;;  %v6687_v17 = vld [vmem:[#allocation8 + $0x58] sm:$0xff] }
 0x34f   : > { %v2498_v6 = vpop.f32.mrf.mxu3  ;;  %v2776_v5 = vpop.f32.mrf.mxu0  ;;  %3709 = vmatpush.bf16.msrb.mxu2 %v6687_v17  ;;  %v2079_v17 = vld [vmem:[%s7157_s14 + $0x159] sm:$0xff] }
 0x350   : > { %v2858_v40 = vadd.f32 %v2776_v5, %v2577_v38  ;;  %3467 = vmatmul.bf16.gmra.mxu1 %v3346_v28  ;;  %v2578_v55 = vadd.f32 %v2498_v6, %v2297_v11  ;;  %v2077_v38 = vld [vmem:[%s7157_s14 + $0x149] sm:$0xff]  ;;  %v3013_v6 = vpop.permute.xlu2 %3012  ;;  %v2078_v28 = vld [vmem:[%s7157_s14 + $0x151] sm:$0xff]  ;;  %v2637_v5 = vld [vmem:[%s7157_s14 + $0x13b] sm:$0xff] }
 0x352   : > { %v2899_v42 = vmax.f32 %v2858_v40, 0.0  ;;  %v2638_v40 = vld [vmem:[%s7157_s14 + $0x143] sm:$0xff] }
 0x353   : > { %v2661_v45 = vpack.c.bf16 %v2638_v40, %v2637_v5  ;;  %v2640_v5 = vld [vmem:[%s7157_s14 + $0x153] sm:$0xff] }
 0x354   : > { %v3145_v50 = vmul.f32 %v3003_v49, %v2899_v42  ;;  %v2358_v42 = vld [vmem:[%s7157_s14 + $0x14a] sm:$0xff]  ;;  %v7903_v49 = vpop.f32.mrf.mxu1 }
 0x355   : > { %v2219_v47 = vpop.f32.mrf.mxu2  ;;  %v3314_v62 = vld [vmem:[#allocation2 + $0x85] sm:$0xff] }
 0x356   : > { %3186 = vst [vmem:[#allocation2 + $0x90] sm:$0xff] %v3145_v50  ;;  %v2298_v13 = vadd.f32 %v2219_v47, %v7566_v57  ;;  %v2100_v50 = vpack.c.bf16 %v2078_v28, %v2077_v38  ;;  %v2381_v47 = vpack.c.bf16 %v2359_v33, %v2358_v42  ;;  %v3023_v38 = vpop.permute.xlu1 %3022  ;;  %v2639_v28 = vld [vmem:[%s7157_s14 + $0x14b] sm:$0xff]  ;;  %v2361_v42 = vld [vmem:[%s7157_s14 + $0x162] sm:$0xff] }
 0x357   : > { %v2500_v48 = vpop.f32.mrf.mxu3  ;;  %v2779_v1 = vpop.f32.mrf.mxu0 }
 0x358   : > { %v2859_v24 = vadd.f32 %v2779_v1, %v2578_v55  ;;  %v2579_v53 = vadd.f32 %v2500_v48, %v2298_v13  ;;  %v2019_v55 = vadd.f32 %v7592_v52, %v7590_v21  ;;  %v3018_v1 = vpop.permute.xlu0 %3017  ;;  %v6703_v21 = vld [vmem:[#allocation8 + $0xd8] sm:$0xff] }
 0x359   : > { %v6711_v52 = vld [vmem:[#allocation8 + $0x118] sm:$0xff]  ;;  %4271 = vmatpush.bf16.msrb.mxu0 %v6703_v21 }
 0x35a   : > { %v2900_v27 = vmax.f32 %v2859_v24, 0.0  ;;  %2261 = vmatmul.bf16.gmra.mxu2 %v2099_v39  ;;  %2818 = vmatmul.bf16.gmra.mxu0 %v2660_v61 }
 0x35b   : > { %4552 = vmatpush.bf16.msrb.mxu1 %v6711_v52  ;;  %v6702_v52 = vld [vmem:[#allocation8 + $0xd0] sm:$0xff] }
 0x35c   : > { %2542 = vmatmul.bf16.gmra.mxu3 %v2380_v4  ;;  %v3146_v23 = vmul.f32 %v3008_v54, %v2900_v27 }
 0x35d   : > { %v2222_v20 = vpop.f32.mrf.mxu2  ;;  %v3315_v59 = vld [vmem:[#allocation2 + $0x8d] sm:$0xff]  ;;  %4272 = vmatpush.bf16.msrb.mxu0 %v6702_v52 }
 0x35e   : > { %3187 = vst [vmem:[#allocation2 + $0x98] sm:$0xff] %v3146_v23  ;;  %v3347_v57 = vpack.c.bf16 %v3315_v59, %v3314_v62  ;;  %v2299_v18 = vadd.f32 %v2222_v20, %v7581_v3  ;;  %v6686_v59 = vld [vmem:[#allocation8 + $0x50] sm:$0xff]  ;;  %v3578_v52 = vld [vmem:[#allocation2 + $0x6] sm:$0xff] }
 0x35f   : > { %v2503_v12 = vpop.f32.mrf.mxu3  ;;  %v2781_v9 = vpop.f32.mrf.mxu0  ;;  %3710 = vmatpush.bf16.msrb.mxu2 %v6686_v59 }
 0x360   : > { %v2860_v22 = vadd.f32 %v2781_v9, %v2579_v53  ;;  %3472 = vmatmul.bf16.gmra.mxu1 %v3347_v57  ;;  %v2580_v29 = vadd.f32 %v2503_v12, %v2299_v18  ;;  %v6694_v12 = vld [vmem:[#allocation8 + $0x90] sm:$0xff]  ;;  %v6685_v18 = vld [vmem:[#allocation8 + $0x48] sm:$0xff] }
 0x361   : > { %3991 = vmatpush.bf16.msrb.mxu3 %v6694_v12 }
 0x362   : > { %v2901_v37 = vmax.f32 %v2860_v22, 0.0 }
 0x363   : > { %3711 = vmatpush.bf16.msrb.mxu2 %v6685_v18  ;;  %v2641_v18 = vld [vmem:[%s7157_s14 + $0x15b] sm:$0xff] }
 0x364   : > { %v3147_v11 = vmul.f32 %v3013_v6, %v2901_v37  ;;  %v6693_v37 = vld [vmem:[#allocation8 + $0x88] sm:$0xff] }
 0x365   : > { %v2224_v0 = vpop.f32.mrf.mxu2  ;;  %v3316_v27 = vld [vmem:[#allocation2 + $0x95] sm:$0xff]  ;;  %3992 = vmatpush.bf16.msrb.mxu3 %v6693_v37 }
 0x366   : > { %3188 = vst [vmem:[#allocation2 + $0xa0] sm:$0xff] %v3147_v11  ;;  %v2300_v39 = vadd.f32 %v2224_v0, %v2019_v55  ;;  %v2080_v6 = vld [vmem:[%s7157_s14 + $0x161] sm:$0xff] }
 0x367   : > { %v2505_v60 = vpop.f32.mrf.mxu3  ;;  %v2784_v3 = vpop.f32.mrf.mxu0  ;;  %v2360_v11 = vld [vmem:[%s7157_s14 + $0x15a] sm:$0xff]  ;;  %v2642_v37 = vld [vmem:[%s7157_s14 + $0x163] sm:$0xff] }
 0x368   : > { %v2861_v48 = vadd.f32 %v2784_v3, %v2580_v29  ;;  %v2581_v23 = vadd.f32 %v2505_v60, %v2300_v39  ;;  %v2382_v3 = vpack.c.bf16 %v2361_v42, %v2360_v11  ;;  %v6692_v39 = vld [vmem:[#allocation8 + $0x80] sm:$0xff] }
 0x369   : > { %3993 = vmatpush.bf16.msrb.mxu3 %v6692_v39 }
 0x36a   : > { %v2902_v61 = vmax.f32 %v2861_v48, 0.0  ;;  %2266 = vmatmul.bf16.gmra.mxu2 %v2100_v50  ;;  %2823 = vmatmul.bf16.gmra.mxu0 %v2661_v45  ;;  %v2662_v50 = vpack.c.bf16 %v2640_v5, %v2639_v28  ;;  %v6684_v45 = vld [vmem:[#allocation8 + $0x40] sm:$0xff] }
 0x36b   : > { %3712 = vmatpush.bf16.msrb.mxu2 %v6684_v45 }
 0x36c   : > { %2547 = vmatmul.bf16.gmra.mxu3 %v2381_v47  ;;  %v3148_v4 = vmul.f32 %v3018_v1, %v2902_v61  ;;  %v8632_v47 = vld [vmem:[#allocation13_spill] sm:$0xff] }
 0x36d   : > { %v2227_v24 = vpop.f32.mrf.mxu2  ;;  %v7907_v13 = vpop.f32.mrf.mxu1  ;;  %v3317_v54 = vld [vmem:[#allocation2 + $0x9d] sm:$0xff]  ;;  %v2021_v55 = vadd.f32 %v8632_v47, %v7622_v35 }
 0x36e   : > { %3189 = vst [vmem:[#allocation2 + $0xa8] sm:$0xff] %v3148_v4  ;;  %v3348_v62 = vpack.c.bf16 %v3317_v54, %v3316_v27  ;;  %v2301_v9 = vadd.f32 %v2227_v24, %v7613_v16  ;;  %v2101_v16 = vpack.c.bf16 %v2080_v6, %v2079_v17  ;;  %v3028_v4 = vpop.permute.xlu2 %3027  ;;  %v2081_v17 = vld [vmem:[%s7157_s14 + $0x169] sm:$0xff]  ;;  %v3038_v47 = vpop.permute.xlu1 %3037 }
 0x36f   : > { %v2508_v20 = vpop.f32.mrf.mxu3  ;;  %v2786_v53 = vpop.f32.mrf.mxu0  ;;  %v2362_v6 = vld [vmem:[%s7157_s14 + $0x16a] sm:$0xff]  ;;  %v2102_v42 = vpack.c.bf16 %v2081_v17, %v2081_v17 }
 0x370   : > { %v2862_v57 = vadd.f32 %v2786_v53, %v2581_v23  ;;  %3477 = vmatmul.bf16.gmra.mxu1 %v3348_v62  ;;  %v2582_v29 = vadd.f32 %v2508_v20, %v2301_v9  ;;  %v6701_v9 = vld [vmem:[#allocation8 + $0xc8] sm:$0xff] }
 0x371   : > { %4273 = vmatpush.bf16.msrb.mxu0 %v6701_v9 }
 0x372   : > { %v2903_v22 = vmax.f32 %v2862_v57, 0.0 }
 0x374   : > { %v3149_v40 = vmul.f32 %v3023_v38, %v2903_v22  ;;  %v3033_v22 = vpop.permute.xlu0 %3032 }
 0x375   : > { %v2229_v33 = vpop.f32.mrf.mxu2  ;;  %v7916_v0 = vpop.f32.mrf.mxu1  ;;  %v3318_v23 = vld [vmem:[#allocation2 + $0xa5] sm:$0xff] }
 0x376   : > { %3190 = vst [vmem:[#allocation2 + $0xb0] sm:$0xff] %v3149_v40  ;;  %v2302_v61 = vadd.f32 %v2229_v33, %v2021_v55  ;;  %v2663_v33 = vpack.c.bf16 %v2642_v37, %v2641_v18 }
 0x377   : > { %v2510_v60 = vpop.f32.mrf.mxu3  ;;  %v2789_v30 = vpop.f32.mrf.mxu0 }
 0x378   : > { %v2863_v48 = vadd.f32 %v2789_v30, %v2582_v29  ;;  %v2583_v35 = vadd.f32 %v2510_v60, %v2302_v61  ;;  %v6700_v29 = vld [vmem:[#allocation8 + $0xc0] sm:$0xff] }
 0x379   : > { %4274 = vmatpush.bf16.msrb.mxu0 %v6700_v29 }
 0x37a   : > { %v2904_v1 = vmax.f32 %v2863_v48, 0.0  ;;  %2271 = vmatmul.bf16.gmra.mxu2 %v2101_v16  ;;  %2828 = vmatmul.bf16.gmra.mxu0 %v2662_v50  ;;  %v8633_v16 = vld [vmem:[#allocation14_spill] sm:$0xff] }
 0x37b   : > { %v2023_v50 = vadd.f32 %v8633_v16, %v7653_v14 }
 0x37c   : > { %2552 = vmatmul.bf16.gmra.mxu3 %v2382_v3  ;;  %v3150_v24 = vmul.f32 %v3028_v4, %v2904_v1  ;;  %v3048_v29 = vpop.permute.xlu0 %3047 }
 0x37d   : > { %v2232_v27 = vpop.f32.mrf.mxu2  ;;  %v7920_v54 = vpop.f32.mrf.mxu1  ;;  %v3319_v20 = vld [vmem:[#allocation2 + $0xad] sm:$0xff] }
 0x37e   : > { %3191 = vst [vmem:[#allocation2 + $0xb8] sm:$0xff] %v3150_v24  ;;  %v3349_v21 = vpack.c.bf16 %v3319_v20, %v3318_v23  ;;  %v2303_v12 = vadd.f32 %v2232_v27, %v7644_v25  ;;  %v2383_v25 = vpack.c.bf16 %v2362_v6, %v2362_v6  ;;  %v6710_v6 = vld [vmem:[#allocation8 + $0x110] sm:$0xff] }
 0x37f   : > { %v2513_v62 = vpop.f32.mrf.mxu3  ;;  %v2791_v59 = vpop.f32.mrf.mxu0  ;;  %4553 = vmatpush.bf16.msrb.mxu1 %v6710_v6 }
 0x380   : > { %v2864_v53 = vadd.f32 %v2791_v59, %v2583_v35  ;;  %3482 = vmatmul.bf16.gmra.mxu1 %v3349_v21  ;;  %v2584_v40 = vadd.f32 %v2513_v62, %v2303_v12  ;;  %v3043_v62 = vpop.permute.xlu2 %3042  ;;  %v2643_v21 = vld [vmem:[%s7157_s14 + $0x16b] sm:$0xff]  ;;  %v3579_v59 = vld [vmem:[#allocation2 + $0xe] sm:$0xff] }
 0x381   : > { %v3859_v12 = vld [vmem:[#allocation2 + $0x7] sm:$0xff]  ;;  %v2664_v37 = vpack.c.bf16 %v2643_v21, %v2643_v21  ;;  %v3861_v21 = vld [vmem:[#allocation2 + $0x17] sm:$0xff] }
 0x382   : > { %v2905_v57 = vmax.f32 %v2864_v53, 0.0 }
 0x384   : > { %v3151_v38 = vmul.f32 %v3033_v22, %v2905_v57  ;;  %v3860_v57 = vld [vmem:[#allocation2 + $0xf] sm:$0xff] }
 0x385   : > { %v2234_v28 = vpop.f32.mrf.mxu2  ;;  %v7927_v5 = vpop.f32.mrf.mxu1  ;;  %v3320_v61 = vld [vmem:[#allocation2 + $0xb5] sm:$0xff] }
 0x386   : > { %3192 = vst [vmem:[#allocation2 + $0xc0] sm:$0xff] %v3151_v38  ;;  %v2304_v30 = vadd.f32 %v2234_v28, %v2023_v50  ;;  %v3619_v38 = vpack.c.bf16 %v3579_v59, %v3578_v52  ;;  %v2027_v52 = vadd.f32 %v7713_v7, %v7711_v10 }
 0x387   : > { %v2515_v11 = vpop.f32.mrf.mxu3  ;;  %v2794_v60 = vpop.f32.mrf.mxu0 }
 0x388   : > { %v2865_v45 = vadd.f32 %v2794_v60, %v2584_v40  ;;  %v2585_v4 = vadd.f32 %v2515_v11, %v2304_v30  ;;  %v3900_v40 = vpack.c.bf16 %v3860_v57, %v3859_v12 }
 0x38a   : > { %v2906_v3 = vmax.f32 %v2865_v45, 0.0  ;;  %2276 = vmatmul.bf16.gmra.mxu2 %v2102_v42  ;;  %2833 = vmatmul.bf16.gmra.mxu0 %v2663_v33 }
 0x38c   : > { %2557 = vmatmul.bf16.gmra.mxu3 %v2383_v25  ;;  %v3152_v55 = vmul.f32 %v3038_v47, %v2906_v3 }
 0x38d   : > { %v2237_v48 = vpop.f32.mrf.mxu2  ;;  %v7931_v39 = vpop.f32.mrf.mxu1  ;;  %v3321_v1 = vld [vmem:[#allocation2 + $0xbd] sm:$0xff] }
 0x38e   : > { %3193 = vst [vmem:[#allocation2 + $0xc8] sm:$0xff] %v3152_v55  ;;  %v3350_v27 = vpack.c.bf16 %v3321_v1, %v3320_v61  ;;  %v2305_v20 = vadd.f32 %v2237_v48, %v7676_v26  ;;  %v2025_v26 = vadd.f32 %v7687_v36, %v7685_v8  ;;  %v3053_v61 = vpop.permute.xlu1 %3052 }
 0x38f   : > { %v2518_v24 = vpop.f32.mrf.mxu3  ;;  %v2796_v14 = vpop.f32.mrf.mxu0 }
 0x390   : > { %v2866_v23 = vadd.f32 %v2796_v14, %v2585_v4  ;;  %3487 = vmatmul.bf16.gmra.mxu1 %v3350_v27  ;;  %v2586_v17 = vadd.f32 %v2518_v24, %v2305_v20  ;;  %v3581_v27 = vld [vmem:[#allocation2 + $0x1e] sm:$0xff] }
 0x391   : > { %v3862_v14 = vld [vmem:[#allocation2 + $0x1f] sm:$0xff] }
 0x392   : > { %v2907_v35 = vmax.f32 %v2866_v23, 0.0 }
 0x394   : > { %v3153_v53 = vmul.f32 %v3043_v62, %v2907_v35  ;;  %v3580_v62 = vld [vmem:[#allocation2 + $0x16] sm:$0xff] }
 0x395   : > { %v2239_v9 = vpop.f32.mrf.mxu2  ;;  %v7935_v22 = vpop.f32.mrf.mxu1  ;;  %v3322_v50 = vld [vmem:[#allocation2 + $0xc5] sm:$0xff] }
 0x396   : > { %3194 = vst [vmem:[#allocation2 + $0xd0] sm:$0xff] %v3153_v53  ;;  %v2306_v42 = vadd.f32 %v2239_v9, %v2025_v26  ;;  %v3620_v53 = vpack.c.bf16 %v3581_v27, %v3580_v62  ;;  %v3058_v9 = vpop.permute.xlu2 %3057  ;;  %v3068_v27 = vpop.permute.xlu1 %3067 }
 0x397   : > { %v2520_v18 = vpop.f32.mrf.mxu3  ;;  %v2799_v28 = vpop.f32.mrf.mxu0 }
 0x398   : > { %v2867_v11 = vadd.f32 %v2799_v28, %v2586_v17  ;;  %v2587_v30 = vadd.f32 %v2520_v18, %v2306_v42 }
 0x39a   : > { %v2908_v33 = vmax.f32 %v2867_v11, 0.0  ;;  %2838 = vmatmul.bf16.gmra.mxu0 %v2664_v37  ;;  %3713 = vmatmul.bf16.vlgmr.msrb.gmra.mxu2 %v3619_v38 }
 0x39c   : > { %3994 = vmatmul.bf16.vlgmr.msrb.gmra.mxu3 %v3900_v40  ;;  %v3154_v60 = vmul.f32 %v3048_v29, %v2908_v33  ;;  %v3063_v33 = vpop.permute.xlu0 %3062 }
 0x39d   : > { %v2242_v25 = vpop.f32.mrf.mxu2  ;;  %v7939_v16 = vpop.f32.mrf.mxu1  ;;  %v3323_v45 = vld [vmem:[#allocation2 + $0xcd] sm:$0xff] }
 0x39e   : > { %3195 = vst [vmem:[#allocation2 + $0xd8] sm:$0xff] %v3154_v60  ;;  %v3351_v47 = vpack.c.bf16 %v3323_v45, %v3322_v50  ;;  %v2307_v36 = vadd.f32 %v2242_v25, %v7705_v2  ;;  %v3901_v2 = vpack.c.bf16 %v3862_v14, %v3861_v21  ;;  %v3583_v50 = vld [vmem:[#allocation2 + $0x2e] sm:$0xff] }
 0x39f   : > { %v2523_v3 = vpop.f32.mrf.mxu3  ;;  %v2801_v55 = vpop.f32.mrf.mxu0  ;;  %v3864_v45 = vld [vmem:[#allocation2 + $0x2f] sm:$0xff] }
 0x3a0   : > { %v2868_v8 = vadd.f32 %v2801_v55, %v2587_v30  ;;  %3492 = vmatmul.bf16.gmra.mxu1 %v3351_v47  ;;  %v2588_v23 = vadd.f32 %v2523_v3, %v2307_v36  ;;  %v3582_v55 = vld [vmem:[#allocation2 + $0x26] sm:$0xff]  ;;  %v2029_v36 = vadd.f32 %v7733_v56, %v7731_v46  ;;  %v6709_v46 = vld [vmem:[#allocation8 + $0x108] sm:$0xff] }
 0x3a1   : > { %4554 = vmatpush.bf16.msrb.mxu1 %v6709_v46  ;;  %v3586_v46 = vld [vmem:[#allocation2 + $0x46] sm:$0xff] }
 0x3a2   : > { %v2909_v48 = vmax.f32 %v2868_v8, 0.0  ;;  %v3863_v8 = vld [vmem:[#allocation2 + $0x27] sm:$0xff] }
 0x3a4   : > { %v3155_v1 = vmul.f32 %v3053_v61, %v2909_v48  ;;  %v3621_v61 = vpack.c.bf16 %v3583_v50, %v3582_v55  ;;  %v3078_v50 = vpop.permute.xlu0 %3077 }
 0x3a5   : > { %v2244_v4 = vpop.f32.mrf.mxu2  ;;  %v7942_v24 = vpop.f32.mrf.mxu1  ;;  %v3324_v38 = vld [vmem:[#allocation2 + $0xd5] sm:$0xff] }
 0x3a6   : > { %3196 = vst [vmem:[#allocation2 + $0xe0] sm:$0xff] %v3155_v1  ;;  %v2308_v12 = vadd.f32 %v2244_v4, %v2027_v52 }
 0x3a7   : > { %v2525_v20 = vpop.f32.mrf.mxu3  ;;  %v2804_v35 = vpop.f32.mrf.mxu0 }
 0x3a8   : > { %v2869_v59 = vadd.f32 %v2804_v35, %v2588_v23  ;;  %v2589_v28 = vadd.f32 %v2525_v20, %v2308_v12 }
 0x3aa   : > { %v2910_v57 = vmax.f32 %v2869_v59, 0.0  ;;  %3718 = vmatmul.bf16.gmra.mxu2 %v3620_v53  ;;  %4275 = vmatmul.bf16.vlgmr.msrb.gmra.mxu0 %v3901_v2 }
 0x3ac   : > { %3999 = vmatmul.bf16.gmra.mxu3 %v3901_v2  ;;  %v3156_v17 = vmul.f32 %v3058_v9, %v2910_v57  ;;  %v3073_v57 = vpop.permute.xlu2 %3072 }
 0x3ad   : > { %v2247_v18 = vpop.f32.mrf.mxu2  ;;  %v7946_v37 = vpop.f32.mrf.mxu1  ;;  %v3325_v6 = vld [vmem:[#allocation2 + $0xdd] sm:$0xff] }
 0x3ae   : > { %3197 = vst [vmem:[#allocation2 + $0xe8] sm:$0xff] %v3156_v17  ;;  %v3352_v26 = vpack.c.bf16 %v3325_v6, %v3324_v38  ;;  %v2309_v11 = vadd.f32 %v2247_v18, %v7728_v41  ;;  %v3902_v41 = vpack.c.bf16 %v3864_v45, %v3863_v8  ;;  %v3585_v38 = vld [vmem:[#allocation2 + $0x3e] sm:$0xff] }
 0x3af   : > { %v2528_v40 = vpop.f32.mrf.mxu3  ;;  %v2806_v10 = vpop.f32.mrf.mxu0  ;;  %v3866_v6 = vld [vmem:[#allocation2 + $0x3f] sm:$0xff] }
 0x3b0   : > { %v2870_v7 = vadd.f32 %v2806_v10, %v2589_v28  ;;  %3497 = vmatmul.bf16.gmra.mxu1 %v3352_v26  ;;  %v2590_v30 = vadd.f32 %v2528_v40, %v2309_v11  ;;  %v3584_v10 = vld [vmem:[#allocation2 + $0x36] sm:$0xff]  ;;  %v2031_v11 = vadd.f32 %v7753_v58, %v7751_v63 }
 0x3b2   : > { %v2911_v42 = vmax.f32 %v2870_v7, 0.0  ;;  %v3865_v7 = vld [vmem:[#allocation2 + $0x37] sm:$0xff] }
 0x3b4   : > { %v3157_v29 = vmul.f32 %v3063_v33, %v2911_v42  ;;  %v3622_v33 = vpack.c.bf16 %v3585_v38, %v3584_v10  ;;  %v3088_v38 = vpop.permute.xlu2 %3087 }
 0x3b5   : > { %v2249_v60 = vpop.f32.mrf.mxu2  ;;  %v7949_v25 = vpop.f32.mrf.mxu1  ;;  %v3326_v35 = vld [vmem:[#allocation2 + $0xe5] sm:$0xff] }
 0x3b6   : > { %3198 = vst [vmem:[#allocation2 + $0xf0] sm:$0xff] %v3157_v29  ;;  %v2310_v1 = vadd.f32 %v2249_v60, %v2029_v36 }
 0x3b7   : > { %v2530_v3 = vpop.f32.mrf.mxu3  ;;  %v2809_v47 = vpop.f32.mrf.mxu0 }
 0x3b8   : > { %v2871_v48 = vadd.f32 %v2809_v47, %v2590_v30  ;;  %v2591_v21 = vadd.f32 %v2530_v3, %v2310_v1 }
 0x3ba   : > { %v2912_v4 = vmax.f32 %v2871_v48, 0.0  ;;  %3723 = vmatmul.bf16.gmra.mxu2 %v3621_v61  ;;  %4280 = vmatmul.bf16.gmra.mxu0 %v3902_v41  ;;  %v8634_v61 = vld [vmem:[#allocation15_spill] sm:$0xff] }
 0x3bc   : > { %4004 = vmatmul.bf16.gmra.mxu3 %v3902_v41  ;;  %v3158_v14 = vmul.f32 %v3068_v27, %v2912_v4  ;;  %v3083_v4 = vpop.permute.xlu1 %3082 }
 0x3bd   : > { %v2252_v23 = vpop.f32.mrf.mxu2  ;;  %v7953_v20 = vpop.f32.mrf.mxu1  ;;  %v3327_v62 = vld [vmem:[#allocation2 + $0xed] sm:$0xff] }
 0x3be   : > { %3199 = vst [vmem:[#allocation2 + $0xf8] sm:$0xff] %v3158_v14  ;;  %v3353_v59 = vpack.c.bf16 %v3327_v62, %v3326_v35  ;;  %v2311_v2 = vadd.f32 %v2252_v23, %v7748_v32  ;;  %v3903_v32 = vpack.c.bf16 %v3866_v6, %v3865_v7  ;;  %v3587_v35 = vld [vmem:[#allocation2 + $0x4e] sm:$0xff] }
 0x3bf   : > { %v2533_v52 = vpop.f32.mrf.mxu3  ;;  %v2811_v56 = vpop.f32.mrf.mxu0  ;;  %v3868_v62 = vld [vmem:[#allocation2 + $0x4f] sm:$0xff] }
 0x3c0   : > { %v2872_v53 = vadd.f32 %v2811_v56, %v2591_v21  ;;  %3502 = vmatmul.bf16.gmra.mxu1 %v3353_v59  ;;  %v2592_v28 = vadd.f32 %v2533_v52, %v2311_v2  ;;  %v3867_v56 = vld [vmem:[#allocation2 + $0x47] sm:$0xff] }
 0x3c2   : > { %v2913_v12 = vmax.f32 %v2872_v53, 0.0  ;;  %v2033_v53 = vadd.f32 %v7770_v51, %v7768_v34 }
 0x3c4   : > { %v3159_v9 = vmul.f32 %v3073_v57, %v2913_v12  ;;  %v3623_v12 = vpack.c.bf16 %v3587_v35, %v3586_v46  ;;  %v3904_v57 = vpack.c.bf16 %v3868_v62, %v3867_v56  ;;  %v6708_v35 = vld [vmem:[#allocation8 + $0x100] sm:$0xff] }
 0x3c5   : > { %v2254_v17 = vpop.f32.mrf.mxu2  ;;  %v7956_v18 = vpop.f32.mrf.mxu1  ;;  %v3328_v47 = vld [vmem:[#allocation2 + $0xf5] sm:$0xff]  ;;  %4555 = vmatpush.bf16.msrb.mxu1 %v6708_v35 }
 0x3c6   : > { %3200 = vst [vmem:[#allocation2 + $0x100] sm:$0xff] %v3159_v9  ;;  %v2312_v29 = vadd.f32 %v2254_v17, %v2031_v11 }
 0x3c7   : > { %v2535_v40 = vpop.f32.mrf.mxu3  ;;  %v2814_v26 = vpop.f32.mrf.mxu0 }
 0x3c8   : > { %v2873_v42 = vadd.f32 %v2814_v26, %v2592_v28  ;;  %v2593_v8 = vadd.f32 %v2535_v40, %v2312_v29 }
 0x3ca   : > { %v2914_v60 = vmax.f32 %v2873_v42, 0.0  ;;  %3728 = vmatmul.bf16.gmra.mxu2 %v3622_v33  ;;  %4285 = vmatmul.bf16.gmra.mxu0 %v3903_v32  ;;  %v8635_v33 = vld [vmem:[#allocation16_spill] sm:$0xff] }
 0x3cc   : > { %4009 = vmatmul.bf16.gmra.mxu3 %v3903_v32  ;;  %v3160_v45 = vmul.f32 %v3078_v50, %v2914_v60  ;;  %v3093_v60 = vpop.permute.xlu0 %3092 }
 0x3cd   : > { %v2257_v30 = vpop.f32.mrf.mxu2  ;;  %v7960_v3 = vpop.f32.mrf.mxu1  ;;  %v3329_v55 = vld [vmem:[#allocation2 + $0xfd] sm:$0xff] }
 0x3ce   : > { %3201 = vst [vmem:[#allocation2 + $0x108] sm:$0xff] %v3160_v45  ;;  %v3354_v48 = vpack.c.bf16 %v3329_v55, %v3328_v47  ;;  %v2313_v41 = vadd.f32 %v2257_v30, %v8634_v61  ;;  %v3589_v47 = vld [vmem:[#allocation2 + $0x5e] sm:$0xff] }
 0x3cf   : > { %v2538_v36 = vpop.f32.mrf.mxu3  ;;  %v2816_v63 = vpop.f32.mrf.mxu0  ;;  %v3870_v55 = vld [vmem:[#allocation2 + $0x5f] sm:$0xff] }
 0x3d0   : > { %v2874_v58 = vadd.f32 %v2816_v63, %v2593_v8  ;;  %3507 = vmatmul.bf16.gmra.mxu1 %v3354_v48  ;;  %v2594_v21 = vadd.f32 %v2538_v36, %v2313_v41  ;;  %v3588_v63 = vld [vmem:[#allocation2 + $0x56] sm:$0xff]  ;;  %v8637_v41 = vld [vmem:[#allocation18_spill] sm:$0xff] }
 0x3d1   : > { %v8636_v61 = vld [vmem:[#allocation17_spill] sm:$0xff] }
 0x3d2   : > { %v2915_v1 = vmax.f32 %v2874_v58, 0.0  ;;  %v3869_v58 = vld [vmem:[#allocation2 + $0x57] sm:$0xff] }
 0x3d4   : > { %v3161_v27 = vmul.f32 %v3083_v4, %v2915_v1  ;;  %v2035_v1 = vadd.f32 %v8637_v41, %v8636_v61  ;;  %v3108_v61 = vpop.permute.xlu0 %3107 }
 0x3d5   : > { %v2259_v14 = vpop.f32.mrf.mxu2  ;;  %v7963_v23 = vpop.f32.mrf.mxu1  ;;  %v3330_v26 = vld [vmem:[#allocation2 + $0x105] sm:$0xff] }
 0x3d6   : > { %3202 = vst [vmem:[#allocation2 + $0x110] sm:$0xff] %v3161_v27  ;;  %v2314_v9 = vadd.f32 %v2259_v14, %v2033_v53  ;;  %v3624_v27 = vpack.c.bf16 %v3589_v47, %v3588_v63  ;;  %v3905_v14 = vpack.c.bf16 %v3870_v55, %v3869_v58  ;;  %v8640_v47 = vld [vmem:[#allocation21_spill] sm:$0xff] }
 0x3d7   : > { %v2540_v52 = vpop.f32.mrf.mxu3  ;;  %v2819_v59 = vpop.f32.mrf.mxu0 }
 0x3d8   : > { %v2875_v2 = vadd.f32 %v2819_v59, %v2594_v21  ;;  %v2595_v7 = vadd.f32 %v2540_v52, %v2314_v9  ;;  %v3098_v52 = vpop.permute.xlu1 %3097 }
 0x3da   : > { %v2916_v17 = vmax.f32 %v2875_v2, 0.0  ;;  %3733 = vmatmul.bf16.gmra.mxu2 %v3623_v12  ;;  %4290 = vmatmul.bf16.gmra.mxu0 %v3904_v57 }
 0x3dc   : > { %4014 = vmatmul.bf16.gmra.mxu3 %v3904_v57  ;;  %v3162_v6 = vmul.f32 %v3088_v38, %v2916_v17 }
 0x3dd   : > { %v2262_v28 = vpop.f32.mrf.mxu2  ;;  %v7967_v40 = vpop.f32.mrf.mxu1  ;;  %v3331_v10 = vld [vmem:[#allocation2 + $0x10d] sm:$0xff] }
 0x3de   : > { %3203 = vst [vmem:[#allocation2 + $0x118] sm:$0xff] %v3162_v6  ;;  %v3355_v42 = vpack.c.bf16 %v3331_v10, %v3330_v26  ;;  %v2315_v32 = vadd.f32 %v2262_v28, %v8635_v33  ;;  %v8638_v6 = vld [vmem:[#allocation19_spill] sm:$0xff]  ;;  %v3103_v10 = vpop.permute.xlu2 %3102 }
 0x3df   : > { %v2543_v11 = vpop.f32.mrf.mxu3  ;;  %v2821_v34 = vpop.f32.mrf.mxu0 }
 0x3e0   : > { %v2876_v51 = vadd.f32 %v2821_v34, %v2595_v7  ;;  %3512 = vmatmul.bf16.gmra.mxu1 %v3355_v42  ;;  %v2596_v8 = vadd.f32 %v2543_v11, %v2315_v32  ;;  %v3591_v34 = vld [vmem:[#allocation2 + $0x6e] sm:$0xff] }
 0x3e2   : > { %v2917_v29 = vmax.f32 %v2876_v51, 0.0  ;;  %v3872_v51 = vld [vmem:[#allocation2 + $0x6f] sm:$0xff] }
 0x3e4   : > { %v3163_v50 = vmul.f32 %v3093_v60, %v2917_v29  ;;  %v3590_v60 = vld [vmem:[#allocation2 + $0x66] sm:$0xff] }
 0x3e5   : > { %v2264_v45 = vpop.f32.mrf.mxu2  ;;  %v7970_v30 = vpop.f32.mrf.mxu1  ;;  %v3332_v53 = vld [vmem:[#allocation2 + $0x115] sm:$0xff] }
 0x3e6   : > { %3204 = vst [vmem:[#allocation2 + $0x120] sm:$0xff] %v3163_v50  ;;  %v2316_v62 = vadd.f32 %v2264_v45, %v2035_v1  ;;  %v3871_v50 = vld [vmem:[#allocation2 + $0x67] sm:$0xff]  ;;  %v8639_v45 = vld [vmem:[#allocation20_spill] sm:$0xff] }
 0x3e7   : > { %v2545_v36 = vpop.f32.mrf.mxu3  ;;  %v2824_v48 = vpop.f32.mrf.mxu0  ;;  %v2037_v55 = vadd.f32 %v8640_v47, %v8639_v45 }
 0x3e8   : > { %v2877_v4 = vadd.f32 %v2824_v48, %v2596_v8  ;;  %v2597_v12 = vadd.f32 %v2545_v36, %v2316_v62  ;;  %v3625_v36 = vpack.c.bf16 %v3591_v34, %v3590_v60  ;;  %v3906_v48 = vpack.c.bf16 %v3872_v51, %v3871_v50  ;;  %v3118_v50 = vpop.permute.xlu2 %3117 }
 0x3ea   : > { %v2918_v21 = vmax.f32 %v2877_v4, 0.0  ;;  %3738 = vmatmul.bf16.gmra.mxu2 %v3624_v27  ;;  %4295 = vmatmul.bf16.gmra.mxu0 %v3905_v14 }
 0x3ec   : > { %4019 = vmatmul.bf16.gmra.mxu3 %v3905_v14  ;;  %v3164_v59 = vmul.f32 %v3098_v52, %v2918_v21 }
 0x3ed   : > { %v2267_v46 = vpop.f32.mrf.mxu2  ;;  %v7974_v56 = vpop.f32.mrf.mxu1  ;;  %v3333_v2 = vld [vmem:[#allocation2 + $0x11d] sm:$0xff] }
 0x3ee   : > { %3205 = vst [vmem:[#allocation2 + $0x128] sm:$0xff] %v3164_v59  ;;  %v3356_v9 = vpack.c.bf16 %v3333_v2, %v3332_v53  ;;  %v2317_v28 = vadd.f32 %v2267_v46, %v8638_v6  ;;  %v3113_v2 = vpop.permute.xlu1 %3112 }
 0x3ef   : > { %v2548_v57 = vpop.f32.mrf.mxu3  ;;  %v2826_v17 = vpop.f32.mrf.mxu0 }
 0x3f0   : > { %v2878_v38 = vadd.f32 %v2826_v17, %v2597_v12  ;;  %3517 = vmatmul.bf16.gmra.mxu1 %v3356_v9  ;;  %v2598_v33 = vadd.f32 %v2548_v57, %v2317_v28  ;;  %v3593_v17 = vld [vmem:[#allocation2 + $0x7e] sm:$0xff] }
 0x3f2   : > { %v2919_v26 = vmax.f32 %v2878_v38, 0.0  ;;  %v3874_v38 = vld [vmem:[#allocation2 + $0x7f] sm:$0xff] }
 0x3f4   : > { %v3165_v7 = vmul.f32 %v3103_v10, %v2919_v26  ;;  %v3592_v10 = vld [vmem:[#allocation2 + $0x76] sm:$0xff] }
 0x3f5   : > { %v2269_v11 = vpop.f32.mrf.mxu2  ;;  %v7977_v42 = vpop.f32.mrf.mxu1  ;;  %v3334_v27 = vld [vmem:[#allocation2 + $0x125] sm:$0xff]  ;;  %v3626_v51 = vpack.c.bf16 %v3593_v17, %v3592_v10 }
 0x3f6   : > { %3206 = vst [vmem:[#allocation2 + $0x130] sm:$0xff] %v3165_v7  ;;  %v2318_v63 = vadd.f32 %v2269_v11, %v2037_v55  ;;  %v3873_v7 = vld [vmem:[#allocation2 + $0x77] sm:$0xff]  ;;  %v2039_v11 = vadd.f32 %v7812_v43, %v7810_v19  ;;  %v3875_v17 = vld [vmem:[#allocation2 + $0x87] sm:$0xff] }
 0x3f7   : > { %v2550_v32 = vpop.f32.mrf.mxu3  ;;  %v2829_v29 = vpop.f32.mrf.mxu0 }
 0x3f8   : > { %v2879_v8 = vadd.f32 %v2829_v29, %v2598_v33  ;;  %v2599_v35 = vadd.f32 %v2550_v32, %v2318_v63  ;;  %v6723_v33 = vld [vmem:[#allocation8 + $0x178] sm:$0xff] }
 0x3f9   : > { %v6731_v32 = vld [vmem:[#allocation8 + $0x1b8] sm:$0xff]  ;;  %4829 = vmatpush.bf16.msra.mxu2 %v6723_v33 }
 0x3fa   : > { %v2920_v58 = vmax.f32 %v2879_v8, 0.0  ;;  %3743 = vmatmul.bf16.gmra.mxu2 %v3625_v36  ;;  %4300 = vmatmul.bf16.gmra.mxu0 %v3906_v48 }
 0x3fb   : > { %5110 = vmatpush.bf16.msra.mxu3 %v6731_v32 }
 0x3fc   : > { %4024 = vmatmul.bf16.gmra.mxu3 %v3906_v48  ;;  %v3166_v41 = vmul.f32 %v3108_v61, %v2920_v58  ;;  %v6739_v61 = vld [vmem:[#allocation8 + $0x1f8] sm:$0xff] }
 0x3fd   : > { %v2272_v1 = vpop.f32.mrf.mxu2  ;;  %v7981_v4 = vpop.f32.mrf.mxu1  ;;  %v3335_v14 = vld [vmem:[#allocation2 + $0x12d] sm:$0xff]  ;;  %5391 = vmatpush.bf16.msra.mxu0 %v6739_v61 }
 0x3fe   : > { %3207 = vst [vmem:[#allocation2 + $0x138] sm:$0xff] %v3166_v41  ;;  %v3357_v21 = vpack.c.bf16 %v3335_v14, %v3334_v27  ;;  %v2319_v46 = vadd.f32 %v2272_v1, %v7807_v31  ;;  %v3907_v31 = vpack.c.bf16 %v3874_v38, %v3873_v7  ;;  %v6747_v41 = vld [vmem:[#allocation8 + $0x238] sm:$0xff]  ;;  %v3123_v14 = vpop.permute.xlu0 %3122  ;;  %v3128_v7 = vpop.permute.xlu1 %3127 }
 0x3ff   : > { %v2553_v62 = vpop.f32.mrf.mxu3  ;;  %v2831_v52 = vpop.f32.mrf.mxu0  ;;  %5672 = vmatpush.bf16.msra.mxu1 %v6747_v41 }
 0x400   : > { %v2880_v59 = vadd.f32 %v2831_v52, %v2599_v35  ;;  %3522 = vmatmul.bf16.gmra.mxu1 %v3357_v21  ;;  %v2600_v6 = vadd.f32 %v2553_v62, %v2319_v46  ;;  %v7994_v35 = vld [vmem:[%s8612_s5] ss:$0 sm:$0xff]  ;;  %v3212_v21 = vld [vmem:[%s7157_s14 + $0x18] sm:$0xff] }
 0x401   : > { %v3595_v46 = vld [vmem:[#allocation2 + $0x8e] sm:$0xff]  ;;  %v3257_v38 = vadd.f32 %v7994_v35, %v3212_v21 }
 0x402   : > { %v2921_v53 = vmax.f32 %v2880_v59, 0.0 }
 0x404   : > { %v3167_v12 = vmul.f32 %v3113_v2, %v2921_v53  ;;  %v3876_v53 = vld [vmem:[#allocation2 + $0x8f] sm:$0xff] }
 0x405   : > { %v2274_v57 = vpop.f32.mrf.mxu2  ;;  %v7984_v9 = vpop.f32.mrf.mxu1  ;;  %v3336_v8 = vld [vmem:[#allocation2 + $0x135] sm:$0xff] }
 0x406   : > { %3208 = vst [vmem:[#allocation2 + $0x140] sm:$0xff] %v3167_v12  ;;  %v2320_v29 = vadd.f32 %v2274_v57, %v2039_v11  ;;  %v3594_v57 = vld [vmem:[#allocation2 + $0x86] sm:$0xff] }
 0x407   : > { %v2555_v28 = vpop.f32.mrf.mxu3  ;;  %v2834_v26 = vpop.f32.mrf.mxu0 }
 0x408   : > { %v2881_v34 = vadd.f32 %v2834_v26, %v2600_v6  ;;  %v2601_v19 = vadd.f32 %v2555_v28, %v2320_v29  ;;  %v3627_v28 = vpack.c.bf16 %v3595_v46, %v3594_v57  ;;  %v3908_v26 = vpack.c.bf16 %v3876_v53, %v3875_v17  ;;  %v4421_v57 = vld [vmem:[#allocation2 + $0x18] sm:$0xff] }
 0x40a   : > { %v2922_v60 = vmax.f32 %v2881_v34, 0.0  ;;  %3748 = vmatmul.bf16.gmra.mxu2 %v3626_v51  ;;  %4305 = vmatmul.bf16.gmra.mxu0 %v3907_v31  ;;  %v3537_v34 = vadd.f32 %v7894_v15, %v3257_v38 }
 0x40c   : > { %4029 = vmatmul.bf16.gmra.mxu3 %v3907_v31  ;;  %v3168_v45 = vmul.f32 %v3118_v50, %v2922_v60  ;;  %v3213_v31 = vld [vmem:[%s7157_s14 + $0x20] sm:$0xff] }
 0x40d   : > { %v2277_v47 = vpop.f32.mrf.mxu2  ;;  %v7988_v55 = vpop.f32.mrf.mxu1  ;;  %v3337_v36 = vld [vmem:[#allocation2 + $0x13d] sm:$0xff] }
 0x40e   : > { %3209 = vst [vmem:[#allocation2 + $0x148] sm:$0xff] %v3168_v45  ;;  %v3358_v48 = vpack.c.bf16 %v3337_v36, %v3336_v8  ;;  %v2321_v1 = vadd.f32 %v2277_v47, %v7820_v44  ;;  %v3258_v47 = vadd.f32 %v7994_v35, %v3213_v31 }
 0x40f   : > { %v2558_v43 = vpop.f32.mrf.mxu3  ;;  %v2836_v63 = vpop.f32.mrf.mxu0 }
 0x410   : > { %v2882_v58 = vadd.f32 %v2836_v63, %v2601_v19  ;;  %3527 = vmatmul.bf16.gmra.mxu1 %v3358_v48  ;;  %v2602_v2 = vadd.f32 %v2558_v43, %v2321_v1  ;;  %v3538_v36 = vadd.f32 %v7903_v49, %v3258_v47  ;;  %v3214_v19 = vld [vmem:[%s7157_s14 + $0x28] sm:$0xff] }
 0x411   : > { %v3597_v48 = vld [vmem:[#allocation2 + $0x9e] sm:$0xff]  ;;  %v3259_v41 = vadd.f32 %v7994_v35, %v3214_v19  ;;  %v3879_v19 = vld [vmem:[#allocation2 + $0xa7] sm:$0xff] }
 0x412   : > { %v2923_v27 = vmax.f32 %v2882_v58, 0.0  ;;  %v3878_v63 = vld [vmem:[#allocation2 + $0x9f] sm:$0xff] }
 0x413   : > { %v4422_v49 = vld [vmem:[#allocation2 + $0x20] sm:$0xff]  ;;  %v3539_v53 = vadd.f32 %v7907_v13, %v3259_v41  ;;  %v6746_v41 = vld [vmem:[#allocation8 + $0x230] sm:$0xff] }
 0x414   : > { %v3169_v62 = vmul.f32 %v3123_v14, %v2923_v27  ;;  %v3596_v27 = vld [vmem:[#allocation2 + $0x96] sm:$0xff]  ;;  %5673 = vmatpush.bf16.msra.mxu1 %v6746_v41 }
 0x415   : > { %v2279_v52 = vpop.f32.mrf.mxu2  ;;  %v7997_v59 = vpop.f32.mrf.mxu1  ;;  %v3338_v11 = vld [vmem:[#allocation2 + $0x145] sm:$0xff]  ;;  %v3877_v14 = vld [vmem:[#allocation2 + $0x97] sm:$0xff] }
 0x416   : > { %3210 = vst [vmem:[#allocation2 + $0x150] sm:$0xff] %v3169_v62  ;;  %v3359_v50 = vpack.c.bf16 %v3338_v11, %v3338_v11  ;;  %v3628_v52 = vpack.c.bf16 %v3597_v48, %v3596_v27  ;;  %v3909_v46 = vpack.c.bf16 %v3878_v63, %v3877_v14  ;;  %v6722_v11 = vld [vmem:[#allocation8 + $0x170] sm:$0xff] }
 0x417   : > { %v2560_v12 = vpop.f32.mrf.mxu3  ;;  %v2839_v44 = vpop.f32.mrf.mxu0  ;;  %4830 = vmatpush.bf16.msra.mxu2 %v6722_v11  ;;  %v3217_v27 = vld [vmem:[%s7157_s14 + $0x40] sm:$0xff] }
 0x418   : > { %v2883_v6 = vadd.f32 %v2839_v44, %v2602_v2  ;;  %v3215_v2 = vld [vmem:[%s7157_s14 + $0x30] sm:$0xff] }
 0x41a   : > { %v2924_v10 = vmax.f32 %v2883_v6, 0.0  ;;  %3753 = vmatmul.bf16.gmra.mxu2 %v3627_v28  ;;  %4310 = vmatmul.bf16.gmra.mxu0 %v3908_v26  ;;  %v4462_v6 = vpack.c.bf16 %v4422_v49, %v4421_v57 }
 0x41c   : > { %4034 = vmatmul.bf16.gmra.mxu3 %v3908_v26  ;;  %v3170_v51 = vmul.f32 %v3128_v7, %v2924_v10  ;;  %v3260_v26 = vadd.f32 %v7994_v35, %v3215_v2 }
 0x41d   : > { %v8002_v33 = vpop.f32.mrf.mxu1  ;;  %v3714_v32 = vpop.f32.mrf.mxu2 }
 0x41e   : > { %3211 = vst [vmem:[#allocation2 + $0x158] sm:$0xff] %v3170_v51  ;;  %v3818_v29 = vadd.f32 %v3714_v32, %v3537_v34  ;;  %v6730_v34 = vld [vmem:[#allocation8 + $0x1b0] sm:$0xff]  ;;  %v3540_v13 = vadd.f32 %v7916_v0, %v3260_v26  ;;  %v3216_v51 = vld [vmem:[%s7157_s14 + $0x38] sm:$0xff] }
 0x41f   : > { %v3995_v60 = vpop.f32.mrf.mxu3  ;;  %v2841_v45 = vpop.f32.mrf.mxu0  ;;  %5111 = vmatpush.bf16.msra.mxu3 %v6730_v34  ;;  %v3261_v47 = vadd.f32 %v7994_v35, %v3216_v51  ;;  %v4424_v0 = vld [vmem:[#allocation2 + $0x30] sm:$0xff]  ;;  %v3601_v26 = vld [vmem:[#allocation2 + $0xbe] sm:$0xff] }
 0x420   : > { %v4099_v8 = vadd.f32 %v3995_v60, %v3818_v29  ;;  %3532 = vmatmul.bf16.gmra.mxu1 %v3359_v50  ;;  %v3599_v29 = vld [vmem:[#allocation2 + $0xae] sm:$0xff] }
 0x421   : > { %v3880_v60 = vld [vmem:[#allocation2 + $0xaf] sm:$0xff] }
 0x425   : > { %v8007_v43 = vpop.f32.mrf.mxu1  ;;  %v3716_v15 = vpop.f32.mrf.mxu2 }
 0x426   : > { %v3819_v58 = vadd.f32 %v3716_v15, %v3538_v36  ;;  %v3598_v36 = vld [vmem:[#allocation2 + $0xa6] sm:$0xff] }
 0x427   : > { %v3997_v61 = vpop.f32.mrf.mxu3  ;;  %v4276_v1 = vpop.f32.mrf.mxu0  ;;  %v3629_v63 = vpack.c.bf16 %v3599_v29, %v3598_v36  ;;  %v3881_v29 = vld [vmem:[#allocation2 + $0xb7] sm:$0xff]  ;;  %v3219_v36 = vld [vmem:[%s7157_s14 + $0x50] sm:$0xff] }
 0x428   : > { %v4100_v62 = vadd.f32 %v3997_v61, %v3819_v58  ;;  %v8010_v21 = vadd.f32 %v4276_v1, %v4099_v8  ;;  %v3910_v58 = vpack.c.bf16 %v3880_v60, %v3879_v19  ;;  %v6738_v61 = vld [vmem:[#allocation8 + $0x1f0] sm:$0xff]  ;;  %v3541_v1 = vadd.f32 %v7920_v54, %v3261_v47 }
 0x429   : > { %5392 = vmatpush.bf16.msra.mxu0 %v6738_v61 }
 0x42a   : > { %3758 = vmatmul.bf16.gmra.mxu2 %v3628_v52  ;;  %4315 = vmatmul.bf16.gmra.mxu0 %v3909_v46  ;;  %v4423_v52 = vld [vmem:[#allocation2 + $0x28] sm:$0xff] }
 0x42c   : > { %4039 = vmatmul.bf16.gmra.mxu3 %v3909_v46 }
 0x42d   : > { %v8014_v12 = vpop.f32.mrf.mxu1  ;;  %v3719_v44 = vpop.f32.mrf.mxu2 }
 0x42e   : > { %v3820_v17 = vadd.f32 %v3719_v44, %v3539_v53  ;;  %v4463_v53 = vpack.c.bf16 %v4424_v0, %v4423_v52  ;;  %v3262_v44 = vadd.f32 %v7994_v35, %v3217_v27 }
 0x42f   : > { %v4000_v38 = vpop.f32.mrf.mxu3  ;;  %v4278_v28 = vpop.f32.mrf.mxu0 }
 0x430   : > { %v4101_v10 = vadd.f32 %v4000_v38, %v3820_v17  ;;  %v8017_v7 = vadd.f32 %v4278_v28, %v4100_v62  ;;  %4556 = vmatmul.bf16.vlgmr.msrb.gmra.mxu1 %v4462_v6  ;;  %v3542_v54 = vadd.f32 %v7927_v5, %v3262_v44  ;;  %v3218_v38 = vld [vmem:[%s7157_s14 + $0x48] sm:$0xff] }
 0x431   : > { %v4426_v5 = vld [vmem:[#allocation2 + $0x40] sm:$0xff] }
 0x435   : > { %v8021_v31 = vpop.f32.mrf.mxu1  ;;  %v3721_v32 = vpop.f32.mrf.mxu2 }
 0x436   : > { %v3821_v50 = vadd.f32 %v3721_v32, %v3540_v13  ;;  %v3263_v13 = vadd.f32 %v7994_v35, %v3218_v38  ;;  %v3600_v32 = vld [vmem:[#allocation2 + $0xb6] sm:$0xff] }
 0x437   : > { %v4002_v45 = vpop.f32.mrf.mxu3  ;;  %v4281_v8 = vpop.f32.mrf.mxu0 }
 0x438   : > { %v4102_v15 = vadd.f32 %v4002_v45, %v3821_v50  ;;  %v8024_v48 = vadd.f32 %v4281_v8, %v4101_v10  ;;  %v3882_v10 = vld [vmem:[#allocation2 + $0xbf] sm:$0xff]  ;;  %v3630_v45 = vpack.c.bf16 %v3601_v26, %v3600_v32  ;;  %v3543_v8 = vadd.f32 %v7931_v39, %v3263_v13  ;;  %v3883_v26 = vld [vmem:[#allocation2 + $0xc7] sm:$0xff]  ;;  %v6729_v32 = vld [vmem:[#allocation8 + $0x1a8] sm:$0xff] }
 0x439   : > { %v3911_v47 = vpack.c.bf16 %v3882_v10, %v3881_v29  ;;  %5112 = vmatpush.bf16.msra.mxu3 %v6729_v32 }
 0x43a   : > { %3763 = vmatmul.bf16.gmra.mxu2 %v3629_v63  ;;  %4320 = vmatmul.bf16.gmra.mxu0 %v3910_v58  ;;  %v4425_v63 = vld [vmem:[#allocation2 + $0x38] sm:$0xff] }
 0x43b   : > { %v4464_v61 = vpack.c.bf16 %v4426_v5, %v4425_v63  ;;  %v4427_v5 = vld [vmem:[#allocation2 + $0x48] sm:$0xff] }
 0x43c   : > { %4044 = vmatmul.bf16.gmra.mxu3 %v3910_v58 }
 0x43d   : > { %v8028_v14 = vpop.f32.mrf.mxu1  ;;  %v3724_v62 = vpop.f32.mrf.mxu2 }
 0x43e   : > { %v3822_v46 = vadd.f32 %v3724_v62, %v3541_v1  ;;  %v3264_v1 = vadd.f32 %v7994_v35, %v3219_v36 }
 0x43f   : > { %v4005_v49 = vpop.f32.mrf.mxu3  ;;  %v4283_v2 = vpop.f32.mrf.mxu0 }
 0x440   : > { %v4103_v57 = vadd.f32 %v4005_v49, %v3822_v46  ;;  %v8031_v17 = vadd.f32 %v4283_v2, %v4102_v15  ;;  %4561 = vmatmul.bf16.gmra.mxu1 %v4463_v53  ;;  %v3544_v52 = vadd.f32 %v7935_v22, %v3264_v1  ;;  %v3220_v46 = vld [vmem:[%s7157_s14 + $0x58] sm:$0xff] }
 0x441   : > { %v3603_v53 = vld [vmem:[#allocation2 + $0xce] sm:$0xff] }
 0x442   : > { %v3884_v2 = vld [vmem:[#allocation2 + $0xcf] sm:$0xff] }
 0x443   : > { %v3912_v13 = vpack.c.bf16 %v3884_v2, %v3883_v26  ;;  %v4428_v22 = vld [vmem:[#allocation2 + $0x50] sm:$0xff] }
 0x445   : > { %v8035_v6 = vpop.f32.mrf.mxu1  ;;  %v3726_v28 = vpop.f32.mrf.mxu2 }
 0x446   : > { %v3823_v11 = vadd.f32 %v3726_v28, %v3542_v54  ;;  %v3265_v54 = vadd.f32 %v7994_v35, %v3220_v46  ;;  %v3602_v28 = vld [vmem:[#allocation2 + $0xc6] sm:$0xff] }
 0x447   : > { %v4007_v34 = vpop.f32.mrf.mxu3  ;;  %v4286_v51 = vpop.f32.mrf.mxu0 }
 0x448   : > { %v4104_v60 = vadd.f32 %v4007_v34, %v3823_v11  ;;  %v8038_v50 = vadd.f32 %v4286_v51, %v4103_v57  ;;  %v3631_v34 = vpack.c.bf16 %v3603_v53, %v3602_v28  ;;  %v6721_v51 = vld [vmem:[#allocation8 + $0x168] sm:$0xff]  ;;  %v3545_v29 = vadd.f32 %v7939_v16, %v3265_v54  ;;  %v3886_v53 = vld [vmem:[#allocation2 + $0xdf] sm:$0xff] }
 0x449   : > { %4831 = vmatpush.bf16.msra.mxu2 %v6721_v51  ;;  %v6745_v16 = vld [vmem:[#allocation8 + $0x228] sm:$0xff]  ;;  %v3223_v51 = vld [vmem:[%s7157_s14 + $0x70] sm:$0xff] }
 0x44a   : > { %3768 = vmatmul.bf16.gmra.mxu2 %v3630_v45  ;;  %4325 = vmatmul.bf16.gmra.mxu0 %v3911_v47  ;;  %v3885_v28 = vld [vmem:[#allocation2 + $0xd7] sm:$0xff] }
 0x44b   : > { %5674 = vmatpush.bf16.msra.mxu1 %v6745_v16 }
 0x44c   : > { %4049 = vmatmul.bf16.gmra.mxu3 %v3911_v47 }
 0x44d   : > { %v8042_v19 = vpop.f32.mrf.mxu1  ;;  %v3729_v15 = vpop.f32.mrf.mxu2 }
 0x44e   : > { %v3824_v58 = vadd.f32 %v3729_v15, %v3543_v8  ;;  %v4465_v15 = vpack.c.bf16 %v4428_v22, %v4427_v5 }
 0x44f   : > { %v4010_v0 = vpop.f32.mrf.mxu3  ;;  %v4288_v41 = vpop.f32.mrf.mxu0 }
 0x450   : > { %v4105_v27 = vadd.f32 %v4010_v0, %v3824_v58  ;;  %v8045_v62 = vadd.f32 %v4288_v41, %v4104_v60  ;;  %4566 = vmatmul.bf16.gmra.mxu1 %v4464_v61  ;;  %v3221_v60 = vld [vmem:[%s7157_s14 + $0x60] sm:$0xff] }
 0x451   : > { %v3266_v58 = vadd.f32 %v7994_v35, %v3221_v60  ;;  %v6737_v41 = vld [vmem:[#allocation8 + $0x1e8] sm:$0xff]  ;;  %v4429_v60 = vld [vmem:[#allocation2 + $0x58] sm:$0xff] }
 0x452   : > { %5393 = vmatpush.bf16.msra.mxu0 %v6737_v41  ;;  %v3224_v41 = vld [vmem:[%s7157_s14 + $0x78] sm:$0xff] }
 0x453   : > { %v3546_v1 = vadd.f32 %v7942_v24, %v3266_v58  ;;  %v4430_v24 = vld [vmem:[#allocation2 + $0x60] sm:$0xff] }
 0x455   : > { %v8049_v49 = vpop.f32.mrf.mxu1  ;;  %v3731_v39 = vpop.f32.mrf.mxu2 }
 0x456   : > { %v3825_v44 = vadd.f32 %v3731_v39, %v3544_v52  ;;  %v3605_v39 = vld [vmem:[#allocation2 + $0xde] sm:$0xff] }
 0x457   : > { %v4012_v57 = vpop.f32.mrf.mxu3  ;;  %v4291_v38 = vpop.f32.mrf.mxu0 }
 0x458   : > { %v4106_v10 = vadd.f32 %v4012_v57, %v3825_v44  ;;  %v8052_v11 = vadd.f32 %v4291_v38, %v4105_v27  ;;  %v3222_v27 = vld [vmem:[%s7157_s14 + $0x68] sm:$0xff] }
 0x459   : > { %v3267_v57 = vadd.f32 %v7994_v35, %v3222_v27  ;;  %v3604_v38 = vld [vmem:[#allocation2 + $0xd6] sm:$0xff] }
 0x45a   : > { %3773 = vmatmul.bf16.gmra.mxu2 %v3631_v34  ;;  %4330 = vmatmul.bf16.gmra.mxu0 %v3912_v13  ;;  %v3632_v34 = vpack.c.bf16 %v3605_v39, %v3604_v38  ;;  %v3888_v27 = vld [vmem:[#allocation2 + $0xef] sm:$0xff] }
 0x45b   : > { %v3547_v22 = vadd.f32 %v7946_v37, %v3267_v57  ;;  %v3887_v57 = vld [vmem:[#allocation2 + $0xe7] sm:$0xff] }
 0x45c   : > { %4054 = vmatmul.bf16.gmra.mxu3 %v3912_v13  ;;  %v3913_v13 = vpack.c.bf16 %v3886_v53, %v3885_v28  ;;  %v3269_v53 = vadd.f32 %v7994_v35, %v3224_v41 }
 0x45d   : > { %v8056_v45 = vpop.f32.mrf.mxu1  ;;  %v3734_v47 = vpop.f32.mrf.mxu2 }
 0x45e   : > { %v3826_v8 = vadd.f32 %v3734_v47, %v3545_v29 }
 0x45f   : > { %v4015_v36 = vpop.f32.mrf.mxu3  ;;  %v4293_v63 = vpop.f32.mrf.mxu0 }
 0x460   : > { %v4107_v0 = vadd.f32 %v4015_v36, %v3826_v8  ;;  %v8059_v61 = vadd.f32 %v4293_v63, %v4106_v10  ;;  %4571 = vmatmul.bf16.gmra.mxu1 %v4465_v15  ;;  %v4466_v8 = vpack.c.bf16 %v4430_v24, %v4429_v60  ;;  %v3268_v15 = vadd.f32 %v7994_v35, %v3223_v51  ;;  %v4431_v51 = vld [vmem:[#allocation2 + $0x68] sm:$0xff] }
 0x465   : > { %v8063_v52 = vpop.f32.mrf.mxu1  ;;  %v3736_v46 = vpop.f32.mrf.mxu2 }
 0x466   : > { %v3827_v2 = vadd.f32 %v3736_v46, %v3546_v1  ;;  %v3607_v1 = vld [vmem:[#allocation2 + $0xee] sm:$0xff] }
 0x467   : > { %v4017_v44 = vpop.f32.mrf.mxu3  ;;  %v4296_v54 = vpop.f32.mrf.mxu0 }
 0x468   : > { %v4108_v26 = vadd.f32 %v4017_v44, %v3827_v2  ;;  %v8066_v10 = vadd.f32 %v4296_v54, %v4107_v0  ;;  %v3548_v0 = vadd.f32 %v7949_v25, %v3268_v15  ;;  %v3606_v44 = vld [vmem:[#allocation2 + $0xe6] sm:$0xff]  ;;  %v4432_v25 = vld [vmem:[#allocation2 + $0x70] sm:$0xff] }
 0x469   : > { %v3633_v28 = vpack.c.bf16 %v3607_v1, %v3606_v44  ;;  %v3609_v1 = vld [vmem:[#allocation2 + $0xfe] sm:$0xff]  ;;  %v3608_v44 = vld [vmem:[#allocation2 + $0xf6] sm:$0xff] }
 0x46a   : > { %3778 = vmatmul.bf16.gmra.mxu2 %v3632_v34  ;;  %4335 = vmatmul.bf16.gmra.mxu0 %v3913_v13  ;;  %v3549_v34 = vadd.f32 %v7953_v20, %v3269_v53 }
 0x46c   : > { %4059 = vmatmul.bf16.gmra.mxu3 %v3913_v13  ;;  %v3225_v13 = vld [vmem:[%s7157_s14 + $0x80] sm:$0xff] }
 0x46d   : > { %v8070_v32 = vpop.f32.mrf.mxu1  ;;  %v3739_v29 = vpop.f32.mrf.mxu2 }
 0x46e   : > { %v3828_v47 = vadd.f32 %v3739_v29, %v3547_v22 }
 0x46f   : > { %v4020_v5 = vpop.f32.mrf.mxu3  ;;  %v4298_v36 = vpop.f32.mrf.mxu0 }
 0x470   : > { %v4109_v63 = vadd.f32 %v4020_v5, %v3828_v47  ;;  %v8073_v58 = vadd.f32 %v4298_v36, %v4108_v26  ;;  %4576 = vmatmul.bf16.gmra.mxu1 %v4466_v8  ;;  %v3914_v26 = vpack.c.bf16 %v3888_v27, %v3887_v57  ;;  %v4467_v47 = vpack.c.bf16 %v4432_v25, %v4431_v51  ;;  %v3890_v27 = vld [vmem:[#allocation2 + $0xff] sm:$0xff]  ;;  %v3889_v57 = vld [vmem:[#allocation2 + $0xf7] sm:$0xff] }
 0x471   : > { %v3270_v8 = vadd.f32 %v7994_v35, %v3225_v13  ;;  %v3915_v25 = vpack.c.bf16 %v3890_v27, %v3889_v57  ;;  %v3228_v27 = vld [vmem:[%s7157_s14 + $0x98] sm:$0xff] }
 0x473   : > { %v3550_v20 = vadd.f32 %v7956_v18, %v3270_v8  ;;  %v6728_v18 = vld [vmem:[#allocation8 + $0x1a0] sm:$0xff] }
 0x474   : > { %5113 = vmatpush.bf16.msra.mxu3 %v6728_v18  ;;  %v3891_v18 = vld [vmem:[#allocation2 + $0x107] sm:$0xff] }
 0x475   : > { %v8077_v16 = vpop.f32.mrf.mxu1  ;;  %v3741_v37 = vpop.f32.mrf.mxu2 }
 0x476   : > { %v3829_v46 = vadd.f32 %v3741_v37, %v3548_v0  ;;  %v3226_v0 = vld [vmem:[%s7157_s14 + $0x88] sm:$0xff] }
 0x477   : > { %v4022_v39 = vpop.f32.mrf.mxu3  ;;  %v4301_v2 = vpop.f32.mrf.mxu0  ;;  %v3271_v53 = vadd.f32 %v7994_v35, %v3226_v0 }
 0x478   : > { %v4110_v54 = vadd.f32 %v4022_v39, %v3829_v46  ;;  %v8080_v38 = vadd.f32 %v4301_v2, %v4109_v63  ;;  %v6720_v63 = vld [vmem:[#allocation8 + $0x160] sm:$0xff] }
 0x479   : > { %4832 = vmatpush.bf16.msra.mxu2 %v6720_v63  ;;  %v3551_v13 = vadd.f32 %v7960_v3, %v3271_v53  ;;  %v3611_v53 = vld [vmem:[#allocation2 + $0x10e] sm:$0xff] }
 0x47a   : > { %3783 = vmatmul.bf16.gmra.mxu2 %v3633_v28  ;;  %4340 = vmatmul.bf16.gmra.mxu0 %v3914_v26 }
 0x47c   : > { %4064 = vmatmul.bf16.gmra.mxu3 %v3914_v26  ;;  %v3634_v26 = vpack.c.bf16 %v3609_v1, %v3608_v44  ;;  %v6744_v1 = vld [vmem:[#allocation8 + $0x220] sm:$0xff] }
 0x47d   : > { %v8084_v24 = vpop.f32.mrf.mxu1  ;;  %v3744_v22 = vpop.f32.mrf.mxu2  ;;  %5675 = vmatpush.bf16.msra.mxu1 %v6744_v1 }
 0x47e   : > { %v3830_v29 = vadd.f32 %v3744_v22, %v3549_v34  ;;  %v4434_v34 = vld [vmem:[#allocation2 + $0x80] sm:$0xff] }
 0x47f   : > { %v4025_v60 = vpop.f32.mrf.mxu3  ;;  %v4303_v5 = vpop.f32.mrf.mxu0  ;;  %v3227_v22 = vld [vmem:[%s7157_s14 + $0x90] sm:$0xff] }
 0x480   : > { %v4111_v36 = vadd.f32 %v4025_v60, %v3830_v29  ;;  %v8087_v15 = vadd.f32 %v4303_v5, %v4110_v54  ;;  %4581 = vmatmul.bf16.gmra.mxu1 %v4467_v47  ;;  %v4433_v60 = vld [vmem:[#allocation2 + $0x78] sm:$0xff]  ;;  %v3272_v63 = vadd.f32 %v7994_v35, %v3227_v22 }
 0x481   : > { %v4468_v8 = vpack.c.bf16 %v4434_v34, %v4433_v60 }
 0x482   : > { %v3552_v3 = vadd.f32 %v7963_v23, %v3272_v63  ;;  %v4436_v23 = vld [vmem:[#allocation2 + $0x90] sm:$0xff] }
 0x485   : > { %v8091_v41 = vpop.f32.mrf.mxu1  ;;  %v3746_v37 = vpop.f32.mrf.mxu2 }
 0x486   : > { %v3831_v46 = vadd.f32 %v3746_v37, %v3550_v20  ;;  %v6736_v37 = vld [vmem:[#allocation8 + $0x1e0] sm:$0xff] }
 0x487   : > { %v4027_v39 = vpop.f32.mrf.mxu3  ;;  %v4306_v2 = vpop.f32.mrf.mxu0  ;;  %5394 = vmatpush.bf16.msra.mxu0 %v6736_v37 }
 0x488   : > { %v4112_v54 = vadd.f32 %v4027_v39, %v3831_v46  ;;  %v8094_v28 = vadd.f32 %v4306_v2, %v4111_v36  ;;  %v3892_v2 = vld [vmem:[#allocation2 + $0x10f] sm:$0xff] }
 0x48a   : > { %3788 = vmatmul.bf16.gmra.mxu2 %v3634_v26  ;;  %4345 = vmatmul.bf16.gmra.mxu0 %v3915_v25  ;;  %v3273_v26 = vadd.f32 %v7994_v35, %v3228_v27 }
 0x48c   : > { %4069 = vmatmul.bf16.gmra.mxu3 %v3915_v25  ;;  %v3610_v25 = vld [vmem:[#allocation2 + $0x106] sm:$0xff]  ;;  %v3553_v60 = vadd.f32 %v7967_v40, %v3273_v26 }
 0x48d   : > { %v8098_v51 = vpop.f32.mrf.mxu1  ;;  %v3749_v29 = vpop.f32.mrf.mxu2  ;;  %v3635_v22 = vpack.c.bf16 %v3611_v53, %v3610_v25  ;;  %v3894_v26 = vld [vmem:[#allocation2 + $0x11f] sm:$0xff] }
 0x48e   : > { %v3832_v47 = vadd.f32 %v3749_v29, %v3551_v13  ;;  %v3916_v29 = vpack.c.bf16 %v3892_v2, %v3891_v18  ;;  %v3230_v2 = vld [vmem:[%s7157_s14 + $0xa8] sm:$0xff] }
 0x48f   : > { %v4030_v5 = vpop.f32.mrf.mxu3  ;;  %v4308_v36 = vpop.f32.mrf.mxu0  ;;  %v3275_v18 = vadd.f32 %v7994_v35, %v3230_v2 }
 0x490   : > { %v4113_v20 = vadd.f32 %v4030_v5, %v3832_v47  ;;  %v8101_v0 = vadd.f32 %v4308_v36, %v4112_v54  ;;  %4586 = vmatmul.bf16.gmra.mxu1 %v4468_v8  ;;  %v3229_v47 = vld [vmem:[%s7157_s14 + $0xa0] sm:$0xff]  ;;  %v4435_v36 = vld [vmem:[#allocation2 + $0x88] sm:$0xff] }
 0x491   : > { %v4469_v1 = vpack.c.bf16 %v4436_v23, %v4435_v36  ;;  %v3893_v23 = vld [vmem:[#allocation2 + $0x117] sm:$0xff]  ;;  %v3555_v36 = vadd.f32 %v7974_v56, %v3275_v18  ;;  %v6727_v56 = vld [vmem:[#allocation8 + $0x198] sm:$0xff] }
 0x492   : > { %5114 = vmatpush.bf16.msra.mxu3 %v6727_v56  ;;  %v3232_v18 = vld [vmem:[%s7157_s14 + $0xb8] sm:$0xff] }
 0x495   : > { %v8105_v46 = vpop.f32.mrf.mxu1  ;;  %v3751_v39 = vpop.f32.mrf.mxu2 }
 0x496   : > { %v3833_v44 = vadd.f32 %v3751_v39, %v3552_v3 }
 0x497   : > { %v4032_v57 = vpop.f32.mrf.mxu3  ;;  %v4311_v54 = vpop.f32.mrf.mxu0 }
 0x498   : > { %v4114_v34 = vadd.f32 %v4032_v57, %v3833_v44  ;;  %v8108_v13 = vadd.f32 %v4311_v54, %v4113_v20  ;;  %v3274_v20 = vadd.f32 %v7994_v35, %v3229_v47  ;;  %v3613_v57 = vld [vmem:[#allocation2 + $0x11e] sm:$0xff] }
 0x49a   : > { %3793 = vmatmul.bf16.gmra.mxu2 %v3635_v22  ;;  %4350 = vmatmul.bf16.gmra.mxu0 %v3916_v29  ;;  %v3554_v53 = vadd.f32 %v7970_v30, %v3274_v20  ;;  %v4438_v30 = vld [vmem:[#allocation2 + $0xa0] sm:$0xff] }
 0x49c   : > { %4074 = vmatmul.bf16.gmra.mxu3 %v3916_v29  ;;  %v3612_v29 = vld [vmem:[#allocation2 + $0x116] sm:$0xff] }
 0x49d   : > { %v8112_v5 = vpop.f32.mrf.mxu1  ;;  %v3754_v8 = vpop.f32.mrf.mxu2 }
 0x49e   : > { %v3834_v63 = vadd.f32 %v3754_v8, %v3553_v60  ;;  %v3917_v8 = vpack.c.bf16 %v3894_v26, %v3893_v23  ;;  %v3615_v23 = vld [vmem:[#allocation2 + $0x12e] sm:$0xff] }
 0x49f   : > { %v4035_v37 = vpop.f32.mrf.mxu3  ;;  %v4313_v3 = vpop.f32.mrf.mxu0 }
 0x4a0   : > { %v4115_v27 = vadd.f32 %v4035_v37, %v3834_v63  ;;  %v8115_v39 = vadd.f32 %v4313_v3, %v4114_v34  ;;  %4591 = vmatmul.bf16.gmra.mxu1 %v4469_v1  ;;  %v3636_v34 = vpack.c.bf16 %v3613_v57, %v3612_v29  ;;  %v3231_v63 = vld [vmem:[%s7157_s14 + $0xb0] sm:$0xff]  ;;  %v4437_v3 = vld [vmem:[#allocation2 + $0x98] sm:$0xff] }
 0x4a5   : > { %v3535_v44 = vpop.f32.mrf.mxu1  ;;  %v3756_v40 = vpop.f32.mrf.mxu2 }
 0x4a6   : > { %v3835_v54 = vadd.f32 %v3756_v40, %v3554_v53  ;;  %v3276_v40 = vadd.f32 %v7994_v35, %v3231_v63  ;;  %v3614_v63 = vld [vmem:[#allocation2 + $0x126] sm:$0xff] }
 0x4a7   : > { %v4037_v25 = vpop.f32.mrf.mxu3  ;;  %v4316_v22 = vpop.f32.mrf.mxu0 }
 0x4a8   : > { %v4116_v60 = vadd.f32 %v4037_v25, %v3835_v54  ;;  %v8120_v47 = vadd.f32 %v4316_v22, %v4115_v27  ;;  %v4470_v27 = vpack.c.bf16 %v4438_v30, %v4437_v3  ;;  %v6719_v54 = vld [vmem:[#allocation8 + $0x158] sm:$0xff]  ;;  %v3556_v25 = vadd.f32 %v7977_v42, %v3276_v40  ;;  %v3233_v40 = vld [vmem:[%s7157_s14 + $0xc0] sm:$0xff] }
 0x4a9   : > { %4833 = vmatpush.bf16.msra.mxu2 %v6719_v54  ;;  %v3637_v42 = vpack.c.bf16 %v3615_v23, %v3614_v63 }
 0x4aa   : > { %3798 = vmatmul.bf16.gmra.mxu2 %v3636_v34  ;;  %4355 = vmatmul.bf16.gmra.mxu0 %v3917_v8 }
 0x4ac   : > { %4079 = vmatmul.bf16.gmra.mxu3 %v3917_v8 }
 0x4ad   : > { %v3759_v37 = vpop.f32.mrf.mxu2  ;;  %v4557_v1 = vpop.f32.mrf.mxu1 }
 0x4ae   : > { %v3836_v20 = vadd.f32 %v3759_v37, %v3555_v36  ;;  %v8125_v2 = vadd.f32 %v4557_v1, %v8010_v21  ;;  %v3896_v21 = vld [vmem:[#allocation2 + $0x12f] sm:$0xff]  ;;  %v3895_v37 = vld [vmem:[#allocation2 + $0x127] sm:$0xff] }
 0x4af   : > { %v4040_v53 = vpop.f32.mrf.mxu3  ;;  %v4318_v44 = vpop.f32.mrf.mxu0 }
 0x4b0   : > { %v4117_v57 = vadd.f32 %v4040_v53, %v3836_v20  ;;  %v8128_v26 = vadd.f32 %v4318_v44, %v4116_v60  ;;  %4596 = vmatmul.bf16.gmra.mxu1 %v4470_v27  ;;  %v3277_v60 = vadd.f32 %v7994_v35, %v3232_v18  ;;  %v3918_v20 = vpack.c.bf16 %v3896_v21, %v3895_v37  ;;  %v6735_v53 = vld [vmem:[#allocation8 + $0x1d8] sm:$0xff]  ;;  %v4440_v44 = vld [vmem:[#allocation2 + $0xb0] sm:$0xff]  ;;  %v6718_v21 = vld [vmem:[#allocation8 + $0x150] sm:$0xff] }
 0x4b1   : > { %v6743_v27 = vld [vmem:[#allocation8 + $0x218] sm:$0xff]  ;;  %5395 = vmatpush.bf16.msra.mxu0 %v6735_v53  ;;  %4834 = vmatpush.bf16.msra.mxu2 %v6718_v21 }
 0x4b2   : > { %5676 = vmatpush.bf16.msra.mxu1 %v6743_v27  ;;  %v3617_v53 = vld [vmem:[#allocation2 + $0x13e] sm:$0xff] }
 0x4b3   : > { %v3898_v27 = vld [vmem:[#allocation2 + $0x13f] sm:$0xff] }
 0x4b5   : > { %v3761_v22 = vpop.f32.mrf.mxu2  ;;  %v4559_v29 = vpop.f32.mrf.mxu1 }
 0x4b6   : > { %v3837_v34 = vadd.f32 %v3761_v22, %v3556_v25  ;;  %v8133_v30 = vadd.f32 %v4559_v29, %v8017_v7  ;;  %v3557_v7 = vadd.f32 %v7981_v4, %v3277_v60  ;;  %v4439_v25 = vld [vmem:[#allocation2 + $0xa8] sm:$0xff]  ;;  %v6717_v4 = vld [vmem:[#allocation8 + $0x148] sm:$0xff] }
 0x4b7   : > { %v4042_v8 = vpop.f32.mrf.mxu3  ;;  %v4321_v36 = vpop.f32.mrf.mxu0  ;;  %v4471_v29 = vpack.c.bf16 %v4440_v44, %v4439_v25  ;;  %v6725_v60 = vld [vmem:[#allocation8 + $0x188] sm:$0xff]  ;;  %4835 = vmatpush.bf16.msra.mxu2 %v6717_v4 }
 0x4b8   : > { %v4118_v1 = vadd.f32 %v4042_v8, %v3837_v34  ;;  %v8136_v3 = vadd.f32 %v4321_v36, %v4117_v57  ;;  %v6726_v34 = vld [vmem:[#allocation8 + $0x190] sm:$0xff]  ;;  %v3278_v8 = vadd.f32 %v7994_v35, %v3233_v40 }
 0x4b9   : > { %5115 = vmatpush.bf16.msra.mxu3 %v6726_v34  ;;  %v3897_v25 = vld [vmem:[#allocation2 + $0x137] sm:$0xff] }
 0x4ba   : > { %3803 = vmatmul.bf16.gmra.mxu2 %v3637_v42  ;;  %4360 = vmatmul.bf16.gmra.mxu0 %v3918_v20  ;;  %v3558_v37 = vadd.f32 %v7984_v9, %v3278_v8  ;;  %v3234_v42 = vld [vmem:[%s7157_s14 + $0xc8] sm:$0xff]  ;;  %v6724_v9 = vld [vmem:[#allocation8 + $0x180] sm:$0xff]  ;;  %v3919_v21 = vpack.c.bf16 %v3898_v27, %v3897_v25 }
 0x4bb   : > { %v3235_v8 = vld [vmem:[%s7157_s14 + $0xd0] sm:$0xff]  ;;  %v6734_v27 = vld [vmem:[#allocation8 + $0x1d0] sm:$0xff] }
 0x4bc   : > { %4084 = vmatmul.bf16.gmra.mxu3 %v3918_v20  ;;  %5396 = vmatpush.bf16.msra.mxu0 %v6734_v27 }
 0x4bd   : > { %v3764_v54 = vpop.f32.mrf.mxu2  ;;  %v4562_v56 = vpop.f32.mrf.mxu1  ;;  %5116 = vmatpush.bf16.msra.mxu3 %v6725_v60 }
 0x4be   : > { %v3838_v18 = vadd.f32 %v3764_v54, %v3557_v7  ;;  %v8141_v22 = vadd.f32 %v4562_v56, %v8024_v48  ;;  %v3279_v54 = vadd.f32 %v7994_v35, %v3234_v42 }
 0x4bf   : > { %v4045_v57 = vpop.f32.mrf.mxu3  ;;  %v4323_v23 = vpop.f32.mrf.mxu0 }
 0x4c0   : > { %v4119_v36 = vadd.f32 %v4045_v57, %v3838_v18  ;;  %v8144_v63 = vadd.f32 %v4323_v23, %v4118_v1  ;;  %4601 = vmatmul.bf16.gmra.mxu1 %v4471_v29  ;;  %v3616_v1 = vld [vmem:[#allocation2 + $0x136] sm:$0xff]  ;;  %v6716_v18 = vld [vmem:[#allocation8 + $0x140] sm:$0xff]  ;;  %v3559_v34 = vadd.f32 %v7988_v55, %v3279_v54 }
 0x4c1   : > { %v3638_v23 = vpack.c.bf16 %v3617_v53, %v3616_v1  ;;  %4836 = vmatpush.bf16.msra.mxu2 %v6716_v18  ;;  %5117 = vmatpush.bf16.msra.mxu3 %v6724_v9  ;;  %v6733_v55 = vld [vmem:[#allocation8 + $0x1c8] sm:$0xff]  ;;  %v3618_v9 = vld [vmem:[#allocation2 + $0x146] sm:$0xff] }
 0x4c2   : > { %5397 = vmatpush.bf16.msra.mxu0 %v6733_v55  ;;  %v4443_v55 = vld [vmem:[#allocation2 + $0xc8] sm:$0xff] }
 0x4c5   : > { %v3766_v20 = vpop.f32.mrf.mxu2  ;;  %v4564_v48 = vpop.f32.mrf.mxu1 }
 0x4c6   : > { %v3839_v44 = vadd.f32 %v3766_v20, %v3558_v37  ;;  %v8149_v40 = vadd.f32 %v4564_v48, %v8031_v17  ;;  %v4442_v17 = vld [vmem:[#allocation2 + $0xc0] sm:$0xff]  ;;  %v4441_v37 = vld [vmem:[#allocation2 + $0xb8] sm:$0xff] }
 0x4c7   : > { %v4047_v7 = vpop.f32.mrf.mxu3  ;;  %v4326_v56 = vpop.f32.mrf.mxu0  ;;  %v4472_v48 = vpack.c.bf16 %v4442_v17, %v4441_v37 }
 0x4c8   : > { %v4120_v57 = vadd.f32 %v4047_v7, %v3839_v44  ;;  %v8152_v29 = vadd.f32 %v4326_v56, %v4119_v36  ;;  %v3280_v44 = vadd.f32 %v7994_v35, %v3235_v8  ;;  %v3236_v56 = vld [vmem:[%s7157_s14 + $0xd8] sm:$0xff] }
 0x4ca   : > { %3808 = vmatmul.bf16.gmra.mxu2 %v3638_v23  ;;  %4365 = vmatmul.bf16.gmra.mxu0 %v3919_v21  ;;  %v3560_v54 = vadd.f32 %v7997_v59, %v3280_v44  ;;  %v4179_v23 = vld [vmem:[#allocation2 + $0x14f] sm:$0xff]  ;;  %v3639_v59 = vpack.c.bf16 %v3618_v9, %v3618_v9 }
 0x4cc   : > { %4089 = vmatmul.bf16.gmra.mxu3 %v3919_v21 }
 0x4cd   : > { %v3769_v4 = vpop.f32.mrf.mxu2  ;;  %v4567_v60 = vpop.f32.mrf.mxu1 }
 0x4ce   : > { %v3840_v42 = vadd.f32 %v3769_v4, %v3559_v34  ;;  %v8157_v36 = vadd.f32 %v4567_v60, %v8038_v50  ;;  %v3899_v34 = vld [vmem:[#allocation2 + $0x147] sm:$0xff] }
 0x4cf   : > { %v4050_v20 = vpop.f32.mrf.mxu3  ;;  %v4328_v53 = vpop.f32.mrf.mxu0  ;;  %v6732_v4 = vld [vmem:[#allocation8 + $0x1c0] sm:$0xff] }
 0x4d0   : > { %v4121_v7 = vadd.f32 %v4050_v20, %v3840_v42  ;;  %v8160_v1 = vadd.f32 %v4328_v53, %v4120_v57  ;;  %4606 = vmatmul.bf16.gmra.mxu1 %v4472_v48  ;;  %v3281_v57 = vadd.f32 %v7994_v35, %v3236_v56  ;;  %v4200_v42 = vpack.c.bf16 %v4179_v23, %v3899_v34  ;;  %v4444_v48 = vld [vmem:[#allocation2 + $0xd0] sm:$0xff] }
 0x4d1   : > { %v3920_v20 = vpack.c.bf16 %v3899_v34, %v3899_v34  ;;  %5398 = vmatpush.bf16.msra.mxu0 %v6732_v4  ;;  %v3237_v53 = vld [vmem:[%s7157_s14 + $0xe0] sm:$0xff]  ;;  %v4703_v34 = vld [vmem:[#allocation2 + $0x21] sm:$0xff] }
 0x4d2   : > { %v3282_v9 = vadd.f32 %v7994_v35, %v3237_v53 }
 0x4d5   : > { %v3771_v25 = vpop.f32.mrf.mxu2  ;;  %v4569_v18 = vpop.f32.mrf.mxu1 }
 0x4d6   : > { %v3841_v50 = vadd.f32 %v3771_v25, %v3560_v54  ;;  %v8165_v17 = vadd.f32 %v4569_v18, %v8045_v62  ;;  %v3561_v62 = vadd.f32 %v8002_v33, %v3281_v57  ;;  %v4473_v25 = vpack.c.bf16 %v4444_v48, %v4443_v55  ;;  %v3238_v57 = vld [vmem:[%s7157_s14 + $0xe8] sm:$0xff] }
 0x4d7   : > { %v4052_v21 = vpop.f32.mrf.mxu3  ;;  %v4331_v8 = vpop.f32.mrf.mxu0  ;;  %v3562_v33 = vadd.f32 %v8007_v43, %v3282_v9  ;;  %v4702_v48 = vld [vmem:[#allocation2 + $0x19] sm:$0xff] }
 0x4d8   : > { %v4122_v60 = vadd.f32 %v4052_v21, %v3841_v50  ;;  %v8168_v37 = vadd.f32 %v4331_v8, %v4121_v7  ;;  %v6742_v21 = vld [vmem:[#allocation8 + $0x210] sm:$0xff]  ;;  %v4743_v53 = vpack.c.bf16 %v4703_v34, %v4702_v48  ;;  %v3240_v48 = vld [vmem:[%s7157_s14 + $0xf8] sm:$0xff] }
 0x4d9   : > { %5677 = vmatpush.bf16.msra.mxu1 %v6742_v21 }
 0x4da   : > { %3813 = vmatmul.bf16.gmra.mxu2 %v3639_v59  ;;  %4370 = vmatmul.bf16.gmra.mxu0 %v4200_v42  ;;  %v4180_v59 = vld [vmem:[#allocation2 + $0x157] sm:$0xff] }
 0x4db   : > { %v4201_v43 = vpack.c.bf16 %v4180_v59, %v4180_v59 }
 0x4dc   : > { %4094 = vmatmul.bf16.gmra.mxu3 %v3920_v20 }
 0x4dd   : > { %v3774_v27 = vpop.f32.mrf.mxu2  ;;  %v4572_v44 = vpop.f32.mrf.mxu1 }
 0x4de   : > { %v3842_v54 = vadd.f32 %v3774_v27, %v3561_v62  ;;  %v8173_v7 = vadd.f32 %v4572_v44, %v8052_v11  ;;  %v4984_v62 = vld [vmem:[#allocation2 + $0x31] sm:$0xff]  ;;  %v3283_v27 = vadd.f32 %v7994_v35, %v3238_v57 }
 0x4df   : > { %v4055_v56 = vpop.f32.mrf.mxu3  ;;  %v4333_v18 = vpop.f32.mrf.mxu0 }
 0x4e0   : > { %v4123_v23 = vadd.f32 %v4055_v56, %v3842_v54  ;;  %v8176_v50 = vadd.f32 %v4333_v18, %v4122_v60  ;;  %4611 = vmatmul.bf16.gmra.mxu1 %v4473_v25  ;;  %v4983_v54 = vld [vmem:[#allocation2 + $0x29] sm:$0xff]  ;;  %v4446_v25 = vld [vmem:[#allocation2 + $0xe0] sm:$0xff] }
 0x4e1   : > { %v5024_v56 = vpack.c.bf16 %v4984_v62, %v4983_v54  ;;  %v3239_v18 = vld [vmem:[%s7157_s14 + $0xf0] sm:$0xff] }
 0x4e2   : > { %v4986_v54 = vld [vmem:[#allocation2 + $0x41] sm:$0xff] }
 0x4e5   : > { %v3776_v8 = vpop.f32.mrf.mxu2  ;;  %v4574_v4 = vpop.f32.mrf.mxu1 }
 0x4e6   : > { %v3843_v42 = vadd.f32 %v3776_v8, %v3562_v33  ;;  %v8181_v20 = vadd.f32 %v4574_v4, %v8059_v61  ;;  %v3563_v61 = vadd.f32 %v8014_v12, %v3283_v27  ;;  %v4445_v33 = vld [vmem:[#allocation2 + $0xd8] sm:$0xff]  ;;  %v8194_v4 = vld [vmem:[%s8612_s5] ss:$0 sm:$0xff] }
 0x4e7   : > { %v4057_v11 = vpop.f32.mrf.mxu3  ;;  %v4336_v60 = vpop.f32.mrf.mxu0  ;;  %v3284_v59 = vadd.f32 %v8194_v4, %v3239_v18  ;;  %v3285_v18 = vadd.f32 %v8194_v4, %v3240_v48 }
 0x4e8   : > { %v4124_v44 = vadd.f32 %v4057_v11, %v3843_v42  ;;  %v8184_v55 = vadd.f32 %v4336_v60, %v4123_v23  ;;  %v4474_v23 = vpack.c.bf16 %v4446_v25, %v4445_v33 }
 0x4e9   : > { %v3564_v11 = vadd.f32 %v8021_v31, %v3284_v59  ;;  %v4447_v59 = vld [vmem:[#allocation2 + $0xe8] sm:$0xff] }
 0x4ea   : > { %4375 = vmatmul.bf16.gmra.mxu0 %v4201_v43  ;;  %4837 = vmatmul.bf16.vlgmr.msra.gmra.mxu2 %v4743_v53 }
 0x4ec   : > { %5118 = vmatmul.bf16.vlgmr.msra.gmra.mxu3 %v5024_v56 }
 0x4ed   : > { %v3779_v9 = vpop.f32.mrf.mxu2  ;;  %v4577_v21 = vpop.f32.mrf.mxu1 }
 0x4ee   : > { %v3844_v34 = vadd.f32 %v3779_v9, %v3563_v61  ;;  %v8189_v35 = vadd.f32 %v4577_v21, %v8066_v10  ;;  %v5265_v10 = vld [vmem:[#allocation2 + $0x32] sm:$0xff]  ;;  %v5264_v61 = vld [vmem:[#allocation2 + $0x2a] sm:$0xff] }
 0x4ef   : > { %v4060_v8 = vpop.f32.mrf.mxu3  ;;  %v4338_v57 = vpop.f32.mrf.mxu0  ;;  %v4985_v21 = vld [vmem:[#allocation2 + $0x39] sm:$0xff]  ;;  %v5305_v31 = vpack.c.bf16 %v5265_v10, %v5264_v61  ;;  %v5267_v61 = vld [vmem:[#allocation2 + $0x42] sm:$0xff] }
 0x4f0   : > { %v4125_v12 = vadd.f32 %v4060_v8, %v3844_v34  ;;  %v8197_v42 = vadd.f32 %v4338_v57, %v4124_v44  ;;  %4616 = vmatmul.bf16.gmra.mxu1 %v4474_v23  ;;  %v5025_v33 = vpack.c.bf16 %v4986_v54, %v4985_v21  ;;  %v4448_v34 = vld [vmem:[#allocation2 + $0xf0] sm:$0xff]  ;;  %v3565_v8 = vadd.f32 %v8028_v14, %v3285_v18  ;;  %v3242_v14 = vld [vmem:[%s7157_s14 + $0x108] sm:$0xff] }
 0x4f5   : > { %v3781_v62 = vpop.f32.mrf.mxu2  ;;  %v4579_v60 = vpop.f32.mrf.mxu1 }
 0x4f6   : > { %v3845_v53 = vadd.f32 %v3781_v62, %v3564_v11  ;;  %v8202_v43 = vadd.f32 %v4579_v60, %v8073_v58  ;;  %v3241_v58 = vld [vmem:[%s7157_s14 + $0x100] sm:$0xff] }
 0x4f7   : > { %v4062_v27 = vpop.f32.mrf.mxu3  ;;  %v4341_v25 = vpop.f32.mrf.mxu0  ;;  %v3286_v10 = vadd.f32 %v8194_v4, %v3241_v58  ;;  %v3287_v58 = vadd.f32 %v8194_v4, %v3242_v14 }
 0x4f8   : > { %v4126_v44 = vadd.f32 %v4062_v27, %v3845_v53  ;;  %v8205_v9 = vadd.f32 %v4341_v25, %v4125_v12  ;;  %v4475_v12 = vpack.c.bf16 %v4448_v34, %v4447_v59 }
 0x4f9   : > { %v3566_v27 = vadd.f32 %v8035_v6, %v3286_v10 }
 0x4fa   : > { %4842 = vmatmul.bf16.gmra.mxu2 %v5024_v56  ;;  %5399 = vmatmul.bf16.vlgmr.msra.gmra.mxu0 %v5305_v31 }
 0x4fc   : > { %5123 = vmatmul.bf16.gmra.mxu3 %v5025_v33 }
 0x4fd   : > { %v3784_v23 = vpop.f32.mrf.mxu2  ;;  %v4582_v57 = vpop.f32.mrf.mxu1 }
 0x4fe   : > { %v3846_v11 = vadd.f32 %v3784_v23, %v3565_v8  ;;  %v8210_v48 = vadd.f32 %v4582_v57, %v8080_v38  ;;  %v4988_v38 = vld [vmem:[#allocation2 + $0x51] sm:$0xff]  ;;  %v5266_v8 = vld [vmem:[#allocation2 + $0x3a] sm:$0xff]  ;;  %v4987_v57 = vld [vmem:[#allocation2 + $0x49] sm:$0xff] }
 0x4ff   : > { %v4065_v62 = vpop.f32.mrf.mxu3  ;;  %v4343_v60 = vpop.f32.mrf.mxu0  ;;  %v5306_v6 = vpack.c.bf16 %v5267_v61, %v5266_v8  ;;  %v5026_v59 = vpack.c.bf16 %v4988_v38, %v4987_v57  ;;  %v3244_v38 = vld [vmem:[%s7157_s14 + $0x118] sm:$0xff] }
 0x500   : > { %v4127_v56 = vadd.f32 %v4065_v62, %v3846_v11  ;;  %v8213_v53 = vadd.f32 %v4343_v60, %v4126_v44  ;;  %4621 = vmatmul.bf16.gmra.mxu1 %v4475_v12  ;;  %v4450_v11 = vld [vmem:[#allocation2 + $0x100] sm:$0xff]  ;;  %v6741_v62 = vld [vmem:[#allocation8 + $0x208] sm:$0xff] }
 0x501   : > { %v3243_v12 = vld [vmem:[%s7157_s14 + $0x110] sm:$0xff]  ;;  %5678 = vmatpush.bf16.msra.mxu1 %v6741_v62 }
 0x505   : > { %v3786_v54 = vpop.f32.mrf.mxu2  ;;  %v4584_v25 = vpop.f32.mrf.mxu1 }
 0x506   : > { %v3847_v18 = vadd.f32 %v3786_v54, %v3566_v27  ;;  %v8218_v31 = vadd.f32 %v4584_v25, %v8087_v15  ;;  %v3567_v15 = vadd.f32 %v8042_v19, %v3287_v58  ;;  %v4449_v27 = vld [vmem:[#allocation2 + $0xf8] sm:$0xff] }
 0x507   : > { %v4067_v21 = vpop.f32.mrf.mxu3  ;;  %v4346_v34 = vpop.f32.mrf.mxu0  ;;  %v4476_v25 = vpack.c.bf16 %v4450_v11, %v4449_v27  ;;  %v5269_v58 = vld [vmem:[#allocation2 + $0x52] sm:$0xff]  ;;  %v4990_v11 = vld [vmem:[#allocation2 + $0x61] sm:$0xff] }
 0x508   : > { %v4128_v44 = vadd.f32 %v4067_v21, %v3847_v18  ;;  %v8221_v23 = vadd.f32 %v4346_v34, %v4127_v56 }
 0x50a   : > { %4847 = vmatmul.bf16.gmra.mxu2 %v5025_v33  ;;  %5404 = vmatmul.bf16.gmra.mxu0 %v5306_v6  ;;  %v3288_v33 = vadd.f32 %v8194_v4, %v3243_v12  ;;  %v3289_v12 = vadd.f32 %v8194_v4, %v3244_v38 }
 0x50c   : > { %5128 = vmatmul.bf16.gmra.mxu3 %v5026_v59  ;;  %v3568_v19 = vadd.f32 %v8049_v49, %v3288_v33  ;;  %v4451_v33 = vld [vmem:[#allocation2 + $0x108] sm:$0xff] }
 0x50d   : > { %v3789_v60 = vpop.f32.mrf.mxu2  ;;  %v4587_v10 = vpop.f32.mrf.mxu1 }
 0x50e   : > { %v3848_v14 = vadd.f32 %v3789_v60, %v3567_v15  ;;  %v8226_v56 = vadd.f32 %v4587_v10, %v8094_v28  ;;  %v5268_v15 = vld [vmem:[#allocation2 + $0x4a] sm:$0xff]  ;;  %v4989_v10 = vld [vmem:[#allocation2 + $0x59] sm:$0xff] }
 0x50f   : > { %v4070_v54 = vpop.f32.mrf.mxu3  ;;  %v4348_v61 = vpop.f32.mrf.mxu0  ;;  %v5307_v49 = vpack.c.bf16 %v5269_v58, %v5268_v15  ;;  %v5027_v27 = vpack.c.bf16 %v4990_v11, %v4989_v10  ;;  %v5271_v15 = vld [vmem:[#allocation2 + $0x62] sm:$0xff] }
 0x510   : > { %v4129_v18 = vadd.f32 %v4070_v54, %v3848_v14  ;;  %v8229_v21 = vadd.f32 %v4348_v61, %v4128_v44  ;;  %4626 = vmatmul.bf16.gmra.mxu1 %v4476_v25  ;;  %v4452_v14 = vld [vmem:[#allocation2 + $0x110] sm:$0xff]  ;;  %v3569_v54 = vadd.f32 %v8056_v45, %v3289_v12  ;;  %v3246_v45 = vld [vmem:[%s7157_s14 + $0x128] sm:$0xff] }
 0x515   : > { %v3791_v34 = vpop.f32.mrf.mxu2  ;;  %v4589_v8 = vpop.f32.mrf.mxu1 }
 0x516   : > { %v3849_v57 = vadd.f32 %v3791_v34, %v3568_v19  ;;  %v8234_v28 = vadd.f32 %v4589_v8, %v8101_v0  ;;  %v3245_v0 = vld [vmem:[%s7157_s14 + $0x120] sm:$0xff] }
 0x517   : > { %v4072_v6 = vpop.f32.mrf.mxu3  ;;  %v4351_v62 = vpop.f32.mrf.mxu0  ;;  %v3290_v58 = vadd.f32 %v8194_v4, %v3245_v0  ;;  %v3291_v0 = vadd.f32 %v8194_v4, %v3246_v45 }
 0x518   : > { %v4130_v44 = vadd.f32 %v4072_v6, %v3849_v57  ;;  %v8237_v60 = vadd.f32 %v4351_v62, %v4129_v18  ;;  %v4477_v18 = vpack.c.bf16 %v4452_v14, %v4451_v33 }
 0x519   : > { %v3570_v6 = vadd.f32 %v8063_v52, %v3290_v58  ;;  %v4453_v58 = vld [vmem:[#allocation2 + $0x118] sm:$0xff] }
 0x51a   : > { %4852 = vmatmul.bf16.gmra.mxu2 %v5026_v59  ;;  %5409 = vmatmul.bf16.gmra.mxu0 %v5307_v49  ;;  %v4992_v49 = vld [vmem:[#allocation2 + $0x71] sm:$0xff] }
 0x51c   : > { %5133 = vmatmul.bf16.gmra.mxu3 %v5027_v27 }
 0x51d   : > { %v3794_v25 = vpop.f32.mrf.mxu2  ;;  %v4592_v61 = vpop.f32.mrf.mxu1 }
 0x51e   : > { %v3850_v19 = vadd.f32 %v3794_v25, %v3569_v54  ;;  %v8242_v38 = vadd.f32 %v4592_v61, %v8108_v13  ;;  %v5270_v54 = vld [vmem:[#allocation2 + $0x5a] sm:$0xff]  ;;  %v4991_v61 = vld [vmem:[#allocation2 + $0x69] sm:$0xff] }
 0x51f   : > { %v4075_v34 = vpop.f32.mrf.mxu3  ;;  %v4353_v8 = vpop.f32.mrf.mxu0  ;;  %v5308_v52 = vpack.c.bf16 %v5271_v15, %v5270_v54  ;;  %v5028_v33 = vpack.c.bf16 %v4992_v49, %v4991_v61  ;;  %v5273_v54 = vld [vmem:[#allocation2 + $0x72] sm:$0xff] }
 0x520   : > { %v4131_v59 = vadd.f32 %v4075_v34, %v3850_v19  ;;  %v8245_v57 = vadd.f32 %v4353_v8, %v4130_v44  ;;  %4631 = vmatmul.bf16.gmra.mxu1 %v4477_v18  ;;  %v4454_v19 = vld [vmem:[#allocation2 + $0x120] sm:$0xff]  ;;  %v3571_v34 = vadd.f32 %v8070_v32, %v3291_v0  ;;  %v3248_v32 = vld [vmem:[%s7157_s14 + $0x138] sm:$0xff] }
 0x525   : > { %v3796_v11 = vpop.f32.mrf.mxu2  ;;  %v4594_v62 = vpop.f32.mrf.mxu1 }
 0x526   : > { %v3851_v12 = vadd.f32 %v3796_v11, %v3570_v6  ;;  %v8250_v13 = vadd.f32 %v4594_v62, %v8115_v39  ;;  %v3247_v39 = vld [vmem:[%s7157_s14 + $0x130] sm:$0xff] }
 0x527   : > { %v4077_v10 = vpop.f32.mrf.mxu3  ;;  %v4356_v14 = vpop.f32.mrf.mxu0  ;;  %v3292_v15 = vadd.f32 %v8194_v4, %v3247_v39  ;;  %v3293_v39 = vadd.f32 %v8194_v4, %v3248_v32 }
 0x528   : > { %v4132_v44 = vadd.f32 %v4077_v10, %v3851_v12  ;;  %v8253_v25 = vadd.f32 %v4356_v14, %v4131_v59  ;;  %v4478_v59 = vpack.c.bf16 %v4454_v19, %v4453_v58  ;;  %v6740_v58 = vld [vmem:[#allocation8 + $0x200] sm:$0xff] }
 0x529   : > { %v3572_v10 = vadd.f32 %v8077_v16, %v3292_v15  ;;  %5679 = vmatpush.bf16.msra.mxu1 %v6740_v58  ;;  %v4996_v58 = vld [vmem:[#allocation2 + $0x91] sm:$0xff] }
 0x52a   : > { %4857 = vmatmul.bf16.gmra.mxu2 %v5027_v27  ;;  %5414 = vmatmul.bf16.gmra.mxu0 %v5308_v52 }
 0x52c   : > { %5138 = vmatmul.bf16.gmra.mxu3 %v5028_v33 }
 0x52d   : > { %v3799_v18 = vpop.f32.mrf.mxu2  ;;  %v4597_v8 = vpop.f32.mrf.mxu1 }
 0x52e   : > { %v3852_v6 = vadd.f32 %v3799_v18, %v3571_v34  ;;  %v8258_v45 = vadd.f32 %v4597_v8, %v8120_v47  ;;  %v4994_v47 = vld [vmem:[#allocation2 + $0x81] sm:$0xff]  ;;  %v5272_v34 = vld [vmem:[#allocation2 + $0x6a] sm:$0xff]  ;;  %v4993_v8 = vld [vmem:[#allocation2 + $0x79] sm:$0xff] }
 0x52f   : > { %v4080_v11 = vpop.f32.mrf.mxu3  ;;  %v4358_v62 = vpop.f32.mrf.mxu0  ;;  %v5309_v16 = vpack.c.bf16 %v5273_v54, %v5272_v34 }
 0x530   : > { %v4133_v27 = vadd.f32 %v4080_v11, %v3852_v6  ;;  %v8261_v12 = vadd.f32 %v4358_v62, %v4132_v44  ;;  %4636 = vmatmul.bf16.gmra.mxu1 %v4478_v59  ;;  %v5029_v6 = vpack.c.bf16 %v4994_v47, %v4993_v8  ;;  %v4456_v11 = vld [vmem:[#allocation2 + $0x130] sm:$0xff] }
 0x531   : > { %v3249_v59 = vld [vmem:[%s7157_s14 + $0x140] sm:$0xff] }
 0x535   : > { %v3801_v49 = vpop.f32.mrf.mxu2  ;;  %v4599_v14 = vpop.f32.mrf.mxu1 }
 0x536   : > { %v3853_v0 = vadd.f32 %v3801_v49, %v3572_v10  ;;  %v8266_v52 = vadd.f32 %v4599_v14, %v8128_v26  ;;  %v3573_v26 = vadd.f32 %v8084_v24, %v3293_v39  ;;  %v4455_v10 = vld [vmem:[#allocation2 + $0x128] sm:$0xff]  ;;  %v3250_v24 = vld [vmem:[%s7157_s14 + $0x148] sm:$0xff] }
 0x537   : > { %v4082_v61 = vpop.f32.mrf.mxu3  ;;  %v4361_v19 = vpop.f32.mrf.mxu0  ;;  %v4479_v14 = vpack.c.bf16 %v4456_v11, %v4455_v10  ;;  %v5275_v39 = vld [vmem:[#allocation2 + $0x82] sm:$0xff] }
 0x538   : > { %v4134_v44 = vadd.f32 %v4082_v61, %v3853_v0  ;;  %v8269_v18 = vadd.f32 %v4361_v19, %v4133_v27 }
 0x53a   : > { %4862 = vmatmul.bf16.gmra.mxu2 %v5028_v33  ;;  %5419 = vmatmul.bf16.gmra.mxu0 %v5309_v16  ;;  %v3294_v33 = vadd.f32 %v8194_v4, %v3249_v59  ;;  %v3295_v59 = vadd.f32 %v8194_v4, %v3250_v24 }
 0x53c   : > { %5143 = vmatmul.bf16.gmra.mxu3 %v5029_v6  ;;  %v3574_v47 = vadd.f32 %v8091_v41, %v3294_v33  ;;  %v4457_v33 = vld [vmem:[#allocation2 + $0x138] sm:$0xff] }
 0x53d   : > { %v3804_v62 = vpop.f32.mrf.mxu2  ;;  %v4602_v15 = vpop.f32.mrf.mxu1 }
 0x53e   : > { %v3854_v32 = vadd.f32 %v3804_v62, %v3573_v26  ;;  %v8274_v27 = vadd.f32 %v4602_v15, %v8136_v3  ;;  %v5274_v26 = vld [vmem:[#allocation2 + $0x7a] sm:$0xff]  ;;  %v4995_v15 = vld [vmem:[#allocation2 + $0x89] sm:$0xff] }
 0x53f   : > { %v4085_v49 = vpop.f32.mrf.mxu3  ;;  %v4363_v54 = vpop.f32.mrf.mxu0  ;;  %v5310_v41 = vpack.c.bf16 %v5275_v39, %v5274_v26  ;;  %v5030_v10 = vpack.c.bf16 %v4996_v58, %v4995_v15  ;;  %v5277_v26 = vld [vmem:[#allocation2 + $0x92] sm:$0xff] }
 0x540   : > { %v4135_v0 = vadd.f32 %v4085_v49, %v3854_v32  ;;  %v8277_v61 = vadd.f32 %v4363_v54, %v4134_v44  ;;  %4641 = vmatmul.bf16.gmra.mxu1 %v4479_v14  ;;  %v4458_v32 = vld [vmem:[#allocation2 + $0x140] sm:$0xff]  ;;  %v3575_v49 = vadd.f32 %v8098_v51, %v3295_v59  ;;  %v3252_v51 = vld [vmem:[%s7157_s14 + $0x158] sm:$0xff] }
 0x545   : > { %v3806_v19 = vpop.f32.mrf.mxu2  ;;  %v4604_v34 = vpop.f32.mrf.mxu1 }
 0x546   : > { %v3855_v8 = vadd.f32 %v3806_v19, %v3574_v47  ;;  %v8282_v3 = vadd.f32 %v4604_v34, %v8144_v63  ;;  %v3251_v63 = vld [vmem:[%s7157_s14 + $0x150] sm:$0xff]  ;;  %s6767_s14 = smul.u32 328, %s7153_s2 }
 0x547   : > { %v4087_v16 = vpop.f32.mrf.mxu3  ;;  %v4366_v11 = vpop.f32.mrf.mxu0  ;;  %v3296_v39 = vadd.f32 %v8194_v4, %v3251_v63  ;;  %v3297_v63 = vadd.f32 %v8194_v4, %v3252_v51 }
 0x548   : > { %v4136_v44 = vadd.f32 %v4087_v16, %v3855_v8  ;;  %v8285_v62 = vadd.f32 %v4366_v11, %v4135_v0  ;;  %v4480_v0 = vpack.c.bf16 %v4458_v32, %v4457_v33  ;;  %s8422_s4 = scalar_lea.vmem [#allocation9], %s6767_s14 }
 0x549   : > { %v3576_v16 = vadd.f32 %v8105_v46, %v3296_v39  ;;  %s5921_s15 = sshll.u32 %s8422_s4, 4  ;;  %s5922_s15 = int_to_ptr.vmem [resolvable:$true] %s5921_s15 }
 0x54a   : > { %4867 = vmatmul.bf16.gmra.mxu2 %v5029_v6  ;;  %5424 = vmatmul.bf16.gmra.mxu0 %v5310_v41 }
 0x54c   : > { %5148 = vmatmul.bf16.gmra.mxu3 %v5030_v10 }
 0x54d   : > { %v3809_v14 = vpop.f32.mrf.mxu2  ;;  %v4607_v54 = vpop.f32.mrf.mxu1 }
 0x54e   : > { %v3856_v47 = vadd.f32 %v3809_v14, %v3575_v49  ;;  %v8290_v24 = vadd.f32 %v4607_v54, %v8152_v29  ;;  %v4998_v29 = vld [vmem:[#allocation2 + $0xa1] sm:$0xff]  ;;  %v5276_v49 = vld [vmem:[#allocation2 + $0x8a] sm:$0xff]  ;;  %v4997_v54 = vld [vmem:[#allocation2 + $0x99] sm:$0xff] }
 0x54f   : > { %v4090_v19 = vpop.f32.mrf.mxu3  ;;  %v4368_v34 = vpop.f32.mrf.mxu0  ;;  %v5311_v33 = vpack.c.bf16 %v5277_v26, %v5276_v49  ;;  %v5031_v46 = vpack.c.bf16 %v4998_v29, %v4997_v54  ;;  %v5000_v29 = vld [vmem:[#allocation2 + $0xb1] sm:$0xff]  ;;  %v5278_v49 = vld [vmem:[#allocation2 + $0x9a] sm:$0xff] }
 0x550   : > { %v4137_v6 = vadd.f32 %v4090_v19, %v3856_v47  ;;  %v8293_v8 = vadd.f32 %v4368_v34, %v4136_v44  ;;  %4646 = vmatmul.bf16.gmra.mxu1 %v4480_v0  ;;  %v4460_v47 = vld [vmem:[#allocation2 + $0x150] sm:$0xff]  ;;  %v3577_v19 = vadd.f32 %v8112_v5, %v3297_v63  ;;  %v4459_v34 = vld [vmem:[#allocation2 + $0x148] sm:$0xff] }
 0x551   : > { %v4481_v4 = vpack.c.bf16 %v4460_v47, %v4459_v34 }
 0x555   : > { %v3811_v58 = vpop.f32.mrf.mxu2  ;;  %v4609_v11 = vpop.f32.mrf.mxu1 }
 0x556   : > { %v3857_v59 = vadd.f32 %v3811_v58, %v3576_v16  ;;  %v8298_v41 = vadd.f32 %v4609_v11, %v8160_v1 }
 0x557   : > { %v4092_v15 = vpop.f32.mrf.mxu3  ;;  %v4371_v32 = vpop.f32.mrf.mxu0 }
 0x558   : > { %v4138_v14 = vadd.f32 %v4092_v15, %v3857_v59  ;;  %v8301_v44 = vadd.f32 %v4371_v32, %v4137_v6  ;;  %v5279_v59 = vld [vmem:[#allocation2 + $0xa2] sm:$0xff] }
 0x559   : > { %v5312_v54 = vpack.c.bf16 %v5279_v59, %v5278_v49  ;;  %v5002_v59 = vld [vmem:[#allocation2 + $0xc1] sm:$0xff] }
 0x55a   : > { %4872 = vmatmul.bf16.gmra.mxu2 %v5030_v10  ;;  %5429 = vmatmul.bf16.gmra.mxu0 %v5311_v33 }
 0x55c   : > { %5153 = vmatmul.bf16.gmra.mxu3 %v5031_v46 }
 0x55d   : > { %v3814_v0 = vpop.f32.mrf.mxu2  ;;  %v4612_v1 = vpop.f32.mrf.mxu1 }
 0x55e   : > { %v3858_v39 = vadd.f32 %v3814_v0, %v3577_v19  ;;  %v8305_v58 = vadd.f32 %v4612_v1, %v8168_v37  ;;  %v4999_v37 = vld [vmem:[#allocation2 + $0xa9] sm:$0xff] }
 0x55f   : > { %v4095_v16 = vpop.f32.mrf.mxu3  ;;  %v4373_v6 = vpop.f32.mrf.mxu0  ;;  %v5032_v33 = vpack.c.bf16 %v5000_v29, %v4999_v37 }
 0x560   : > { %v4139_v51 = vadd.f32 %v4095_v16, %v3858_v39  ;;  %v8307_v11 = vadd.f32 %v4373_v6, %v4138_v14  ;;  %4651 = vmatmul.bf16.gmra.mxu1 %v4481_v4  ;;  %v4461_v14 = vld [vmem:[#allocation2 + $0x158] sm:$0xff] }
 0x561   : > { %v4482_v34 = vpack.c.bf16 %v4461_v14, %v4461_v14 }
 0x565   : > { %v3816_v10 = vpop.f32.mrf.mxu2  ;;  %v4614_v26 = vpop.f32.mrf.mxu1 }
 0x566   : > { %v8310_v5 = vadd.f32 %v4614_v26, %v8176_v50 }
 0x567   : > { %v4097_v15 = vpop.f32.mrf.mxu3  ;;  %v4376_v32 = vpop.f32.mrf.mxu0 }
 0x568   : > { %v8312_v63 = vadd.f32 %v4376_v32, %v4139_v51  ;;  %v5281_v51 = vld [vmem:[#allocation2 + $0xb2] sm:$0xff] }
 0x56a   : > { %4877 = vmatmul.bf16.gmra.mxu2 %v5031_v46  ;;  %5434 = vmatmul.bf16.gmra.mxu0 %v5312_v54  ;;  %v5546_v54 = vld [vmem:[#allocation2 + $0x33] sm:$0xff] }
 0x56c   : > { %5158 = vmatmul.bf16.gmra.mxu3 %v5032_v33 }
 0x56d   : > { %v4617_v47 = vpop.f32.mrf.mxu1  ;;  %v4838_v19 = vpop.f32.mrf.mxu2 }
 0x56e   : > { %v8315_v0 = vadd.f32 %v4617_v47, %v8184_v55  ;;  %v4942_v50 = vadd.f32 %v4838_v19, %v8125_v2  ;;  %v5280_v55 = vld [vmem:[#allocation2 + $0xaa] sm:$0xff]  ;;  %v5001_v2 = vld [vmem:[#allocation2 + $0xb9] sm:$0xff] }
 0x56f   : > { %v5119_v1 = vpop.f32.mrf.mxu3  ;;  %v4378_v39 = vpop.f32.mrf.mxu0  ;;  %v5313_v49 = vpack.c.bf16 %v5281_v51, %v5280_v55  ;;  %v5033_v37 = vpack.c.bf16 %v5002_v59, %v5001_v2  ;;  %v5003_v2 = vld [vmem:[#allocation2 + $0xc9] sm:$0xff] }
 0x570   : > { %v5223_v16 = vadd.f32 %v5119_v1, %v4942_v50  ;;  %4656 = vmatmul.bf16.gmra.mxu1 %v4482_v34 }
 0x575   : > { %v4619_v4 = vpop.f32.mrf.mxu1  ;;  %v4840_v6 = vpop.f32.mrf.mxu2 }
 0x576   : > { %v8319_v46 = vadd.f32 %v4619_v4, %v8197_v42  ;;  %v4943_v10 = vadd.f32 %v4840_v6, %v8133_v30  ;;  %v5545_v42 = vld [vmem:[#allocation2 + $0x2b] sm:$0xff]  ;;  %v5283_v6 = vld [vmem:[#allocation2 + $0xc2] sm:$0xff] }
 0x577   : > { %v5121_v26 = vpop.f32.mrf.mxu3  ;;  %v5400_v15 = vpop.f32.mrf.mxu0  ;;  %v5586_v1 = vpack.c.bf16 %v5546_v54, %v5545_v42  ;;  %v5548_v54 = vld [vmem:[#allocation2 + $0x43] sm:$0xff] }
 0x578   : > { %v5224_v29 = vadd.f32 %v5121_v26, %v4943_v10  ;;  %v8322_v32 = vadd.f32 %v5400_v15, %v5223_v16  ;;  %v5282_v15 = vld [vmem:[#allocation2 + $0xba] sm:$0xff] }
 0x57a   : > { %4882 = vmatmul.bf16.gmra.mxu2 %v5032_v33  ;;  %5439 = vmatmul.bf16.gmra.mxu0 %v5313_v49  ;;  %v5314_v49 = vpack.c.bf16 %v5283_v6, %v5282_v15 }
 0x57c   : > { %5163 = vmatmul.bf16.gmra.mxu3 %v5033_v37 }
 0x57d   : > { %v4622_v14 = vpop.f32.mrf.mxu1  ;;  %v4843_v47 = vpop.f32.mrf.mxu2 }
 0x57e   : > { %v8325_v19 = vadd.f32 %v4622_v14, %v8205_v9  ;;  %v4944_v30 = vadd.f32 %v4843_v47, %v8141_v22  ;;  %v5004_v9 = vld [vmem:[#allocation2 + $0xd1] sm:$0xff] }
 0x57f   : > { %v5124_v50 = vpop.f32.mrf.mxu3  ;;  %v5402_v34 = vpop.f32.mrf.mxu0 }
 0x580   : > { %v5225_v39 = vadd.f32 %v5124_v50, %v4944_v30  ;;  %v8328_v16 = vadd.f32 %v5402_v34, %v5224_v29  ;;  %5680 = vmatmul.bf16.vlgmr.msra.gmra.mxu1 %v5586_v1  ;;  %v5034_v29 = vpack.c.bf16 %v5004_v9, %v5003_v2  ;;  %v5005_v2 = vld [vmem:[#allocation2 + $0xd9] sm:$0xff] }
 0x585   : > { %v4624_v4 = vpop.f32.mrf.mxu1  ;;  %v4845_v33 = vpop.f32.mrf.mxu2 }
 0x586   : > { %v8331_v51 = vadd.f32 %v4624_v4, %v8213_v53  ;;  %v4945_v10 = vadd.f32 %v4845_v33, %v8149_v40  ;;  %v5547_v53 = vld [vmem:[#allocation2 + $0x3b] sm:$0xff]  ;;  %v5285_v33 = vld [vmem:[#allocation2 + $0xd2] sm:$0xff] }
 0x587   : > { %v5126_v26 = vpop.f32.mrf.mxu3  ;;  %v5405_v59 = vpop.f32.mrf.mxu0  ;;  %v5587_v50 = vpack.c.bf16 %v5548_v54, %v5547_v53  ;;  %v5550_v54 = vld [vmem:[#allocation2 + $0x53] sm:$0xff] }
 0x588   : > { %v5226_v22 = vadd.f32 %v5126_v26, %v4945_v10  ;;  %v8334_v55 = vadd.f32 %v5405_v59, %v5225_v39  ;;  %v5284_v59 = vld [vmem:[#allocation2 + $0xca] sm:$0xff] }
 0x58a   : > { %4887 = vmatmul.bf16.gmra.mxu2 %v5033_v37  ;;  %5444 = vmatmul.bf16.gmra.mxu0 %v5314_v49  ;;  %v5315_v49 = vpack.c.bf16 %v5285_v33, %v5284_v59 }
 0x58c   : > { %5168 = vmatmul.bf16.gmra.mxu3 %v5034_v29 }
 0x58d   : > { %v4627_v14 = vpop.f32.mrf.mxu1  ;;  %v4848_v47 = vpop.f32.mrf.mxu2 }
 0x58e   : > { %v8337_v42 = vadd.f32 %v4627_v14, %v8221_v23  ;;  %v4946_v40 = vadd.f32 %v4848_v47, %v8157_v36  ;;  %v5006_v23 = vld [vmem:[#allocation2 + $0xe1] sm:$0xff] }
 0x58f   : > { %v5129_v30 = vpop.f32.mrf.mxu3  ;;  %v5407_v1 = vpop.f32.mrf.mxu0 }
 0x590   : > { %v5227_v34 = vadd.f32 %v5129_v30, %v4946_v40  ;;  %v8340_v39 = vadd.f32 %v5407_v1, %v5226_v22  ;;  %5685 = vmatmul.bf16.gmra.mxu1 %v5587_v50  ;;  %v5035_v22 = vpack.c.bf16 %v5006_v23, %v5005_v2  ;;  %v5007_v2 = vld [vmem:[#allocation2 + $0xe9] sm:$0xff] }
 0x595   : > { %v4629_v4 = vpop.f32.mrf.mxu1  ;;  %v4850_v37 = vpop.f32.mrf.mxu2 }
 0x596   : > { %v8343_v6 = vadd.f32 %v4629_v4, %v8229_v21  ;;  %v4947_v10 = vadd.f32 %v4850_v37, %v8165_v17  ;;  %v5549_v21 = vld [vmem:[#allocation2 + $0x4b] sm:$0xff]  ;;  %v5287_v37 = vld [vmem:[#allocation2 + $0xe2] sm:$0xff] }
 0x597   : > { %v5131_v26 = vpop.f32.mrf.mxu3  ;;  %v5410_v9 = vpop.f32.mrf.mxu0  ;;  %v5588_v30 = vpack.c.bf16 %v5550_v54, %v5549_v21  ;;  %v5552_v54 = vld [vmem:[#allocation2 + $0x63] sm:$0xff] }
 0x598   : > { %v5228_v36 = vadd.f32 %v5131_v26, %v4947_v10  ;;  %v8346_v15 = vadd.f32 %v5410_v9, %v5227_v34  ;;  %v5286_v9 = vld [vmem:[#allocation2 + $0xda] sm:$0xff] }
 0x59a   : > { %4892 = vmatmul.bf16.gmra.mxu2 %v5034_v29  ;;  %5449 = vmatmul.bf16.gmra.mxu0 %v5315_v49  ;;  %v5316_v49 = vpack.c.bf16 %v5287_v37, %v5286_v9 }
 0x59c   : > { %5173 = vmatmul.bf16.gmra.mxu3 %v5035_v22 }
 0x59d   : > { %v4632_v14 = vpop.f32.mrf.mxu1  ;;  %v4853_v47 = vpop.f32.mrf.mxu2 }
 0x59e   : > { %v8349_v53 = vadd.f32 %v4632_v14, %v8237_v60  ;;  %v4948_v17 = vadd.f32 %v4853_v47, %v8173_v7  ;;  %v5008_v60 = vld [vmem:[#allocation2 + $0xf1] sm:$0xff] }
 0x59f   : > { %v5134_v40 = vpop.f32.mrf.mxu3  ;;  %v5412_v50 = vpop.f32.mrf.mxu0 }
 0x5a0   : > { %v5229_v1 = vadd.f32 %v5134_v40, %v4948_v17  ;;  %v8352_v34 = vadd.f32 %v5412_v50, %v5228_v36  ;;  %5690 = vmatmul.bf16.gmra.mxu1 %v5588_v30  ;;  %v5036_v36 = vpack.c.bf16 %v5008_v60, %v5007_v2  ;;  %v5009_v2 = vld [vmem:[#allocation2 + $0xf9] sm:$0xff] }
 0x5a5   : > { %v4634_v4 = vpop.f32.mrf.mxu1  ;;  %v4855_v29 = vpop.f32.mrf.mxu2 }
 0x5a6   : > { %v8355_v33 = vadd.f32 %v4634_v4, %v8245_v57  ;;  %v4949_v10 = vadd.f32 %v4855_v29, %v8181_v20  ;;  %v5551_v57 = vld [vmem:[#allocation2 + $0x5b] sm:$0xff]  ;;  %v5289_v29 = vld [vmem:[#allocation2 + $0xf2] sm:$0xff] }
 0x5a7   : > { %v5136_v26 = vpop.f32.mrf.mxu3  ;;  %v5415_v23 = vpop.f32.mrf.mxu0  ;;  %v5589_v40 = vpack.c.bf16 %v5552_v54, %v5551_v57  ;;  %v5554_v54 = vld [vmem:[#allocation2 + $0x73] sm:$0xff] }
 0x5a8   : > { %v5230_v7 = vadd.f32 %v5136_v26, %v4949_v10  ;;  %v8358_v59 = vadd.f32 %v5415_v23, %v5229_v1  ;;  %v5288_v23 = vld [vmem:[#allocation2 + $0xea] sm:$0xff] }
 0x5aa   : > { %4897 = vmatmul.bf16.gmra.mxu2 %v5035_v22  ;;  %5454 = vmatmul.bf16.gmra.mxu0 %v5316_v49  ;;  %v5317_v49 = vpack.c.bf16 %v5289_v29, %v5288_v23 }
 0x5ac   : > { %5178 = vmatmul.bf16.gmra.mxu3 %v5036_v36 }
 0x5ad   : > { %v4637_v14 = vpop.f32.mrf.mxu1  ;;  %v4858_v47 = vpop.f32.mrf.mxu2 }
 0x5ae   : > { %v8361_v21 = vadd.f32 %v4637_v14, %v8253_v25  ;;  %v4950_v20 = vadd.f32 %v4858_v47, %v8189_v35  ;;  %v5010_v25 = vld [vmem:[#allocation2 + $0x101] sm:$0xff] }
 0x5af   : > { %v5139_v17 = vpop.f32.mrf.mxu3  ;;  %v5417_v30 = vpop.f32.mrf.mxu0 }
 0x5b0   : > { %v5231_v50 = vadd.f32 %v5139_v17, %v4950_v20  ;;  %v8364_v1 = vadd.f32 %v5417_v30, %v5230_v7  ;;  %5695 = vmatmul.bf16.gmra.mxu1 %v5589_v40  ;;  %v5037_v7 = vpack.c.bf16 %v5010_v25, %v5009_v2  ;;  %v5011_v2 = vld [vmem:[#allocation2 + $0x109] sm:$0xff] }
 0x5b5   : > { %v4639_v4 = vpop.f32.mrf.mxu1  ;;  %v4860_v22 = vpop.f32.mrf.mxu2 }
 0x5b6   : > { %v8367_v37 = vadd.f32 %v4639_v4, %v8261_v12  ;;  %v4951_v10 = vadd.f32 %v4860_v22, %v8202_v43  ;;  %v5553_v12 = vld [vmem:[#allocation2 + $0x6b] sm:$0xff]  ;;  %v5291_v22 = vld [vmem:[#allocation2 + $0x102] sm:$0xff] }
 0x5b7   : > { %v5141_v26 = vpop.f32.mrf.mxu3  ;;  %v5420_v60 = vpop.f32.mrf.mxu0  ;;  %v5590_v17 = vpack.c.bf16 %v5554_v54, %v5553_v12  ;;  %v5556_v54 = vld [vmem:[#allocation2 + $0x83] sm:$0xff] }
 0x5b8   : > { %v5232_v35 = vadd.f32 %v5141_v26, %v4951_v10  ;;  %v8370_v9 = vadd.f32 %v5420_v60, %v5231_v50  ;;  %v5290_v60 = vld [vmem:[#allocation2 + $0xfa] sm:$0xff] }
 0x5ba   : > { %4902 = vmatmul.bf16.gmra.mxu2 %v5036_v36  ;;  %5459 = vmatmul.bf16.gmra.mxu0 %v5317_v49  ;;  %v5318_v49 = vpack.c.bf16 %v5291_v22, %v5290_v60 }
 0x5bc   : > { %5183 = vmatmul.bf16.gmra.mxu3 %v5037_v7 }
 0x5bd   : > { %v4642_v14 = vpop.f32.mrf.mxu1  ;;  %v4863_v47 = vpop.f32.mrf.mxu2 }
 0x5be   : > { %v8373_v57 = vadd.f32 %v4642_v14, %v8269_v18  ;;  %v4952_v43 = vadd.f32 %v4863_v47, %v8210_v48  ;;  %v5012_v18 = vld [vmem:[#allocation2 + $0x111] sm:$0xff] }
 0x5bf   : > { %v5144_v20 = vpop.f32.mrf.mxu3  ;;  %v5422_v40 = vpop.f32.mrf.mxu0 }
 0x5c0   : > { %v5233_v30 = vadd.f32 %v5144_v20, %v4952_v43  ;;  %v8376_v50 = vadd.f32 %v5422_v40, %v5232_v35  ;;  %5700 = vmatmul.bf16.gmra.mxu1 %v5590_v17  ;;  %v5038_v35 = vpack.c.bf16 %v5012_v18, %v5011_v2  ;;  %v5013_v2 = vld [vmem:[#allocation2 + $0x119] sm:$0xff] }
 0x5c5   : > { %v4644_v4 = vpop.f32.mrf.mxu1  ;;  %v4865_v36 = vpop.f32.mrf.mxu2 }
 0x5c6   : > { %v8379_v29 = vadd.f32 %v4644_v4, %v8277_v61  ;;  %v4953_v10 = vadd.f32 %v4865_v36, %v8218_v31  ;;  %v5555_v61 = vld [vmem:[#allocation2 + $0x7b] sm:$0xff]  ;;  %v5293_v36 = vld [vmem:[#allocation2 + $0x112] sm:$0xff] }
 0x5c7   : > { %v5146_v26 = vpop.f32.mrf.mxu3  ;;  %v5425_v25 = vpop.f32.mrf.mxu0  ;;  %v5591_v20 = vpack.c.bf16 %v5556_v54, %v5555_v61  ;;  %v5558_v54 = vld [vmem:[#allocation2 + $0x93] sm:$0xff] }
 0x5c8   : > { %v5234_v48 = vadd.f32 %v5146_v26, %v4953_v10  ;;  %v8382_v23 = vadd.f32 %v5425_v25, %v5233_v30  ;;  %v5292_v25 = vld [vmem:[#allocation2 + $0x10a] sm:$0xff] }
 0x5ca   : > { %4907 = vmatmul.bf16.gmra.mxu2 %v5037_v7  ;;  %5464 = vmatmul.bf16.gmra.mxu0 %v5318_v49  ;;  %v5319_v49 = vpack.c.bf16 %v5293_v36, %v5292_v25 }
 0x5cc   : > { %5188 = vmatmul.bf16.gmra.mxu3 %v5038_v35 }
 0x5cd   : > { %v4647_v14 = vpop.f32.mrf.mxu1  ;;  %v4868_v47 = vpop.f32.mrf.mxu2 }
 0x5ce   : > { %v8385_v12 = vadd.f32 %v4647_v14, %v8285_v62  ;;  %v4954_v31 = vadd.f32 %v4868_v47, %v8226_v56  ;;  %v5014_v62 = vld [vmem:[#allocation2 + $0x121] sm:$0xff] }
 0x5cf   : > { %v5149_v43 = vpop.f32.mrf.mxu3  ;;  %v5427_v17 = vpop.f32.mrf.mxu0 }
 0x5d0   : > { %v5235_v40 = vadd.f32 %v5149_v43, %v4954_v31  ;;  %v8388_v30 = vadd.f32 %v5427_v17, %v5234_v48  ;;  %5705 = vmatmul.bf16.gmra.mxu1 %v5591_v20  ;;  %v5039_v48 = vpack.c.bf16 %v5014_v62, %v5013_v2  ;;  %v5015_v2 = vld [vmem:[#allocation2 + $0x129] sm:$0xff] }
 0x5d5   : > { %v4649_v4 = vpop.f32.mrf.mxu1  ;;  %v4870_v7 = vpop.f32.mrf.mxu2 }
 0x5d6   : > { %v8391_v22 = vadd.f32 %v4649_v4, %v8293_v8  ;;  %v4955_v10 = vadd.f32 %v4870_v7, %v8234_v28  ;;  %v5557_v8 = vld [vmem:[#allocation2 + $0x8b] sm:$0xff]  ;;  %v5295_v7 = vld [vmem:[#allocation2 + $0x122] sm:$0xff] }
 0x5d7   : > { %v5151_v26 = vpop.f32.mrf.mxu3  ;;  %v5430_v18 = vpop.f32.mrf.mxu0  ;;  %v5592_v43 = vpack.c.bf16 %v5558_v54, %v5557_v8  ;;  %v5560_v54 = vld [vmem:[#allocation2 + $0xa3] sm:$0xff] }
 0x5d8   : > { %v5236_v56 = vadd.f32 %v5151_v26, %v4955_v10  ;;  %v8394_v60 = vadd.f32 %v5430_v18, %v5235_v40  ;;  %v5294_v18 = vld [vmem:[#allocation2 + $0x11a] sm:$0xff] }
 0x5da   : > { %4912 = vmatmul.bf16.gmra.mxu2 %v5038_v35  ;;  %5469 = vmatmul.bf16.gmra.mxu0 %v5319_v49  ;;  %v5320_v49 = vpack.c.bf16 %v5295_v7, %v5294_v18 }
 0x5dc   : > { %5193 = vmatmul.bf16.gmra.mxu3 %v5039_v48 }
 0x5dd   : > { %v4652_v14 = vpop.f32.mrf.mxu1  ;;  %v4873_v47 = vpop.f32.mrf.mxu2 }
 0x5de   : > { %v8397_v61 = vadd.f32 %v4652_v14, %v8301_v44  ;;  %v4956_v28 = vadd.f32 %v4873_v47, %v8242_v38  ;;  %v5016_v44 = vld [vmem:[#allocation2 + $0x131] sm:$0xff] }
 0x5df   : > { %v5154_v31 = vpop.f32.mrf.mxu3  ;;  %v5432_v20 = vpop.f32.mrf.mxu0 }
 0x5e0   : > { %v5237_v17 = vadd.f32 %v5154_v31, %v4956_v28  ;;  %v8400_v40 = vadd.f32 %v5432_v20, %v5236_v56  ;;  %5710 = vmatmul.bf16.gmra.mxu1 %v5592_v43  ;;  %v5040_v56 = vpack.c.bf16 %v5016_v44, %v5015_v2 }
 0x5e5   : > { %v4654_v4 = vpop.f32.mrf.mxu1  ;;  %v4875_v35 = vpop.f32.mrf.mxu2 }
 0x5e6   : > { %v8403_v36 = vadd.f32 %v4654_v4, %v8307_v11  ;;  %v4957_v10 = vadd.f32 %v4875_v35, %v8250_v13  ;;  %v5559_v11 = vld [vmem:[#allocation2 + $0x9b] sm:$0xff]  ;;  %v5297_v35 = vld [vmem:[#allocation2 + $0x132] sm:$0xff] }
 0x5e7   : > { %v5156_v26 = vpop.f32.mrf.mxu3  ;;  %v5435_v62 = vpop.f32.mrf.mxu0  ;;  %v5593_v31 = vpack.c.bf16 %v5560_v54, %v5559_v11 }
 0x5e8   : > { %v5238_v38 = vadd.f32 %v5156_v26, %v4957_v10  ;;  %v8406_v25 = vadd.f32 %v5435_v62, %v5237_v17  ;;  %v5018_v26 = vld [vmem:[#allocation2 + $0x141] sm:$0xff] }
 0x5ea   : > { %4917 = vmatmul.bf16.gmra.mxu2 %v5039_v48  ;;  %5474 = vmatmul.bf16.gmra.mxu0 %v5320_v49 }
 0x5ec   : > { %5198 = vmatmul.bf16.gmra.mxu3 %v5040_v56 }
 0x5ed   : > { %v4657_v14 = vpop.f32.mrf.mxu1  ;;  %v4878_v47 = vpop.f32.mrf.mxu2 }
 0x5ee   : > { %v8409_v8 = vadd.f32 %v4657_v14, %v8312_v63  ;;  %v4958_v13 = vadd.f32 %v4878_v47, %v8258_v45  ;;  %v5296_v63 = vld [vmem:[#allocation2 + $0x12a] sm:$0xff]  ;;  %v5017_v45 = vld [vmem:[#allocation2 + $0x139] sm:$0xff] }
 0x5ef   : > { %v5159_v28 = vpop.f32.mrf.mxu3  ;;  %v5437_v43 = vpop.f32.mrf.mxu0  ;;  %v5321_v2 = vpack.c.bf16 %v5297_v35, %v5296_v63  ;;  %v5041_v49 = vpack.c.bf16 %v5018_v26, %v5017_v45  ;;  %v5561_v47 = vld [vmem:[#allocation2 + $0xab] sm:$0xff]  ;;  %v5299_v35 = vld [vmem:[#allocation2 + $0x142] sm:$0xff] }
 0x5f0   : > { %v5239_v20 = vadd.f32 %v5159_v28, %v4958_v13  ;;  %v8412_v17 = vadd.f32 %v5437_v43, %v5238_v38  ;;  %5715 = vmatmul.bf16.gmra.mxu1 %v5593_v31  ;;  %v5562_v38 = vld [vmem:[#allocation2 + $0xb3] sm:$0xff] }
 0x5f1   : > { %v5594_v28 = vpack.c.bf16 %v5562_v38, %v5561_v47 }
 0x5f5   : > { %v4659_v4 = vpop.f32.mrf.mxu1  ;;  %v4880_v48 = vpop.f32.mrf.mxu2 }
 0x5f6   : > { %v4959_v7 = vadd.f32 %v4880_v48, %v8266_v52 }
 0x5f7   : > { %v5161_v10 = vpop.f32.mrf.mxu3  ;;  %v5440_v44 = vpop.f32.mrf.mxu0 }
 0x5f8   : > { %v5240_v62 = vadd.f32 %v5161_v10, %v4959_v7  ;;  %v8415_v18 = vadd.f32 %v5440_v44, %v5239_v20  ;;  %v5020_v10 = vld [vmem:[#allocation2 + $0x151] sm:$0xff]  ;;  %v5298_v44 = vld [vmem:[#allocation2 + $0x13a] sm:$0xff] }
 0x5f9   : > { %v5322_v38 = vpack.c.bf16 %v5299_v35, %v5298_v44  ;;  %v5301_v35 = vld [vmem:[#allocation2 + $0x152] sm:$0xff] }
 0x5fa   : > { %4922 = vmatmul.bf16.gmra.mxu2 %v5040_v56  ;;  %5479 = vmatmul.bf16.gmra.mxu0 %v5321_v2  ;;  %v5019_v2 = vld [vmem:[#allocation2 + $0x149] sm:$0xff] }
 0x5fc   : > { %5203 = vmatmul.bf16.gmra.mxu3 %v5041_v49 }
 0x5fd   : > { %v4883_v54 = vpop.f32.mrf.mxu2  ;;  %v5681_v14 = vpop.f32.mrf.mxu1 }
 0x5fe   : > { %v4960_v52 = vadd.f32 %v4883_v54, %v8274_v27  ;;  %v5785_v13 = vadd.f32 %v5681_v14, %v8322_v32  ;;  %v5042_v54 = vpack.c.bf16 %v5020_v10, %v5019_v2  ;;  %v5564_v14 = vld [vmem:[#allocation2 + $0xc3] sm:$0xff] }
 0x5ff   : > { %v5164_v11 = vpop.f32.mrf.mxu3  ;;  %v5442_v31 = vpop.f32.mrf.mxu0  ;;  %v5022_v10 = vld [vmem:[#allocation2 + $0x161] sm:$0xff] }
 0x600   : > { %v5241_v43 = vadd.f32 %v5164_v11, %v4960_v52  ;;  %v5826_v20 = vmax.f32 %v5785_v13, 0.0  ;;  %v8420_v4 = vadd.f32 %v5442_v31, %v5240_v62  ;;  %5720 = vmatmul.bf16.gmra.mxu1 %v5594_v28  ;;  %v5563_v52 = vld [vmem:[#allocation2 + $0xbb] sm:$0xff] }
 0x601   : > { %v5595_v28 = vpack.c.bf16 %v5564_v14, %v5563_v52  ;;  %v5566_v14 = vld [vmem:[#allocation2 + $0xd3] sm:$0xff] }
 0x602   : > { %5867 = vst [vmem:[%s8422_s4] sm:$0xff] %v5826_v20 }
 0x605   : > { %v4885_v56 = vpop.f32.mrf.mxu2  ;;  %v5683_v48 = vpop.f32.mrf.mxu1 }
 0x606   : > { %v4961_v27 = vadd.f32 %v4885_v56, %v8282_v3  ;;  %v5786_v32 = vadd.f32 %v5683_v48, %v8328_v16 }
 0x607   : > { %v5166_v7 = vpop.f32.mrf.mxu3  ;;  %v5445_v26 = vpop.f32.mrf.mxu0 }
 0x608   : > { %v5242_v63 = vadd.f32 %v5166_v7, %v4961_v27  ;;  %v5827_v62 = vmax.f32 %v5786_v32, 0.0  ;;  %v8427_v45 = vadd.f32 %v5445_v26, %v5241_v43  ;;  %v5021_v32 = vld [vmem:[#allocation2 + $0x159] sm:$0xff]  ;;  %v5300_v26 = vld [vmem:[#allocation2 + $0x14a] sm:$0xff] }
 0x60a   : > { %5868 = vst [vmem:[%s8422_s4 + $0x8] sm:$0xff] %v5827_v62  ;;  %4927 = vmatmul.bf16.gmra.mxu2 %v5041_v49  ;;  %5484 = vmatmul.bf16.gmra.mxu0 %v5322_v38  ;;  %v5043_v38 = vpack.c.bf16 %v5022_v10, %v5021_v32 }
 0x60c   : > { %5208 = vmatmul.bf16.gmra.mxu3 %v5042_v54 }
 0x60d   : > { %v4888_v3 = vpop.f32.mrf.mxu2  ;;  %v5686_v47 = vpop.f32.mrf.mxu1 }
 0x60e   : > { %v4962_v16 = vadd.f32 %v4888_v3, %v8290_v24  ;;  %v5787_v13 = vadd.f32 %v5686_v47, %v8334_v55  ;;  %v5565_v47 = vld [vmem:[#allocation2 + $0xcb] sm:$0xff] }
 0x60f   : > { %v5169_v11 = vpop.f32.mrf.mxu3  ;;  %v5447_v31 = vpop.f32.mrf.mxu0 }
 0x610   : > { %v5243_v43 = vadd.f32 %v5169_v11, %v4962_v16  ;;  %v5828_v20 = vmax.f32 %v5787_v13, 0.0  ;;  %v8432_v56 = vadd.f32 %v5447_v31, %v5242_v63  ;;  %5725 = vmatmul.bf16.gmra.mxu1 %v5595_v28  ;;  %v5323_v63 = vpack.c.bf16 %v5301_v35, %v5300_v26  ;;  %v5303_v35 = vld [vmem:[#allocation2 + $0x162] sm:$0xff] }
 0x611   : > { %v5596_v11 = vpack.c.bf16 %v5566_v14, %v5565_v47 }
 0x612   : > { %5869 = vst [vmem:[%s8422_s4 + $0x10] sm:$0xff] %v5828_v20 }
 0x615   : > { %v4890_v49 = vpop.f32.mrf.mxu2  ;;  %v5688_v48 = vpop.f32.mrf.mxu1 }
 0x616   : > { %v4963_v27 = vadd.f32 %v4890_v49, %v8298_v41  ;;  %v5788_v24 = vadd.f32 %v5688_v48, %v8340_v39  ;;  %v5302_v48 = vld [vmem:[#allocation2 + $0x15a] sm:$0xff] }
 0x617   : > { %v5171_v7 = vpop.f32.mrf.mxu3  ;;  %v5450_v55 = vpop.f32.mrf.mxu0 }
 0x618   : > { %v5244_v44 = vadd.f32 %v5171_v7, %v4963_v27  ;;  %v5829_v62 = vmax.f32 %v5788_v24, 0.0  ;;  %v8437_v2 = vadd.f32 %v5450_v55, %v5243_v43  ;;  %v4763_v24 = vpack.c.bf16 %v5021_v32, %v5021_v32 }
 0x61a   : > { %5870 = vst [vmem:[%s8422_s4 + $0x18] sm:$0xff] %v5829_v62  ;;  %4932 = vmatmul.bf16.gmra.mxu2 %v5042_v54  ;;  %5489 = vmatmul.bf16.gmra.mxu0 %v5323_v63  ;;  %v5023_v54 = vld [vmem:[#allocation2 + $0x169] sm:$0xff]  ;;  %v5324_v62 = vpack.c.bf16 %v5303_v35, %v5302_v48 }
 0x61b   : > { %v5044_v10 = vpack.c.bf16 %v5023_v54, %v5023_v54  ;;  %v5568_v63 = vld [vmem:[#allocation2 + $0xe3] sm:$0xff] }
 0x61c   : > { %5213 = vmatmul.bf16.gmra.mxu3 %v5043_v38 }
 0x61d   : > { %v4893_v41 = vpop.f32.mrf.mxu2  ;;  %v5691_v3 = vpop.f32.mrf.mxu1 }
 0x61e   : > { %v4964_v39 = vadd.f32 %v4893_v41, %v8305_v58  ;;  %v5789_v16 = vadd.f32 %v5691_v3, %v8346_v15 }
 0x61f   : > { %v5174_v52 = vpop.f32.mrf.mxu3  ;;  %v5452_v13 = vpop.f32.mrf.mxu0 }
 0x620   : > { %v5245_v28 = vadd.f32 %v5174_v52, %v4964_v39  ;;  %v5830_v31 = vmax.f32 %v5789_v16, 0.0  ;;  %v8442_v43 = vadd.f32 %v5452_v13, %v5244_v44  ;;  %5730 = vmatmul.bf16.gmra.mxu1 %v5596_v11  ;;  %v5304_v11 = vld [vmem:[#allocation2 + $0x16a] sm:$0xff] }
 0x622   : > { %5871 = vst [vmem:[%s8422_s4 + $0x20] sm:$0xff] %v5830_v31 }
 0x625   : > { %v4895_v20 = vpop.f32.mrf.mxu2  ;;  %v5693_v49 = vpop.f32.mrf.mxu1 }
 0x626   : > { %v4965_v27 = vadd.f32 %v4895_v20, %v8310_v5  ;;  %v5790_v7 = vadd.f32 %v5693_v49, %v8352_v34  ;;  %v5567_v5 = vld [vmem:[#allocation2 + $0xdb] sm:$0xff]  ;;  %v5325_v20 = vpack.c.bf16 %v5304_v11, %v5304_v11 }
 0x627   : > { %v5176_v58 = vpop.f32.mrf.mxu3  ;;  %v5455_v15 = vpop.f32.mrf.mxu0  ;;  %v5597_v3 = vpack.c.bf16 %v5568_v63, %v5567_v5  ;;  %v5571_v11 = vld [vmem:[#allocation2 + $0xfb] sm:$0xff] }
 0x628   : > { %v5246_v55 = vadd.f32 %v5176_v58, %v4965_v27  ;;  %v5831_v26 = vmax.f32 %v5790_v7, 0.0  ;;  %v8447_v44 = vadd.f32 %v5455_v15, %v5245_v28  ;;  %v5570_v27 = vld [vmem:[#allocation2 + $0xf3] sm:$0xff]  ;;  %v5569_v15 = vld [vmem:[#allocation2 + $0xeb] sm:$0xff] }
 0x62a   : > { %5872 = vst [vmem:[%s8422_s4 + $0x28] sm:$0xff] %v5831_v26  ;;  %4937 = vmatmul.bf16.gmra.mxu2 %v4763_v24  ;;  %5494 = vmatmul.bf16.gmra.mxu0 %v5324_v62 }
 0x62c   : > { %5218 = vmatmul.bf16.gmra.mxu3 %v5044_v10 }
 0x62d   : > { %v4898_v38 = vpop.f32.mrf.mxu2  ;;  %v5696_v14 = vpop.f32.mrf.mxu1 }
 0x62e   : > { %v4966_v41 = vadd.f32 %v4898_v38, %v8315_v0  ;;  %v5791_v32 = vadd.f32 %v5696_v14, %v8358_v59 }
 0x62f   : > { %v5179_v34 = vpop.f32.mrf.mxu3  ;;  %v5457_v47 = vpop.f32.mrf.mxu0 }
 0x630   : > { %v5247_v39 = vadd.f32 %v5179_v34, %v4966_v41  ;;  %v5832_v52 = vmax.f32 %v5791_v32, 0.0  ;;  %v8452_v16 = vadd.f32 %v5457_v47, %v5246_v55  ;;  %5735 = vmatmul.bf16.gmra.mxu1 %v5597_v3  ;;  %v5598_v55 = vpack.c.bf16 %v5570_v27, %v5569_v15  ;;  %v5572_v47 = vld [vmem:[#allocation2 + $0x103] sm:$0xff] }
 0x632   : > { %5873 = vst [vmem:[%s8422_s4 + $0x30] sm:$0xff] %v5832_v52 }
 0x635   : > { %v4900_v13 = vpop.f32.mrf.mxu2  ;;  %v5698_v28 = vpop.f32.mrf.mxu1 }
 0x636   : > { %v4967_v31 = vadd.f32 %v4900_v13, %v8319_v46  ;;  %v5792_v0 = vadd.f32 %v5698_v28, %v8364_v1 }
 0x637   : > { %v5181_v54 = vpop.f32.mrf.mxu3  ;;  %v5460_v49 = vpop.f32.mrf.mxu0 }
 0x638   : > { %v5248_v59 = vadd.f32 %v5181_v54, %v4967_v31  ;;  %v5833_v48 = vmax.f32 %v5792_v0, 0.0  ;;  %v8457_v35 = vadd.f32 %v5460_v49, %v5247_v39 }
 0x63a   : > { %5874 = vst [vmem:[%s8422_s4 + $0x38] sm:$0xff] %v5833_v48  ;;  %5499 = vmatmul.bf16.gmra.mxu0 %v5325_v20 }
 0x63d   : > { %v4903_v58 = vpop.f32.mrf.mxu2  ;;  %v5701_v7 = vpop.f32.mrf.mxu1 }
 0x63e   : > { %v4968_v24 = vadd.f32 %v4903_v58, %v8325_v19  ;;  %v5793_v46 = vadd.f32 %v5701_v7, %v8370_v9 }
 0x63f   : > { %v5184_v10 = vpop.f32.mrf.mxu3  ;;  %v5462_v1 = vpop.f32.mrf.mxu0 }
 0x640   : > { %v5249_v26 = vadd.f32 %v5184_v10, %v4968_v24  ;;  %v5834_v62 = vmax.f32 %v5793_v46, 0.0  ;;  %v8462_v63 = vadd.f32 %v5462_v1, %v5248_v59  ;;  %5740 = vmatmul.bf16.gmra.mxu1 %v5598_v55  ;;  %v5574_v24 = vld [vmem:[#allocation2 + $0x113] sm:$0xff]  ;;  %v5573_v55 = vld [vmem:[#allocation2 + $0x10b] sm:$0xff] }
 0x642   : > { %5875 = vst [vmem:[%s8422_s4 + $0x40] sm:$0xff] %v5834_v62 }
 0x645   : > { %v4905_v38 = vpop.f32.mrf.mxu2  ;;  %v5703_v14 = vpop.f32.mrf.mxu1 }
 0x646   : > { %v4969_v5 = vadd.f32 %v4905_v38, %v8331_v51  ;;  %v5794_v34 = vadd.f32 %v5703_v14, %v8376_v50  ;;  %v5599_v51 = vpack.c.bf16 %v5572_v47, %v5571_v11 }
 0x647   : > { %v5186_v41 = vpop.f32.mrf.mxu3  ;;  %v5465_v19 = vpop.f32.mrf.mxu0 }
 0x648   : > { %v5250_v32 = vadd.f32 %v5186_v41, %v4969_v5  ;;  %v5835_v3 = vmax.f32 %v5794_v34, 0.0  ;;  %v8467_v9 = vadd.f32 %v5465_v19, %v5249_v26 }
 0x64a   : > { %5876 = vst [vmem:[%s8422_s4 + $0x48] sm:$0xff] %v5835_v3 }
 0x64d   : > { %v4908_v39 = vpop.f32.mrf.mxu2  ;;  %v5706_v52 = vpop.f32.mrf.mxu1 }
 0x64e   : > { %v4970_v13 = vadd.f32 %v4908_v39, %v8337_v42  ;;  %v5795_v31 = vadd.f32 %v5706_v52, %v8382_v23  ;;  %v5576_v52 = vld [vmem:[#allocation2 + $0x123] sm:$0xff] }
 0x64f   : > { %v5189_v28 = vpop.f32.mrf.mxu3  ;;  %v5467_v54 = vpop.f32.mrf.mxu0 }
 0x650   : > { %v5251_v50 = vadd.f32 %v5189_v28, %v4970_v13  ;;  %v5836_v0 = vmax.f32 %v5795_v31, 0.0  ;;  %v8472_v20 = vadd.f32 %v5467_v54, %v5250_v32  ;;  %5745 = vmatmul.bf16.gmra.mxu1 %v5599_v51  ;;  %v5575_v28 = vld [vmem:[#allocation2 + $0x11b] sm:$0xff] }
 0x652   : > { %5877 = vst [vmem:[%s8422_s4 + $0x50] sm:$0xff] %v5836_v0 }
 0x655   : > { %v4910_v49 = vpop.f32.mrf.mxu2  ;;  %v5708_v59 = vpop.f32.mrf.mxu1 }
 0x656   : > { %v4971_v48 = vadd.f32 %v4910_v49, %v8343_v6  ;;  %v5796_v58 = vadd.f32 %v5708_v59, %v8388_v30  ;;  %v5600_v6 = vpack.c.bf16 %v5574_v24, %v5573_v55  ;;  %v5578_v24 = vld [vmem:[#allocation2 + $0x133] sm:$0xff]  ;;  %v5577_v55 = vld [vmem:[#allocation2 + $0x12b] sm:$0xff] }
 0x657   : > { %v5191_v27 = vpop.f32.mrf.mxu3  ;;  %v5470_v42 = vpop.f32.mrf.mxu0 }
 0x658   : > { %v5252_v7 = vadd.f32 %v5191_v27, %v4971_v48  ;;  %v5837_v15 = vmax.f32 %v5796_v58, 0.0  ;;  %v8477_v23 = vadd.f32 %v5470_v42, %v5251_v50 }
 0x65a   : > { %5878 = vst [vmem:[%s8422_s4 + $0x58] sm:$0xff] %v5837_v15 }
 0x65d   : > { %v4913_v10 = vpop.f32.mrf.mxu2  ;;  %v5711_v46 = vpop.f32.mrf.mxu1 }
 0x65e   : > { %v4972_v1 = vadd.f32 %v4913_v10, %v8349_v53  ;;  %v5797_v62 = vadd.f32 %v5711_v46, %v8394_v60 }
 0x65f   : > { %v5194_v26 = vpop.f32.mrf.mxu3  ;;  %v5472_v38 = vpop.f32.mrf.mxu0 }
 0x660   : > { %v5253_v30 = vadd.f32 %v5194_v26, %v4972_v1  ;;  %v5838_v14 = vmax.f32 %v5797_v62, 0.0  ;;  %v8482_v5 = vadd.f32 %v5472_v38, %v5252_v7  ;;  %5750 = vmatmul.bf16.gmra.mxu1 %v5600_v6 }
 0x662   : > { %5879 = vst [vmem:[%s8422_s4 + $0x60] sm:$0xff] %v5838_v14 }
 0x665   : > { %v4915_v41 = vpop.f32.mrf.mxu2  ;;  %v5713_v34 = vpop.f32.mrf.mxu1 }
 0x666   : > { %v4973_v19 = vadd.f32 %v4915_v41, %v8355_v33  ;;  %v5798_v3 = vadd.f32 %v5713_v34, %v8400_v40  ;;  %v5601_v33 = vpack.c.bf16 %v5576_v52, %v5575_v28 }
 0x667   : > { %v5196_v32 = vpop.f32.mrf.mxu3  ;;  %v5475_v53 = vpop.f32.mrf.mxu0 }
 0x668   : > { %v5254_v47 = vadd.f32 %v5196_v32, %v4973_v19  ;;  %v5839_v39 = vmax.f32 %v5798_v3, 0.0  ;;  %v8487_v60 = vadd.f32 %v5475_v53, %v5253_v30 }
 0x66a   : > { %5880 = vst [vmem:[%s8422_s4 + $0x68] sm:$0xff] %v5839_v39 }
 0x66d   : > { %v4918_v11 = vpop.f32.mrf.mxu2  ;;  %v5716_v13 = vpop.f32.mrf.mxu1 }
 0x66e   : > { %v4974_v31 = vadd.f32 %v4918_v11, %v8361_v21  ;;  %v5799_v54 = vadd.f32 %v5716_v13, %v8406_v25  ;;  %v5579_v11 = vld [vmem:[#allocation2 + $0x13b] sm:$0xff] }
 0x66f   : > { %v5199_v51 = vpop.f32.mrf.mxu3  ;;  %v5477_v50 = vpop.f32.mrf.mxu0 }
 0x670   : > { %v5255_v40 = vadd.f32 %v5199_v51, %v4974_v31  ;;  %v5840_v0 = vmax.f32 %v5799_v54, 0.0  ;;  %v8492_v49 = vadd.f32 %v5477_v50, %v5254_v47  ;;  %5755 = vmatmul.bf16.gmra.mxu1 %v5601_v33  ;;  %v5580_v47 = vld [vmem:[#allocation2 + $0x143] sm:$0xff] }
 0x672   : > { %5881 = vst [vmem:[%s8422_s4 + $0x70] sm:$0xff] %v5840_v0 }
 0x675   : > { %v4920_v59 = vpop.f32.mrf.mxu2  ;;  %v5718_v48 = vpop.f32.mrf.mxu1 }
 0x676   : > { %v4975_v27 = vadd.f32 %v4920_v59, %v8367_v37  ;;  %v5800_v42 = vadd.f32 %v5718_v48, %v8412_v17  ;;  %v5602_v37 = vpack.c.bf16 %v5578_v24, %v5577_v55 }
 0x677   : > { %v5201_v58 = vpop.f32.mrf.mxu3  ;;  %v5480_v21 = vpop.f32.mrf.mxu0 }
 0x678   : > { %v5256_v7 = vadd.f32 %v5201_v58, %v4975_v27  ;;  %v5841_v15 = vmax.f32 %v5800_v42, 0.0  ;;  %v8497_v25 = vadd.f32 %v5480_v21, %v5255_v40  ;;  %v5582_v42 = vld [vmem:[#allocation2 + $0x153] sm:$0xff] }
 0x67a   : > { %5882 = vst [vmem:[%s8422_s4 + $0x78] sm:$0xff] %v5841_v15  ;;  %v5581_v15 = vld [vmem:[#allocation2 + $0x14b] sm:$0xff] }
 0x67d   : > { %v4923_v10 = vpop.f32.mrf.mxu2  ;;  %v5721_v46 = vpop.f32.mrf.mxu1 }
 0x67e   : > { %v4976_v1 = vadd.f32 %v4923_v10, %v8373_v57  ;;  %v5801_v62 = vadd.f32 %v5721_v46, %v8415_v18 }
 0x67f   : > { %v5204_v26 = vpop.f32.mrf.mxu3  ;;  %v5482_v6 = vpop.f32.mrf.mxu0 }
 0x680   : > { %v5257_v17 = vadd.f32 %v5204_v26, %v4976_v1  ;;  %v5842_v38 = vmax.f32 %v5801_v62, 0.0  ;;  %v8502_v30 = vadd.f32 %v5482_v6, %v5256_v7  ;;  %5760 = vmatmul.bf16.gmra.mxu1 %v5602_v37 }
 0x682   : > { %5883 = vst [vmem:[%s8422_s4 + $0x80] sm:$0xff] %v5842_v38 }
 0x685   : > { %v4925_v14 = vpop.f32.mrf.mxu2  ;;  %v5723_v41 = vpop.f32.mrf.mxu1 }
 0x686   : > { %v4977_v34 = vadd.f32 %v4925_v14, %v8379_v29  ;;  %v5802_v32 = vadd.f32 %v5723_v41, %v8420_v4  ;;  %v5603_v29 = vpack.c.bf16 %v5580_v47, %v5579_v11 }
 0x687   : > { %v5206_v19 = vpop.f32.mrf.mxu3  ;;  %v5485_v57 = vpop.f32.mrf.mxu0 }
 0x688   : > { %v5258_v3 = vadd.f32 %v5206_v19, %v4977_v34  ;;  %v5843_v53 = vmax.f32 %v5802_v32, 0.0  ;;  %v8507_v18 = vadd.f32 %v5485_v57, %v5257_v17  ;;  %v5583_v34 = vld [vmem:[#allocation2 + $0x15b] sm:$0xff]  ;;  %v5584_v19 = vld [vmem:[#allocation2 + $0x163] sm:$0xff] }
 0x68a   : > { %5884 = vst [vmem:[%s8422_s4 + $0x88] sm:$0xff] %v5843_v53 }
 0x68d   : > { %v4928_v39 = vpop.f32.mrf.mxu2  ;;  %v5726_v52 = vpop.f32.mrf.mxu1 }
 0x68e   : > { %v4978_v13 = vadd.f32 %v4928_v39, %v8385_v12  ;;  %v5803_v31 = vadd.f32 %v5726_v52, %v8427_v45 }
 0x68f   : > { %v5209_v28 = vpop.f32.mrf.mxu3  ;;  %v5487_v51 = vpop.f32.mrf.mxu0 }
 0x690   : > { %v5259_v4 = vadd.f32 %v5209_v28, %v4978_v13  ;;  %v5844_v54 = vmax.f32 %v5803_v31, 0.0  ;;  %v8512_v33 = vadd.f32 %v5487_v51, %v5258_v3  ;;  %5765 = vmatmul.bf16.gmra.mxu1 %v5603_v29 }
 0x692   : > { %5885 = vst [vmem:[%s8422_s4 + $0x90] sm:$0xff] %v5844_v54 }
 0x695   : > { %v4930_v50 = vpop.f32.mrf.mxu2  ;;  %v5728_v40 = vpop.f32.mrf.mxu1 }
 0x696   : > { %v4979_v0 = vadd.f32 %v4930_v50, %v8391_v22  ;;  %v5804_v48 = vadd.f32 %v5728_v40, %v8432_v56  ;;  %v5604_v22 = vpack.c.bf16 %v5582_v42, %v5581_v15 }
 0x697   : > { %v5211_v59 = vpop.f32.mrf.mxu3  ;;  %v5490_v12 = vpop.f32.mrf.mxu0 }
 0x698   : > { %v5260_v27 = vadd.f32 %v5211_v59, %v4979_v0  ;;  %v5845_v58 = vmax.f32 %v5804_v48, 0.0  ;;  %v8517_v45 = vadd.f32 %v5490_v12, %v5259_v4  ;;  %v5585_v4 = vld [vmem:[#allocation2 + $0x16b] sm:$0xff] }
 0x699   : > { %v5606_v54 = vpack.c.bf16 %v5585_v4, %v5585_v4 }
 0x69a   : > { %5886 = vst [vmem:[%s8422_s4 + $0x98] sm:$0xff] %v5845_v58 }
 0x69d   : > { %v4933_v21 = vpop.f32.mrf.mxu2  ;;  %v5731_v7 = vpop.f32.mrf.mxu1 }
 0x69e   : > { %v4980_v24 = vadd.f32 %v4933_v21, %v8397_v61  ;;  %v5805_v46 = vadd.f32 %v5731_v7, %v8437_v2 }
 0x69f   : > { %v5214_v10 = vpop.f32.mrf.mxu3  ;;  %v5492_v55 = vpop.f32.mrf.mxu0 }
 0x6a0   : > { %v5261_v56 = vadd.f32 %v5214_v10, %v4980_v24  ;;  %v5846_v1 = vmax.f32 %v5805_v46, 0.0  ;;  %v8522_v26 = vadd.f32 %v5492_v55, %v5260_v27  ;;  %5770 = vmatmul.bf16.gmra.mxu1 %v5604_v22 }
 0x6a2   : > { %5887 = vst [vmem:[%s8422_s4 + $0xa0] sm:$0xff] %v5846_v1 }
 0x6a5   : > { %v4935_v62 = vpop.f32.mrf.mxu2  ;;  %v5733_v37 = vpop.f32.mrf.mxu1 }
 0x6a6   : > { %v4981_v6 = vadd.f32 %v4935_v62, %v8403_v36  ;;  %v5806_v38 = vadd.f32 %v5733_v37, %v8442_v43  ;;  %v5605_v36 = vpack.c.bf16 %v5584_v19, %v5583_v34 }
 0x6a7   : > { %v5216_v17 = vpop.f32.mrf.mxu3  ;;  %v5495_v61 = vpop.f32.mrf.mxu0 }
 0x6a8   : > { %v5262_v14 = vadd.f32 %v5216_v17, %v4981_v6  ;;  %v5847_v41 = vmax.f32 %v5806_v38, 0.0  ;;  %v8527_v2 = vadd.f32 %v5495_v61, %v5261_v56 }
 0x6aa   : > { %5888 = vst [vmem:[%s8422_s4 + $0xa8] sm:$0xff] %v5847_v41 }
 0x6ad   : > { %v4938_v32 = vpop.f32.mrf.mxu2  ;;  %v5736_v57 = vpop.f32.mrf.mxu1 }
 0x6ae   : > { %v4982_v3 = vadd.f32 %v4938_v32, %v8409_v8  ;;  %v5807_v53 = vadd.f32 %v5736_v57, %v8447_v44 }
 0x6af   : > { %v5219_v47 = vpop.f32.mrf.mxu3  ;;  %v5497_v39 = vpop.f32.mrf.mxu0 }
 0x6b0   : > { %v5848_v43 = vmax.f32 %v5807_v53, 0.0  ;;  %v5263_v52 = vadd.f32 %v5219_v47, %v4982_v3  ;;  %v8532_v11 = vadd.f32 %v5497_v39, %v5262_v14  ;;  %5775 = vmatmul.bf16.gmra.mxu1 %v5605_v36 }
 0x6b2   : > { %5889 = vst [vmem:[%s8422_s4 + $0xb0] sm:$0xff] %v5848_v43 }
 0x6b5   : > { %v4940_v13 = vpop.f32.mrf.mxu2  ;;  %v5738_v28 = vpop.f32.mrf.mxu1 }
 0x6b6   : > { %v5808_v31 = vadd.f32 %v5738_v28, %v8452_v16 }
 0x6b7   : > { %v5221_v29 = vpop.f32.mrf.mxu3  ;;  %v5500_v8 = vpop.f32.mrf.mxu0 }
 0x6b8   : > { %v5849_v51 = vmax.f32 %v5808_v31, 0.0  ;;  %v8536_v44 = vadd.f32 %v5500_v8, %v5263_v52 }
 0x6ba   : > { %5890 = vst [vmem:[%s8422_s4 + $0xb8] sm:$0xff] %v5849_v51 }
 0x6bd   : > { %v5741_v50 = vpop.f32.mrf.mxu1 }
 0x6be   : > { %v5809_v40 = vadd.f32 %v5741_v50, %v8457_v35 }
 0x6bf   : > { %v5502_v0 = vpop.f32.mrf.mxu0 }
 0x6c0   : > { %v5850_v59 = vmax.f32 %v5809_v40, 0.0  ;;  %5780 = vmatmul.bf16.gmra.mxu1 %v5606_v54 }
 0x6c2   : > { %5891 = vst [vmem:[%s8422_s4 + $0xc0] sm:$0xff] %v5850_v59 }
 0x6c5   : > { %v5743_v16 = vpop.f32.mrf.mxu1 }
 0x6c6   : > { %v5810_v48 = vadd.f32 %v5743_v16, %v8462_v63 }
 0x6c8   : > { %v5851_v12 = vmax.f32 %v5810_v48, 0.0 }
 0x6ca   : > { %5892 = vst [vmem:[%s8422_s4 + $0xc8] sm:$0xff] %v5851_v12 }
 0x6cd   : > { %v5746_v27 = vpop.f32.mrf.mxu1 }
 0x6ce   : > { %v5811_v58 = vadd.f32 %v5746_v27, %v8467_v9 }
 0x6d0   : > { %v5852_v42 = vmax.f32 %v5811_v58, 0.0 }
 0x6d2   : > { %5893 = vst [vmem:[%s8422_s4 + $0xd0] sm:$0xff] %v5852_v42 }
 0x6d5   : > { %v5748_v21 = vpop.f32.mrf.mxu1 }
 0x6d6   : > { %v5812_v35 = vadd.f32 %v5748_v21, %v8472_v20 }
 0x6d8   : > { %v5853_v7 = vmax.f32 %v5812_v35, 0.0 }
 0x6da   : > { %5894 = vst [vmem:[%s8422_s4 + $0xd8] sm:$0xff] %v5853_v7 }
 0x6dd   : > { %v5751_v15 = vpop.f32.mrf.mxu1 }
 0x6de   : > { %v5813_v24 = vadd.f32 %v5751_v15, %v8477_v23 }
 0x6e0   : > { %v5854_v10 = vmax.f32 %v5813_v24, 0.0 }
 0x6e2   : > { %5895 = vst [vmem:[%s8422_s4 + $0xe0] sm:$0xff] %v5854_v10 }
 0x6e5   : > { %v5753_v63 = vpop.f32.mrf.mxu1 }
 0x6e6   : > { %v5814_v46 = vadd.f32 %v5753_v63, %v8482_v5 }
 0x6e8   : > { %v5855_v22 = vmax.f32 %v5814_v46, 0.0 }
 0x6ea   : > { %5896 = vst [vmem:[%s8422_s4 + $0xe8] sm:$0xff] %v5855_v22 }
 0x6ed   : > { %v5756_v9 = vpop.f32.mrf.mxu1 }
 0x6ee   : > { %v5815_v55 = vadd.f32 %v5756_v9, %v8487_v60 }
 0x6f0   : > { %v5856_v56 = vmax.f32 %v5815_v55, 0.0 }
 0x6f2   : > { %5897 = vst [vmem:[%s8422_s4 + $0xf0] sm:$0xff] %v5856_v56 }
 0x6f5   : > { %v5758_v20 = vpop.f32.mrf.mxu1 }
 0x6f6   : > { %v5816_v1 = vadd.f32 %v5758_v20, %v8492_v49 }
 0x6f8   : > { %v5857_v62 = vmax.f32 %v5816_v1, 0.0 }
 0x6fa   : > { %5898 = vst [vmem:[%s8422_s4 + $0xf8] sm:$0xff] %v5857_v62 }
 0x6fd   : > { %v5761_v23 = vpop.f32.mrf.mxu1 }
 0x6fe   : > { %v5817_v37 = vadd.f32 %v5761_v23, %v8497_v25 }
 0x700   : > { %v5858_v6 = vmax.f32 %v5817_v37, 0.0 }
 0x702   : > { %5899 = vst [vmem:[%s8422_s4 + $0x100] sm:$0xff] %v5858_v6 }
 0x705   : > { %v5763_v5 = vpop.f32.mrf.mxu1 }
 0x706   : > { %v5818_v17 = vadd.f32 %v5763_v5, %v8502_v30 }
 0x708   : > { %v5859_v38 = vmax.f32 %v5818_v17, 0.0 }
 0x70a   : > { %5900 = vst [vmem:[%s8422_s4 + $0x108] sm:$0xff] %v5859_v38 }
 0x70d   : > { %v5766_v60 = vpop.f32.mrf.mxu1 }
 0x70e   : > { %v5819_v61 = vadd.f32 %v5766_v60, %v8507_v18 }
 0x710   : > { %v5860_v14 = vmax.f32 %v5819_v61, 0.0 }
 0x712   : > { %5901 = vst [vmem:[%s8422_s4 + $0x110] sm:$0xff] %v5860_v14 }
 0x715   : > { %v5768_v49 = vpop.f32.mrf.mxu1 }
 0x716   : > { %v5820_v41 = vadd.f32 %v5768_v49, %v8512_v33 }
 0x718   : > { %v5861_v25 = vmax.f32 %v5820_v41, 0.0 }
 0x71a   : > { %5902 = vst [vmem:[%s8422_s4 + $0x118] sm:$0xff] %v5861_v25 }
 0x71d   : > { %v5771_v34 = vpop.f32.mrf.mxu1 }
 0x71e   : > { %v5821_v19 = vadd.f32 %v5771_v34, %v8517_v45 }
 0x720   : > { %v5862_v30 = vmax.f32 %v5821_v19, 0.0 }
 0x722   : > { %5903 = vst [vmem:[%s8422_s4 + $0x120] sm:$0xff] %v5862_v30 }
 0x725   : > { %v5773_v32 = vpop.f32.mrf.mxu1 }
 0x726   : > { %v5822_v57 = vadd.f32 %v5773_v32, %v8522_v26 }
 0x728   : > { %v5863_v18 = vmax.f32 %v5822_v57, 0.0 }
 0x72a   : > { %5904 = vst [vmem:[%s8422_s4 + $0x128] sm:$0xff] %v5863_v18 }
 0x72d   : > { %v5776_v3 = vpop.f32.mrf.mxu1 }
 0x72e   : > { %v5823_v53 = vadd.f32 %v5776_v3, %v8527_v2 }
 0x730   : > { %v5864_v33 = vmax.f32 %v5823_v53, 0.0 }
 0x732   : > { %5905 = vst [vmem:[%s8422_s4 + $0x130] sm:$0xff] %v5864_v33 }
 0x735   : > { %v5778_v47 = vpop.f32.mrf.mxu1 }
 0x736   : > { %v5824_v45 = vadd.f32 %v5778_v47, %v8532_v11 }
 0x738   : > { %v5865_v36 = vmax.f32 %v5824_v45, 0.0 }
 0x73a   : > { %5906 = vst [vmem:[%s8422_s4 + $0x138] sm:$0xff] %v5865_v36 }
 0x73d   : > { %v5781_v26 = vpop.f32.mrf.mxu1 }
 0x73e   : > { %v5825_v2 = vadd.f32 %v5781_v26, %v8536_v44 }
 0x740   : > { %v5866_v39 = vmax.f32 %v5825_v2, 0.0 }
 0x742   : > { %5907 = vst [vmem:[%s8422_s4 + $0x140] sm:$0xff] %v5866_v39 }
 0x743   : > { %6967 = shalt.err (!%p6964_p10)
}
 0x744   : > { %s7020_s2 = smov 128   ;;  %s7021_s7 = smov 8  }
 0x745   : > { %6779 = dma.vmem_to_hbm [thread:$0]  (%p7123_p3), %s5922_s15, 5248, %s5924_s16, %s5909_s17, %s7020_s2, %s7020_s2, %s7021_s7   ;;  %v5783_v43 = vpop.f32.mrf.mxu1 }
 0x746 PF: > { %s5938_s14 = sand.u32 1, %s6998_s21   ;;  %p8641_p12 = scmp.ge.s32.totalorder %s7010_s24, 2 }
 0x747   : > { %s5939_s4 = scalar_lea.sflag [#allocation5], %s5938_s14 }
 0x748   : > { %p6793_p13 = pnand %p8641_p12, %p7092_p6 }
 0x74a   : > { %p6794_p0 = pneg %p6793_p13 }
 0x74c   : > { %6993 = dma.done.wait (%p6794_p0), %s5939_s4, 5248  }
 0x74d   : > { %6995 = vsyncadd (%p6794_p0), %s5939_s4, 4294962048  ;;  %p20_p5 = scmp.ge.s32.totalorder %s7113_s18, 4   ;;  %s8642_s21 = smov %s7002_s22 }
 0x74e   : > { %s8643_s22 = smov %s7006_s23  ;;  %s8644_s23 = smov %s7129_s29 }
 0x74f   : > { %s8645_s24 = smov %s7113_s18  ;;  %22 = sbr.rel (!%p20_p5) target bundleno = 9 (0x9), region = 113 }
 0x754   :  { %5945 = vsyncpa [#allocation4], 1 }
 0x755   :  { %5947 = vsyncpa [#allocation4 + $0x1], 1 }
 0x756   :  { %5948 = vsyncpa [#allocation7], 1 }
 0x757   :  { %5949 = vsyncpa [#allocation5], 1 }
 0x758   :  { %5951 = vsyncpa [#allocation5 + $0x1], 1 }

</bundles_post_ra>
